<compile_context>
chip_gen: v6e
topology: v6e:2x2x1
jax: 0.10.0
libtpu: 0.0.40
codegen_flags: <defaults>
</compile_context>

<pallas_src>
import functools

import numpy as np
import jax
import jax.numpy as jnp
from jax.experimental import pallas as pl
from jax.experimental.pallas import tpu as pltpu


# ---------------------------------------------------------------------------
# Fused Pallas kernel: 3 x LSTM layer + final Linear, single program (no grid)
# ---------------------------------------------------------------------------
def _fused_lstm_fc_kernel(x_ref, *refs, T, B, H, num_layers):
    """Fused multi-layer LSTM + FC.

    x_ref : (T*B, D) time-major flattened input, bf16, fully resident in VMEM.
    refs  : per layer (w_ih_t (Din,4H) bf16, w_hh_t (H,4H) bf16, b (1,4H) f32),
            then fc_w_t (H,O) bf16, fc_b (1,O) f32, out_ref (B,O) f32,
            then scratch xw_buf (T*B,4H) f32, h_buf (T*B,H) f32.
    Gate column order is pre-permuted to [i, f, o, g] (PyTorch order is [i,f,g,o]).
    """
    layer_refs = [refs[3 * l: 3 * l + 3] for l in range(num_layers)]
    fcw_ref = refs[3 * num_layers]
    fcb_ref = refs[3 * num_layers + 1]
    out_ref = refs[3 * num_layers + 2]
    xw_buf = refs[3 * num_layers + 3]     # (T*B, 4H) f32 scratch
    h_buf = refs[3 * num_layers + 4]      # (T*B, H)  f32 scratch

    # ---- layer 0 input projection: ONE batched matmul + one bias add.
    xw_buf[...] = (jnp.dot(x_ref[...], layer_refs[0][0][...],
                           preferred_element_type=jnp.float32)
                   + layer_refs[0][2][...])

    h_last = None
    for l in range(num_layers):
        w_hh_ref = layer_refs[l][1]       # keep as Ref; index at the use site

        h = jnp.zeros((B, H), jnp.float32)
        c = jnp.zeros((B, H), jnp.float32)

        # Statically unrolled time loop: the h/c recurrence is the only
        # serialization; per step only the recurrent matmul + gate math.
        for t in range(T):
            gates = (xw_buf[pl.ds(t * B, B), :]
                     + jnp.dot(h.astype(jnp.bfloat16), w_hh_ref[...],
                               preferred_element_type=jnp.float32))
            # Columns are [i, f, o, g]: one sigmoid over 3H, one tanh over H.
            s = jax.nn.sigmoid(gates[:, 0:3 * H])
            g = jnp.tanh(gates[:, 3 * H:4 * H])
            i = s[:, 0:H]
            f = s[:, H:2 * H]
            o = s[:, 2 * H:3 * H]
            c = f * c + i * g
            h = o * jnp.tanh(c)
            if l + 1 < num_layers:
                h_buf[pl.ds(t * B, B), :] = h

        if l + 1 < num_layers:
            # Next layer's input projection: ONE batched matmul at the layer
            # boundary (off the recurrence critical path, no per-step MRF pops).
            xw_buf[...] = (jnp.dot(h_buf[...].astype(jnp.bfloat16),
                                   layer_refs[l + 1][0][...],
                                   preferred_element_type=jnp.float32)
                           + layer_refs[l + 1][2][...])
        h_last = h

    # ---- final Linear on the last time step of the top layer.
    out_ref[...] = (jnp.dot(h_last.astype(jnp.bfloat16), fcw_ref[...],
                            preferred_element_type=jnp.float32)
                    + fcb_ref[...]).astype(out_ref.dtype)


# ---------------------------------------------------------------------------
# Wrapper
# ---------------------------------------------------------------------------
def receipt_count_lstm_forward(x, prepared):
    """x: (B, T, input_size) float32 -> (B, output_size) float32."""
    B, T, D = x.shape
    layers = prepared["layers"]            # [(w_ih_t bf16, w_hh_t bf16, b_row f32), ...]
    fc_w_t = prepared["fc_w_t"]            # (H, O) bf16
    fc_b = prepared["fc_b_row"]            # (1, O) f32
    H = layers[0][1].shape[0]
    O = fc_w_t.shape[1]
    num_layers = len(layers)

    # Pad batch to a sublane multiple (8): every per-step row slice of the VMEM
    # scratch buffers is then 8-aligned (no masked partial stores), at zero MXU cost.
    B_pad = max(8, ((B + 7) // 8) * 8)
    x_p = jnp.zeros((B_pad, T, D), x.dtype).at[:B].set(x)
    # Time-major, flattened to (T*B_pad, D); bf16 operands for the MXU.
    x_flat = jnp.transpose(x_p, (1, 0, 2)).reshape(T * B_pad, D).astype(jnp.bfloat16)

    flat_w = [w for layer in layers for w in layer]
    vmem = lambda: pl.BlockSpec(memory_space=pltpu.MemorySpace.VMEM)

    kernel = functools.partial(_fused_lstm_fc_kernel,
                               T=T, B=B_pad, H=H, num_layers=num_layers)

    out = pl.pallas_call(
        kernel,
        out_shape=jax.ShapeDtypeStruct((B_pad, O), jnp.float32),
        in_specs=[vmem() for _ in range(1 + len(flat_w) + 2)],
        out_specs=vmem(),
        scratch_shapes=[pltpu.VMEM((T * B_pad, 4 * H), jnp.float32),
                        pltpu.VMEM((T * B_pad, H), jnp.float32)],
    )(x_flat, *flat_w, fc_w_t, fc_b)
    return out[:B]


def _reorder_gates(a, axis=0):
    # PyTorch gate block order [i, f, g, o] -> [i, f, o, g] so the kernel can apply
    # one sigmoid over the first 3H columns and one tanh over the last H.
    i, f, g, o = jnp.split(a, 4, axis=axis)
    return jnp.concatenate([i, f, o, g], axis=axis)


def prepare_params(params):
    """One-time weight prep (outside the per-call path): fold b_ih + b_hh, permute
    gate columns to [i,f,o,g], transpose to (in,4H)/(H,4H)/(H,O), cast weights to
    bf16 (MXU operands); biases stay f32 (added to f32 accumulators)."""
    layers = []
    for (w_ih, w_hh, b_ih, b_hh) in params["layers"]:
        w_ih_t = _reorder_gates(jnp.asarray(w_ih)).T.astype(jnp.bfloat16)   # (Din, 4H)
        w_hh_t = _reorder_gates(jnp.asarray(w_hh)).T.astype(jnp.bfloat16)   # (H, 4H)
        b_row = _reorder_gates(jnp.asarray(b_ih + b_hh))[None, :].astype(jnp.float32)
        layers.append((w_ih_t, w_hh_t, b_row))
    return {"layers": layers,
            "fc_w_t": jnp.asarray(params["fc_w"]).T.astype(jnp.bfloat16),   # (H, O)
            "fc_b_row": jnp.asarray(params["fc_b"])[None, :].astype(jnp.float32)}


# ---------------------------------------------------------------------------
# Deterministic parameter init (PyTorch-style U(-1/sqrt(H), 1/sqrt(H)))
# ---------------------------------------------------------------------------
def init_params(key, input_size, hidden_size, num_layers, output_size):
    s = 1.0 / np.sqrt(hidden_size)
    layers = []
    for l in range(num_layers):
        din = input_size if l == 0 else hidden_size
        key, k1, k2, k3, k4 = jax.random.split(key, 5)
        w_ih = jax.random.uniform(k1, (4 * hidden_size, din), jnp.float32, -s, s)
        w_hh = jax.random.uniform(k2, (4 * hidden_size, hidden_size), jnp.float32, -s, s)
        b_ih = jax.random.uniform(k3, (4 * hidden_size,), jnp.float32, -s, s)
        b_hh = jax.random.uniform(k4, (4 * hidden_size,), jnp.float32, -s, s)
        layers.append((w_ih, w_hh, b_ih, b_hh))
    key, k5, k6 = jax.random.split(key, 3)
    fc_w = jax.random.uniform(k5, (output_size, hidden_size), jnp.float32, -s, s)
    fc_b = jax.random.uniform(k6, (output_size,), jnp.float32, -s, s)
    return {"layers": layers, "fc_w": fc_w, "fc_b": fc_b}


# ---------------------------------------------------------------------------
# Pure-JAX f32 reference (mirrors PyTorch nn.LSTM + nn.Linear, eval mode)
# ---------------------------------------------------------------------------
def reference_forward(x, params):
    B = x.shape[0]
    h_seq = x  # (B, T, D)
    for (w_ih, w_hh, b_ih, b_hh) in params["layers"]:
        H = w_hh.shape[1]
        h0 = jnp.zeros((B, H), jnp.float32)
        c0 = jnp.zeros((B, H), jnp.float32)

        def step(carry, x_t):
            h, c = carry
            gates = x_t @ w_ih.T + h @ w_hh.T + b_ih + b_hh
            i, f, g, o = jnp.split(gates, 4, axis=-1)
            i, f, o = jax.nn.sigmoid(i), jax.nn.sigmoid(f), jax.nn.sigmoid(o)
            g = jnp.tanh(g)
            c = f * c + i * g
            h = o * jnp.tanh(c)
            return (h, c), h

        _, ys = jax.lax.scan(step, (h0, c0), jnp.transpose(h_seq, (1, 0, 2)))
        h_seq = jnp.transpose(ys, (1, 0, 2))
    return h_seq[:, -1, :] @ params["fc_w"].T + params["fc_b"]


# ---------------------------------------------------------------------------
if __name__ == "__main__":
    INPUT_SIZE, HIDDEN_SIZE, NUM_LAYERS, OUTPUT_SIZE = 3, 128, 3, 1
    B, T = 2, 8

    key = jax.random.PRNGKey(0)
    kx, kp = jax.random.split(key)
    x = jax.random.normal(kx, (B, T, INPUT_SIZE), jnp.float32)
    params = init_params(kp, INPUT_SIZE, HIDDEN_SIZE, NUM_LAYERS, OUTPUT_SIZE)
    prepared = prepare_params(params)

    y = receipt_count_lstm_forward(x, prepared)
    jax.block_until_ready(y)
    assert y.shape == (B, OUTPUT_SIZE)

    # bf16 MXU operands (f32 accumulation / gate math) vs. pure-f32 reference:
    # expect ~1e-3 absolute error on this problem size; tolerance relaxed accordingly.
    y_ref = reference_forward(x, params)
    np.testing.assert_allclose(np.asarray(y), np.asarray(y_ref),
                               rtol=2e-2, atol=2e-2)

    print("KERNEL_OK")
</pallas_src>

<mosaic_0001>
module attributes {stable_mosaic.version = 11 : i64} {
  func.func @_fused_lstm_fc_kernel(%arg0: memref<64x3xbf16, #tpu.memory_space<vmem>>, %arg1: memref<3x512xbf16, #tpu.memory_space<vmem>>, %arg2: memref<128x512xbf16, #tpu.memory_space<vmem>>, %arg3: memref<1x512xf32, #tpu.memory_space<vmem>>, %arg4: memref<128x512xbf16, #tpu.memory_space<vmem>>, %arg5: memref<128x512xbf16, #tpu.memory_space<vmem>>, %arg6: memref<1x512xf32, #tpu.memory_space<vmem>>, %arg7: memref<128x512xbf16, #tpu.memory_space<vmem>>, %arg8: memref<128x512xbf16, #tpu.memory_space<vmem>>, %arg9: memref<1x512xf32, #tpu.memory_space<vmem>>, %arg10: memref<128x1xbf16, #tpu.memory_space<vmem>>, %arg11: memref<1x1xf32, #tpu.memory_space<vmem>>, %arg12: memref<8x1xf32, #tpu.memory_space<vmem>>, %arg13: memref<64x512xf32, #tpu.memory_space<vmem>>, %arg14: memref<64x128xf32, #tpu.memory_space<vmem>>) attributes {dimension_semantics = [], scalar_prefetch = 0 : i64, scratch_operands = 2 : i64, tpu.core_type = #tpu.core_type<tc>} {
    %c0 = arith.constant 0 : index
    %c0_0 = arith.constant 0 : index
    %0 = vector.load %arg0[%c0, %c0_0] : memref<64x3xbf16, #tpu.memory_space<vmem>>, vector<64x3xbf16>
    %c0_1 = arith.constant 0 : index
    %c0_2 = arith.constant 0 : index
    %1 = vector.load %arg1[%c0_1, %c0_2] : memref<3x512xbf16, #tpu.memory_space<vmem>>, vector<3x512xbf16>
    %cst = arith.constant dense<0.000000e+00> : vector<64x512xf32>
    %2 = tpu.matmul %0, %1, %cst {dimension_numbers = #tpu.dot_dimension_numbers<[1], [0], [0], [1], [0, 0, 1, 1], [], []>} : vector<64x3xbf16>, vector<3x512xbf16>, vector<64x512xf32> -> vector<64x512xf32>
    %c0_3 = arith.constant 0 : index
    %c0_4 = arith.constant 0 : index
    %3 = vector.load %arg3[%c0_3, %c0_4] : memref<1x512xf32, #tpu.memory_space<vmem>>, vector<1x512xf32>
    %4 = vector.broadcast %3 : vector<1x512xf32> to vector<64x512xf32>
    %5 = arith.addf %2, %4 : vector<64x512xf32>
    %c0_5 = arith.constant 0 : index
    %c0_6 = arith.constant 0 : index
    %6 = vector.load %arg13[%c0_5, %c0_6] : memref<64x512xf32, #tpu.memory_space<vmem>>, vector<64x512xf32>
    tpu.vector_store %arg13[%c0_5, %c0_6], %5 {strides = array<i32>} : memref<64x512xf32, #tpu.memory_space<vmem>>, vector<64x512xf32>,
    %cst_7 = arith.constant 0.000000e+00 : f32
    %7 = vector.broadcast %cst_7 : f32 to vector<8x128xf32>
    %cst_8 = arith.constant 0.000000e+00 : f32
    %8 = vector.broadcast %cst_8 : f32 to vector<8x128xf32>
    %c0_9 = arith.constant 0 : index
    %c0_10 = arith.constant 0 : index
    %9 = vector.load %arg13[%c0_9, %c0_10] : memref<64x512xf32, #tpu.memory_space<vmem>>, vector<8x512xf32>
    %10 = arith.truncf %7 : vector<8x128xf32> to vector<8x128xbf16>
    %c0_11 = arith.constant 0 : index
    %c0_12 = arith.constant 0 : index
    %11 = vector.load %arg2[%c0_11, %c0_12] : memref<128x512xbf16, #tpu.memory_space<vmem>>, vector<128x512xbf16>
    %cst_13 = arith.constant dense<0.000000e+00> : vector<8x512xf32>
    %12 = tpu.matmul %10, %11, %cst_13 {dimension_numbers = #tpu.dot_dimension_numbers<[1], [0], [0], [1], [0, 0, 1, 1], [], []>} : vector<8x128xbf16>, vector<128x512xbf16>, vector<8x512xf32> -> vector<8x512xf32>
    %13 = arith.addf %9, %12 : vector<8x512xf32>
    %14 = vector.extract_strided_slice %13 {offsets = [0, 0], sizes = [8, 384], strides = [1, 1]} : vector<8x512xf32> to vector<8x384xf32>
    %15 = arith.negf %14 : vector<8x384xf32>
    %16 = math.exp %15 : vector<8x384xf32>
    %cst_14 = arith.constant 1.000000e+00 : f32
    %17 = vector.broadcast %cst_14 : f32 to vector<8x384xf32>
    %18 = arith.addf %17, %16 : vector<8x384xf32>
    %19 = arith.divf %17, %18 : vector<8x384xf32>
    %20 = vector.extract_strided_slice %13 {offsets = [0, 384], sizes = [8, 128], strides = [1, 1]} : vector<8x512xf32> to vector<8x128xf32>
    %21 = math.tanh %20 : vector<8x128xf32>
    %22 = vector.extract_strided_slice %19 {offsets = [0, 0], sizes = [8, 128], strides = [1, 1]} : vector<8x384xf32> to vector<8x128xf32>
    %23 = vector.extract_strided_slice %19 {offsets = [0, 128], sizes = [8, 128], strides = [1, 1]} : vector<8x384xf32> to vector<8x128xf32>
    %24 = vector.extract_strided_slice %19 {offsets = [0, 256], sizes = [8, 128], strides = [1, 1]} : vector<8x384xf32> to vector<8x128xf32>
    %25 = arith.mulf %23, %8 : vector<8x128xf32>
    %26 = arith.mulf %22, %21 : vector<8x128xf32>
    %27 = arith.addf %25, %26 : vector<8x128xf32>
    %28 = math.tanh %27 : vector<8x128xf32>
    %29 = arith.mulf %24, %28 : vector<8x128xf32>
    %c0_15 = arith.constant 0 : index
    %c0_16 = arith.constant 0 : index
    %30 = vector.load %arg14[%c0_15, %c0_16] : memref<64x128xf32, #tpu.memory_space<vmem>>, vector<8x128xf32>
    tpu.vector_store %arg14[%c0_15, %c0_16], %29 {strides = array<i32>} : memref<64x128xf32, #tpu.memory_space<vmem>>, vector<8x128xf32>,
    %c8 = arith.constant 8 : index
    %c0_17 = arith.constant 0 : index
    %31 = vector.load %arg13[%c8, %c0_17] : memref<64x512xf32, #tpu.memory_space<vmem>>, vector<8x512xf32>
    %32 = arith.truncf %29 : vector<8x128xf32> to vector<8x128xbf16>
    %c0_18 = arith.constant 0 : index
    %c0_19 = arith.constant 0 : index
    %33 = vector.load %arg2[%c0_18, %c0_19] : memref<128x512xbf16, #tpu.memory_space<vmem>>, vector<128x512xbf16>
    %cst_20 = arith.constant dense<0.000000e+00> : vector<8x512xf32>
    %34 = tpu.matmul %32, %33, %cst_20 {dimension_numbers = #tpu.dot_dimension_numbers<[1], [0], [0], [1], [0, 0, 1, 1], [], []>} : vector<8x128xbf16>, vector<128x512xbf16>, vector<8x512xf32> -> vector<8x512xf32>
    %35 = arith.addf %31, %34 : vector<8x512xf32>
    %36 = vector.extract_strided_slice %35 {offsets = [0, 0], sizes = [8, 384], strides = [1, 1]} : vector<8x512xf32> to vector<8x384xf32>
    %37 = arith.negf %36 : vector<8x384xf32>
    %38 = math.exp %37 : vector<8x384xf32>
    %cst_21 = arith.constant 1.000000e+00 : f32
    %39 = vector.broadcast %cst_21 : f32 to vector<8x384xf32>
    %40 = arith.addf %39, %38 : vector<8x384xf32>
    %41 = arith.divf %39, %40 : vector<8x384xf32>
    %42 = vector.extract_strided_slice %35 {offsets = [0, 384], sizes = [8, 128], strides = [1, 1]} : vector<8x512xf32> to vector<8x128xf32>
    %43 = math.tanh %42 : vector<8x128xf32>
    %44 = vector.extract_strided_slice %41 {offsets = [0, 0], sizes = [8, 128], strides = [1, 1]} : vector<8x384xf32> to vector<8x128xf32>
    %45 = vector.extract_strided_slice %41 {offsets = [0, 128], sizes = [8, 128], strides = [1, 1]} : vector<8x384xf32> to vector<8x128xf32>
    %46 = vector.extract_strided_slice %41 {offsets = [0, 256], sizes = [8, 128], strides = [1, 1]} : vector<8x384xf32> to vector<8x128xf32>
    %47 = arith.mulf %45, %27 : vector<8x128xf32>
    %48 = arith.mulf %44, %43 : vector<8x128xf32>
    %49 = arith.addf %47, %48 : vector<8x128xf32>
    %50 = math.tanh %49 : vector<8x128xf32>
    %51 = arith.mulf %46, %50 : vector<8x128xf32>
    %c8_22 = arith.constant 8 : index
    %c0_23 = arith.constant 0 : index
    %52 = vector.load %arg14[%c8_22, %c0_23] : memref<64x128xf32, #tpu.memory_space<vmem>>, vector<8x128xf32>
    tpu.vector_store %arg14[%c8_22, %c0_23], %51 {strides = array<i32>} : memref<64x128xf32, #tpu.memory_space<vmem>>, vector<8x128xf32>,
    %c16 = arith.constant 16 : index
    %c0_24 = arith.constant 0 : index
    %53 = vector.load %arg13[%c16, %c0_24] : memref<64x512xf32, #tpu.memory_space<vmem>>, vector<8x512xf32>
    %54 = arith.truncf %51 : vector<8x128xf32> to vector<8x128xbf16>
    %c0_25 = arith.constant 0 : index
    %c0_26 = arith.constant 0 : index
    %55 = vector.load %arg2[%c0_25, %c0_26] : memref<128x512xbf16, #tpu.memory_space<vmem>>, vector<128x512xbf16>
    %cst_27 = arith.constant dense<0.000000e+00> : vector<8x512xf32>
    %56 = tpu.matmul %54, %55, %cst_27 {dimension_numbers = #tpu.dot_dimension_numbers<[1], [0], [0], [1], [0, 0, 1, 1], [], []>} : vector<8x128xbf16>, vector<128x512xbf16>, vector<8x512xf32> -> vector<8x512xf32>
    %57 = arith.addf %53, %56 : vector<8x512xf32>
    %58 = vector.extract_strided_slice %57 {offsets = [0, 0], sizes = [8, 384], strides = [1, 1]} : vector<8x512xf32> to vector<8x384xf32>
    %59 = arith.negf %58 : vector<8x384xf32>
    %60 = math.exp %59 : vector<8x384xf32>
    %cst_28 = arith.constant 1.000000e+00 : f32
    %61 = vector.broadcast %cst_28 : f32 to vector<8x384xf32>
    %62 = arith.addf %61, %60 : vector<8x384xf32>
    %63 = arith.divf %61, %62 : vector<8x384xf32>
    %64 = vector.extract_strided_slice %57 {offsets = [0, 384], sizes = [8, 128], strides = [1, 1]} : vector<8x512xf32> to vector<8x128xf32>
    %65 = math.tanh %64 : vector<8x128xf32>
    %66 = vector.extract_strided_slice %63 {offsets = [0, 0], sizes = [8, 128], strides = [1, 1]} : vector<8x384xf32> to vector<8x128xf32>
    %67 = vector.extract_strided_slice %63 {offsets = [0, 128], sizes = [8, 128], strides = [1, 1]} : vector<8x384xf32> to vector<8x128xf32>
    %68 = vector.extract_strided_slice %63 {offsets = [0, 256], sizes = [8, 128], strides = [1, 1]} : vector<8x384xf32> to vector<8x128xf32>
    %69 = arith.mulf %67, %49 : vector<8x128xf32>
    %70 = arith.mulf %66, %65 : vector<8x128xf32>
    %71 = arith.addf %69, %70 : vector<8x128xf32>
    %72 = math.tanh %71 : vector<8x128xf32>
    %73 = arith.mulf %68, %72 : vector<8x128xf32>
    %c16_29 = arith.constant 16 : index
    %c0_30 = arith.constant 0 : index
    %74 = vector.load %arg14[%c16_29, %c0_30] : memref<64x128xf32, #tpu.memory_space<vmem>>, vector<8x128xf32>
    tpu.vector_store %arg14[%c16_29, %c0_30], %73 {strides = array<i32>} : memref<64x128xf32, #tpu.memory_space<vmem>>, vector<8x128xf32>,
    %c24 = arith.constant 24 : index
    %c0_31 = arith.constant 0 : index
    %75 = vector.load %arg13[%c24, %c0_31] : memref<64x512xf32, #tpu.memory_space<vmem>>, vector<8x512xf32>
    %76 = arith.truncf %73 : vector<8x128xf32> to vector<8x128xbf16>
    %c0_32 = arith.constant 0 : index
    %c0_33 = arith.constant 0 : index
    %77 = vector.load %arg2[%c0_32, %c0_33] : memref<128x512xbf16, #tpu.memory_space<vmem>>, vector<128x512xbf16>
    %cst_34 = arith.constant dense<0.000000e+00> : vector<8x512xf32>
    %78 = tpu.matmul %76, %77, %cst_34 {dimension_numbers = #tpu.dot_dimension_numbers<[1], [0], [0], [1], [0, 0, 1, 1], [], []>} : vector<8x128xbf16>, vector<128x512xbf16>, vector<8x512xf32> -> vector<8x512xf32>
    %79 = arith.addf %75, %78 : vector<8x512xf32>
    %80 = vector.extract_strided_slice %79 {offsets = [0, 0], sizes = [8, 384], strides = [1, 1]} : vector<8x512xf32> to vector<8x384xf32>
    %81 = arith.negf %80 : vector<8x384xf32>
    %82 = math.exp %81 : vector<8x384xf32>
    %cst_35 = arith.constant 1.000000e+00 : f32
    %83 = vector.broadcast %cst_35 : f32 to vector<8x384xf32>
    %84 = arith.addf %83, %82 : vector<8x384xf32>
    %85 = arith.divf %83, %84 : vector<8x384xf32>
    %86 = vector.extract_strided_slice %79 {offsets = [0, 384], sizes = [8, 128], strides = [1, 1]} : vector<8x512xf32> to vector<8x128xf32>
    %87 = math.tanh %86 : vector<8x128xf32>
    %88 = vector.extract_strided_slice %85 {offsets = [0, 0], sizes = [8, 128], strides = [1, 1]} : vector<8x384xf32> to vector<8x128xf32>
    %89 = vector.extract_strided_slice %85 {offsets = [0, 128], sizes = [8, 128], strides = [1, 1]} : vector<8x384xf32> to vector<8x128xf32>
    %90 = vector.extract_strided_slice %85 {offsets = [0, 256], sizes = [8, 128], strides = [1, 1]} : vector<8x384xf32> to vector<8x128xf32>
    %91 = arith.mulf %89, %71 : vector<8x128xf32>
    %92 = arith.mulf %88, %87 : vector<8x128xf32>
    %93 = arith.addf %91, %92 : vector<8x128xf32>
    %94 = math.tanh %93 : vector<8x128xf32>
    %95 = arith.mulf %90, %94 : vector<8x128xf32>
    %c24_36 = arith.constant 24 : index
    %c0_37 = arith.constant 0 : index
    %96 = vector.load %arg14[%c24_36, %c0_37] : memref<64x128xf32, #tpu.memory_space<vmem>>, vector<8x128xf32>
    tpu.vector_store %arg14[%c24_36, %c0_37], %95 {strides = array<i32>} : memref<64x128xf32, #tpu.memory_space<vmem>>, vector<8x128xf32>,
    %c32 = arith.constant 32 : index
    %c0_38 = arith.constant 0 : index
    %97 = vector.load %arg13[%c32, %c0_38] : memref<64x512xf32, #tpu.memory_space<vmem>>, vector<8x512xf32>
    %98 = arith.truncf %95 : vector<8x128xf32> to vector<8x128xbf16>
    %c0_39 = arith.constant 0 : index
    %c0_40 = arith.constant 0 : index
    %99 = vector.load %arg2[%c0_39, %c0_40] : memref<128x512xbf16, #tpu.memory_space<vmem>>, vector<128x512xbf16>
    %cst_41 = arith.constant dense<0.000000e+00> : vector<8x512xf32>
    %100 = tpu.matmul %98, %99, %cst_41 {dimension_numbers = #tpu.dot_dimension_numbers<[1], [0], [0], [1], [0, 0, 1, 1], [], []>} : vector<8x128xbf16>, vector<128x512xbf16>, vector<8x512xf32> -> vector<8x512xf32>
    %101 = arith.addf %97, %100 : vector<8x512xf32>
    %102 = vector.extract_strided_slice %101 {offsets = [0, 0], sizes = [8, 384], strides = [1, 1]} : vector<8x512xf32> to vector<8x384xf32>
    %103 = arith.negf %102 : vector<8x384xf32>
    %104 = math.exp %103 : vector<8x384xf32>
    %cst_42 = arith.constant 1.000000e+00 : f32
    %105 = vector.broadcast %cst_42 : f32 to vector<8x384xf32>
    %106 = arith.addf %105, %104 : vector<8x384xf32>
    %107 = arith.divf %105, %106 : vector<8x384xf32>
    %108 = vector.extract_strided_slice %101 {offsets = [0, 384], sizes = [8, 128], strides = [1, 1]} : vector<8x512xf32> to vector<8x128xf32>
    %109 = math.tanh %108 : vector<8x128xf32>
    %110 = vector.extract_strided_slice %107 {offsets = [0, 0], sizes = [8, 128], strides = [1, 1]} : vector<8x384xf32> to vector<8x128xf32>
    %111 = vector.extract_strided_slice %107 {offsets = [0, 128], sizes = [8, 128], strides = [1, 1]} : vector<8x384xf32> to vector<8x128xf32>
    %112 = vector.extract_strided_slice %107 {offsets = [0, 256], sizes = [8, 128], strides = [1, 1]} : vector<8x384xf32> to vector<8x128xf32>
    %113 = arith.mulf %111, %93 : vector<8x128xf32>
    %114 = arith.mulf %110, %109 : vector<8x128xf32>
    %115 = arith.addf %113, %114 : vector<8x128xf32>
    %116 = math.tanh %115 : vector<8x128xf32>
    %117 = arith.mulf %112, %116 : vector<8x128xf32>
    %c32_43 = arith.constant 32 : index
    %c0_44 = arith.constant 0 : index
    %118 = vector.load %arg14[%c32_43, %c0_44] : memref<64x128xf32, #tpu.memory_space<vmem>>, vector<8x128xf32>
    tpu.vector_store %arg14[%c32_43, %c0_44], %117 {strides = array<i32>} : memref<64x128xf32, #tpu.memory_space<vmem>>, vector<8x128xf32>,
    %c40 = arith.constant 40 : index
    %c0_45 = arith.constant 0 : index
    %119 = vector.load %arg13[%c40, %c0_45] : memref<64x512xf32, #tpu.memory_space<vmem>>, vector<8x512xf32>
    %120 = arith.truncf %117 : vector<8x128xf32> to vector<8x128xbf16>
    %c0_46 = arith.constant 0 : index
    %c0_47 = arith.constant 0 : index
    %121 = vector.load %arg2[%c0_46, %c0_47] : memref<128x512xbf16, #tpu.memory_space<vmem>>, vector<128x512xbf16>
    %cst_48 = arith.constant dense<0.000000e+00> : vector<8x512xf32>
    %122 = tpu.matmul %120, %121, %cst_48 {dimension_numbers = #tpu.dot_dimension_numbers<[1], [0], [0], [1], [0, 0, 1, 1], [], []>} : vector<8x128xbf16>, vector<128x512xbf16>, vector<8x512xf32> -> vector<8x512xf32>
    %123 = arith.addf %119, %122 : vector<8x512xf32>
    %124 = vector.extract_strided_slice %123 {offsets = [0, 0], sizes = [8, 384], strides = [1, 1]} : vector<8x512xf32> to vector<8x384xf32>
    %125 = arith.negf %124 : vector<8x384xf32>
    %126 = math.exp %125 : vector<8x384xf32>
    %cst_49 = arith.constant 1.000000e+00 : f32
    %127 = vector.broadcast %cst_49 : f32 to vector<8x384xf32>
    %128 = arith.addf %127, %126 : vector<8x384xf32>
    %129 = arith.divf %127, %128 : vector<8x384xf32>
    %130 = vector.extract_strided_slice %123 {offsets = [0, 384], sizes = [8, 128], strides = [1, 1]} : vector<8x512xf32> to vector<8x128xf32>
    %131 = math.tanh %130 : vector<8x128xf32>
    %132 = vector.extract_strided_slice %129 {offsets = [0, 0], sizes = [8, 128], strides = [1, 1]} : vector<8x384xf32> to vector<8x128xf32>
    %133 = vector.extract_strided_slice %129 {offsets = [0, 128], sizes = [8, 128], strides = [1, 1]} : vector<8x384xf32> to vector<8x128xf32>
    %134 = vector.extract_strided_slice %129 {offsets = [0, 256], sizes = [8, 128], strides = [1, 1]} : vector<8x384xf32> to vector<8x128xf32>
    %135 = arith.mulf %133, %115 : vector<8x128xf32>
    %136 = arith.mulf %132, %131 : vector<8x128xf32>
    %137 = arith.addf %135, %136 : vector<8x128xf32>
    %138 = math.tanh %137 : vector<8x128xf32>
    %139 = arith.mulf %134, %138 : vector<8x128xf32>
    %c40_50 = arith.constant 40 : index
    %c0_51 = arith.constant 0 : index
    %140 = vector.load %arg14[%c40_50, %c0_51] : memref<64x128xf32, #tpu.memory_space<vmem>>, vector<8x128xf32>
    tpu.vector_store %arg14[%c40_50, %c0_51], %139 {strides = array<i32>} : memref<64x128xf32, #tpu.memory_space<vmem>>, vector<8x128xf32>,
    %c48 = arith.constant 48 : index
    %c0_52 = arith.constant 0 : index
    %141 = vector.load %arg13[%c48, %c0_52] : memref<64x512xf32, #tpu.memory_space<vmem>>, vector<8x512xf32>
    %142 = arith.truncf %139 : vector<8x128xf32> to vector<8x128xbf16>
    %c0_53 = arith.constant 0 : index
    %c0_54 = arith.constant 0 : index
    %143 = vector.load %arg2[%c0_53, %c0_54] : memref<128x512xbf16, #tpu.memory_space<vmem>>, vector<128x512xbf16>
    %cst_55 = arith.constant dense<0.000000e+00> : vector<8x512xf32>
    %144 = tpu.matmul %142, %143, %cst_55 {dimension_numbers = #tpu.dot_dimension_numbers<[1], [0], [0], [1], [0, 0, 1, 1], [], []>} : vector<8x128xbf16>, vector<128x512xbf16>, vector<8x512xf32> -> vector<8x512xf32>
    %145 = arith.addf %141, %144 : vector<8x512xf32>
    %146 = vector.extract_strided_slice %145 {offsets = [0, 0], sizes = [8, 384], strides = [1, 1]} : vector<8x512xf32> to vector<8x384xf32>
    %147 = arith.negf %146 : vector<8x384xf32>
    %148 = math.exp %147 : vector<8x384xf32>
    %cst_56 = arith.constant 1.000000e+00 : f32
    %149 = vector.broadcast %cst_56 : f32 to vector<8x384xf32>
    %150 = arith.addf %149, %148 : vector<8x384xf32>
    %151 = arith.divf %149, %150 : vector<8x384xf32>
    %152 = vector.extract_strided_slice %145 {offsets = [0, 384], sizes = [8, 128], strides = [1, 1]} : vector<8x512xf32> to vector<8x128xf32>
    %153 = math.tanh %152 : vector<8x128xf32>
    %154 = vector.extract_strided_slice %151 {offsets = [0, 0], sizes = [8, 128], strides = [1, 1]} : vector<8x384xf32> to vector<8x128xf32>
    %155 = vector.extract_strided_slice %151 {offsets = [0, 128], sizes = [8, 128], strides = [1, 1]} : vector<8x384xf32> to vector<8x128xf32>
    %156 = vector.extract_strided_slice %151 {offsets = [0, 256], sizes = [8, 128], strides = [1, 1]} : vector<8x384xf32> to vector<8x128xf32>
    %157 = arith.mulf %155, %137 : vector<8x128xf32>
    %158 = arith.mulf %154, %153 : vector<8x128xf32>
    %159 = arith.addf %157, %158 : vector<8x128xf32>
    %160 = math.tanh %159 : vector<8x128xf32>
    %161 = arith.mulf %156, %160 : vector<8x128xf32>
    %c48_57 = arith.constant 48 : index
    %c0_58 = arith.constant 0 : index
    %162 = vector.load %arg14[%c48_57, %c0_58] : memref<64x128xf32, #tpu.memory_space<vmem>>, vector<8x128xf32>
    tpu.vector_store %arg14[%c48_57, %c0_58], %161 {strides = array<i32>} : memref<64x128xf32, #tpu.memory_space<vmem>>, vector<8x128xf32>,
    %c56 = arith.constant 56 : index
    %c0_59 = arith.constant 0 : index
    %163 = vector.load %arg13[%c56, %c0_59] : memref<64x512xf32, #tpu.memory_space<vmem>>, vector<8x512xf32>
    %164 = arith.truncf %161 : vector<8x128xf32> to vector<8x128xbf16>
    %c0_60 = arith.constant 0 : index
    %c0_61 = arith.constant 0 : index
    %165 = vector.load %arg2[%c0_60, %c0_61] : memref<128x512xbf16, #tpu.memory_space<vmem>>, vector<128x512xbf16>
    %cst_62 = arith.constant dense<0.000000e+00> : vector<8x512xf32>
    %166 = tpu.matmul %164, %165, %cst_62 {dimension_numbers = #tpu.dot_dimension_numbers<[1], [0], [0], [1], [0, 0, 1, 1], [], []>} : vector<8x128xbf16>, vector<128x512xbf16>, vector<8x512xf32> -> vector<8x512xf32>
    %167 = arith.addf %163, %166 : vector<8x512xf32>
    %168 = vector.extract_strided_slice %167 {offsets = [0, 0], sizes = [8, 384], strides = [1, 1]} : vector<8x512xf32> to vector<8x384xf32>
    %169 = arith.negf %168 : vector<8x384xf32>
    %170 = math.exp %169 : vector<8x384xf32>
    %cst_63 = arith.constant 1.000000e+00 : f32
    %171 = vector.broadcast %cst_63 : f32 to vector<8x384xf32>
    %172 = arith.addf %171, %170 : vector<8x384xf32>
    %173 = arith.divf %171, %172 : vector<8x384xf32>
    %174 = vector.extract_strided_slice %167 {offsets = [0, 384], sizes = [8, 128], strides = [1, 1]} : vector<8x512xf32> to vector<8x128xf32>
    %175 = math.tanh %174 : vector<8x128xf32>
    %176 = vector.extract_strided_slice %173 {offsets = [0, 0], sizes = [8, 128], strides = [1, 1]} : vector<8x384xf32> to vector<8x128xf32>
    %177 = vector.extract_strided_slice %173 {offsets = [0, 128], sizes = [8, 128], strides = [1, 1]} : vector<8x384xf32> to vector<8x128xf32>
    %178 = vector.extract_strided_slice %173 {offsets = [0, 256], sizes = [8, 128], strides = [1, 1]} : vector<8x384xf32> to vector<8x128xf32>
    %179 = arith.mulf %177, %159 : vector<8x128xf32>
    %180 = arith.mulf %176, %175 : vector<8x128xf32>
    %181 = arith.addf %179, %180 : vector<8x128xf32>
    %182 = math.tanh %181 : vector<8x128xf32>
    %183 = arith.mulf %178, %182 : vector<8x128xf32>
    %c56_64 = arith.constant 56 : index
    %c0_65 = arith.constant 0 : index
    %184 = vector.load %arg14[%c56_64, %c0_65] : memref<64x128xf32, #tpu.memory_space<vmem>>, vector<8x128xf32>
    tpu.vector_store %arg14[%c56_64, %c0_65], %183 {strides = array<i32>} : memref<64x128xf32, #tpu.memory_space<vmem>>, vector<8x128xf32>,
    %c0_66 = arith.constant 0 : index
    %c0_67 = arith.constant 0 : index
    %185 = vector.load %arg14[%c0_66, %c0_67] : memref<64x128xf32, #tpu.memory_space<vmem>>, vector<64x128xf32>
    %186 = arith.truncf %185 : vector<64x128xf32> to vector<64x128xbf16>
    %c0_68 = arith.constant 0 : index
    %c0_69 = arith.constant 0 : index
    %187 = vector.load %arg4[%c0_68, %c0_69] : memref<128x512xbf16, #tpu.memory_space<vmem>>, vector<128x512xbf16>
    %cst_70 = arith.constant dense<0.000000e+00> : vector<64x512xf32>
    %188 = tpu.matmul %186, %187, %cst_70 {dimension_numbers = #tpu.dot_dimension_numbers<[1], [0], [0], [1], [0, 0, 1, 1], [], []>} : vector<64x128xbf16>, vector<128x512xbf16>, vector<64x512xf32> -> vector<64x512xf32>
    %c0_71 = arith.constant 0 : index
    %c0_72 = arith.constant 0 : index
    %189 = vector.load %arg6[%c0_71, %c0_72] : memref<1x512xf32, #tpu.memory_space<vmem>>, vector<1x512xf32>
    %190 = vector.broadcast %189 : vector<1x512xf32> to vector<64x512xf32>
    %191 = arith.addf %188, %190 : vector<64x512xf32>
    %c0_73 = arith.constant 0 : index
    %c0_74 = arith.constant 0 : index
    %192 = vector.load %arg13[%c0_73, %c0_74] : memref<64x512xf32, #tpu.memory_space<vmem>>, vector<64x512xf32>
    tpu.vector_store %arg13[%c0_73, %c0_74], %191 {strides = array<i32>} : memref<64x512xf32, #tpu.memory_space<vmem>>, vector<64x512xf32>,
    %cst_75 = arith.constant 0.000000e+00 : f32
    %193 = vector.broadcast %cst_75 : f32 to vector<8x128xf32>
    %cst_76 = arith.constant 0.000000e+00 : f32
    %194 = vector.broadcast %cst_76 : f32 to vector<8x128xf32>
    %c0_77 = arith.constant 0 : index
    %c0_78 = arith.constant 0 : index
    %195 = vector.load %arg13[%c0_77, %c0_78] : memref<64x512xf32, #tpu.memory_space<vmem>>, vector<8x512xf32>
    %196 = arith.truncf %193 : vector<8x128xf32> to vector<8x128xbf16>
    %c0_79 = arith.constant 0 : index
    %c0_80 = arith.constant 0 : index
    %197 = vector.load %arg5[%c0_79, %c0_80] : memref<128x512xbf16, #tpu.memory_space<vmem>>, vector<128x512xbf16>
    %cst_81 = arith.constant dense<0.000000e+00> : vector<8x512xf32>
    %198 = tpu.matmul %196, %197, %cst_81 {dimension_numbers = #tpu.dot_dimension_numbers<[1], [0], [0], [1], [0, 0, 1, 1], [], []>} : vector<8x128xbf16>, vector<128x512xbf16>, vector<8x512xf32> -> vector<8x512xf32>
    %199 = arith.addf %195, %198 : vector<8x512xf32>
    %200 = vector.extract_strided_slice %199 {offsets = [0, 0], sizes = [8, 384], strides = [1, 1]} : vector<8x512xf32> to vector<8x384xf32>
    %201 = arith.negf %200 : vector<8x384xf32>
    %202 = math.exp %201 : vector<8x384xf32>
    %cst_82 = arith.constant 1.000000e+00 : f32
    %203 = vector.broadcast %cst_82 : f32 to vector<8x384xf32>
    %204 = arith.addf %203, %202 : vector<8x384xf32>
    %205 = arith.divf %203, %204 : vector<8x384xf32>
    %206 = vector.extract_strided_slice %199 {offsets = [0, 384], sizes = [8, 128], strides = [1, 1]} : vector<8x512xf32> to vector<8x128xf32>
    %207 = math.tanh %206 : vector<8x128xf32>
    %208 = vector.extract_strided_slice %205 {offsets = [0, 0], sizes = [8, 128], strides = [1, 1]} : vector<8x384xf32> to vector<8x128xf32>
    %209 = vector.extract_strided_slice %205 {offsets = [0, 128], sizes = [8, 128], strides = [1, 1]} : vector<8x384xf32> to vector<8x128xf32>
    %210 = vector.extract_strided_slice %205 {offsets = [0, 256], sizes = [8, 128], strides = [1, 1]} : vector<8x384xf32> to vector<8x128xf32>
    %211 = arith.mulf %209, %194 : vector<8x128xf32>
    %212 = arith.mulf %208, %207 : vector<8x128xf32>
    %213 = arith.addf %211, %212 : vector<8x128xf32>
    %214 = math.tanh %213 : vector<8x128xf32>
    %215 = arith.mulf %210, %214 : vector<8x128xf32>
    %c0_83 = arith.constant 0 : index
    %c0_84 = arith.constant 0 : index
    %216 = vector.load %arg14[%c0_83, %c0_84] : memref<64x128xf32, #tpu.memory_space<vmem>>, vector<8x128xf32>
    tpu.vector_store %arg14[%c0_83, %c0_84], %215 {strides = array<i32>} : memref<64x128xf32, #tpu.memory_space<vmem>>, vector<8x128xf32>,
    %c8_85 = arith.constant 8 : index
    %c0_86 = arith.constant 0 : index
    %217 = vector.load %arg13[%c8_85, %c0_86] : memref<64x512xf32, #tpu.memory_space<vmem>>, vector<8x512xf32>
    %218 = arith.truncf %215 : vector<8x128xf32> to vector<8x128xbf16>
    %c0_87 = arith.constant 0 : index
    %c0_88 = arith.constant 0 : index
    %219 = vector.load %arg5[%c0_87, %c0_88] : memref<128x512xbf16, #tpu.memory_space<vmem>>, vector<128x512xbf16>
    %cst_89 = arith.constant dense<0.000000e+00> : vector<8x512xf32>
    %220 = tpu.matmul %218, %219, %cst_89 {dimension_numbers = #tpu.dot_dimension_numbers<[1], [0], [0], [1], [0, 0, 1, 1], [], []>} : vector<8x128xbf16>, vector<128x512xbf16>, vector<8x512xf32> -> vector<8x512xf32>
    %221 = arith.addf %217, %220 : vector<8x512xf32>
    %222 = vector.extract_strided_slice %221 {offsets = [0, 0], sizes = [8, 384], strides = [1, 1]} : vector<8x512xf32> to vector<8x384xf32>
    %223 = arith.negf %222 : vector<8x384xf32>
    %224 = math.exp %223 : vector<8x384xf32>
    %cst_90 = arith.constant 1.000000e+00 : f32
    %225 = vector.broadcast %cst_90 : f32 to vector<8x384xf32>
    %226 = arith.addf %225, %224 : vector<8x384xf32>
    %227 = arith.divf %225, %226 : vector<8x384xf32>
    %228 = vector.extract_strided_slice %221 {offsets = [0, 384], sizes = [8, 128], strides = [1, 1]} : vector<8x512xf32> to vector<8x128xf32>
    %229 = math.tanh %228 : vector<8x128xf32>
    %230 = vector.extract_strided_slice %227 {offsets = [0, 0], sizes = [8, 128], strides = [1, 1]} : vector<8x384xf32> to vector<8x128xf32>
    %231 = vector.extract_strided_slice %227 {offsets = [0, 128], sizes = [8, 128], strides = [1, 1]} : vector<8x384xf32> to vector<8x128xf32>
    %232 = vector.extract_strided_slice %227 {offsets = [0, 256], sizes = [8, 128], strides = [1, 1]} : vector<8x384xf32> to vector<8x128xf32>
    %233 = arith.mulf %231, %213 : vector<8x128xf32>
    %234 = arith.mulf %230, %229 : vector<8x128xf32>
    %235 = arith.addf %233, %234 : vector<8x128xf32>
    %236 = math.tanh %235 : vector<8x128xf32>
    %237 = arith.mulf %232, %236 : vector<8x128xf32>
    %c8_91 = arith.constant 8 : index
    %c0_92 = arith.constant 0 : index
    %238 = vector.load %arg14[%c8_91, %c0_92] : memref<64x128xf32, #tpu.memory_space<vmem>>, vector<8x128xf32>
    tpu.vector_store %arg14[%c8_91, %c0_92], %237 {strides = array<i32>} : memref<64x128xf32, #tpu.memory_space<vmem>>, vector<8x128xf32>,
    %c16_93 = arith.constant 16 : index
    %c0_94 = arith.constant 0 : index
    %239 = vector.load %arg13[%c16_93, %c0_94] : memref<64x512xf32, #tpu.memory_space<vmem>>, vector<8x512xf32>
    %240 = arith.truncf %237 : vector<8x128xf32> to vector<8x128xbf16>
    %c0_95 = arith.constant 0 : index
    %c0_96 = arith.constant 0 : index
    %241 = vector.load %arg5[%c0_95, %c0_96] : memref<128x512xbf16, #tpu.memory_space<vmem>>, vector<128x512xbf16>
    %cst_97 = arith.constant dense<0.000000e+00> : vector<8x512xf32>
    %242 = tpu.matmul %240, %241, %cst_97 {dimension_numbers = #tpu.dot_dimension_numbers<[1], [0], [0], [1], [0, 0, 1, 1], [], []>} : vector<8x128xbf16>, vector<128x512xbf16>, vector<8x512xf32> -> vector<8x512xf32>
    %243 = arith.addf %239, %242 : vector<8x512xf32>
    %244 = vector.extract_strided_slice %243 {offsets = [0, 0], sizes = [8, 384], strides = [1, 1]} : vector<8x512xf32> to vector<8x384xf32>
    %245 = arith.negf %244 : vector<8x384xf32>
    %246 = math.exp %245 : vector<8x384xf32>
    %cst_98 = arith.constant 1.000000e+00 : f32
    %247 = vector.broadcast %cst_98 : f32 to vector<8x384xf32>
    %248 = arith.addf %247, %246 : vector<8x384xf32>
    %249 = arith.divf %247, %248 : vector<8x384xf32>
    %250 = vector.extract_strided_slice %243 {offsets = [0, 384], sizes = [8, 128], strides = [1, 1]} : vector<8x512xf32> to vector<8x128xf32>
    %251 = math.tanh %250 : vector<8x128xf32>
    %252 = vector.extract_strided_slice %249 {offsets = [0, 0], sizes = [8, 128], strides = [1, 1]} : vector<8x384xf32> to vector<8x128xf32>
    %253 = vector.extract_strided_slice %249 {offsets = [0, 128], sizes = [8, 128], strides = [1, 1]} : vector<8x384xf32> to vector<8x128xf32>
    %254 = vector.extract_strided_slice %249 {offsets = [0, 256], sizes = [8, 128], strides = [1, 1]} : vector<8x384xf32> to vector<8x128xf32>
    %255 = arith.mulf %253, %235 : vector<8x128xf32>
    %256 = arith.mulf %252, %251 : vector<8x128xf32>
    %257 = arith.addf %255, %256 : vector<8x128xf32>
    %258 = math.tanh %257 : vector<8x128xf32>
    %259 = arith.mulf %254, %258 : vector<8x128xf32>
    %c16_99 = arith.constant 16 : index
    %c0_100 = arith.constant 0 : index
    %260 = vector.load %arg14[%c16_99, %c0_100] : memref<64x128xf32, #tpu.memory_space<vmem>>, vector<8x128xf32>
    tpu.vector_store %arg14[%c16_99, %c0_100], %259 {strides = array<i32>} : memref<64x128xf32, #tpu.memory_space<vmem>>, vector<8x128xf32>,
    %c24_101 = arith.constant 24 : index
    %c0_102 = arith.constant 0 : index
    %261 = vector.load %arg13[%c24_101, %c0_102] : memref<64x512xf32, #tpu.memory_space<vmem>>, vector<8x512xf32>
    %262 = arith.truncf %259 : vector<8x128xf32> to vector<8x128xbf16>
    %c0_103 = arith.constant 0 : index
    %c0_104 = arith.constant 0 : index
    %263 = vector.load %arg5[%c0_103, %c0_104] : memref<128x512xbf16, #tpu.memory_space<vmem>>, vector<128x512xbf16>
    %cst_105 = arith.constant dense<0.000000e+00> : vector<8x512xf32>
    %264 = tpu.matmul %262, %263, %cst_105 {dimension_numbers = #tpu.dot_dimension_numbers<[1], [0], [0], [1], [0, 0, 1, 1], [], []>} : vector<8x128xbf16>, vector<128x512xbf16>, vector<8x512xf32> -> vector<8x512xf32>
    %265 = arith.addf %261, %264 : vector<8x512xf32>
    %266 = vector.extract_strided_slice %265 {offsets = [0, 0], sizes = [8, 384], strides = [1, 1]} : vector<8x512xf32> to vector<8x384xf32>
    %267 = arith.negf %266 : vector<8x384xf32>
    %268 = math.exp %267 : vector<8x384xf32>
    %cst_106 = arith.constant 1.000000e+00 : f32
    %269 = vector.broadcast %cst_106 : f32 to vector<8x384xf32>
    %270 = arith.addf %269, %268 : vector<8x384xf32>
    %271 = arith.divf %269, %270 : vector<8x384xf32>
    %272 = vector.extract_strided_slice %265 {offsets = [0, 384], sizes = [8, 128], strides = [1, 1]} : vector<8x512xf32> to vector<8x128xf32>
    %273 = math.tanh %272 : vector<8x128xf32>
    %274 = vector.extract_strided_slice %271 {offsets = [0, 0], sizes = [8, 128], strides = [1, 1]} : vector<8x384xf32> to vector<8x128xf32>
    %275 = vector.extract_strided_slice %271 {offsets = [0, 128], sizes = [8, 128], strides = [1, 1]} : vector<8x384xf32> to vector<8x128xf32>
    %276 = vector.extract_strided_slice %271 {offsets = [0, 256], sizes = [8, 128], strides = [1, 1]} : vector<8x384xf32> to vector<8x128xf32>
    %277 = arith.mulf %275, %257 : vector<8x128xf32>
    %278 = arith.mulf %274, %273 : vector<8x128xf32>
    %279 = arith.addf %277, %278 : vector<8x128xf32>
    %280 = math.tanh %279 : vector<8x128xf32>
    %281 = arith.mulf %276, %280 : vector<8x128xf32>
    %c24_107 = arith.constant 24 : index
    %c0_108 = arith.constant 0 : index
    %282 = vector.load %arg14[%c24_107, %c0_108] : memref<64x128xf32, #tpu.memory_space<vmem>>, vector<8x128xf32>
    tpu.vector_store %arg14[%c24_107, %c0_108], %281 {strides = array<i32>} : memref<64x128xf32, #tpu.memory_space<vmem>>, vector<8x128xf32>,
    %c32_109 = arith.constant 32 : index
    %c0_110 = arith.constant 0 : index
    %283 = vector.load %arg13[%c32_109, %c0_110] : memref<64x512xf32, #tpu.memory_space<vmem>>, vector<8x512xf32>
    %284 = arith.truncf %281 : vector<8x128xf32> to vector<8x128xbf16>
    %c0_111 = arith.constant 0 : index
    %c0_112 = arith.constant 0 : index
    %285 = vector.load %arg5[%c0_111, %c0_112] : memref<128x512xbf16, #tpu.memory_space<vmem>>, vector<128x512xbf16>
    %cst_113 = arith.constant dense<0.000000e+00> : vector<8x512xf32>
    %286 = tpu.matmul %284, %285, %cst_113 {dimension_numbers = #tpu.dot_dimension_numbers<[1], [0], [0], [1], [0, 0, 1, 1], [], []>} : vector<8x128xbf16>, vector<128x512xbf16>, vector<8x512xf32> -> vector<8x512xf32>
    %287 = arith.addf %283, %286 : vector<8x512xf32>
    %288 = vector.extract_strided_slice %287 {offsets = [0, 0], sizes = [8, 384], strides = [1, 1]} : vector<8x512xf32> to vector<8x384xf32>
    %289 = arith.negf %288 : vector<8x384xf32>
    %290 = math.exp %289 : vector<8x384xf32>
    %cst_114 = arith.constant 1.000000e+00 : f32
    %291 = vector.broadcast %cst_114 : f32 to vector<8x384xf32>
    %292 = arith.addf %291, %290 : vector<8x384xf32>
    %293 = arith.divf %291, %292 : vector<8x384xf32>
    %294 = vector.extract_strided_slice %287 {offsets = [0, 384], sizes = [8, 128], strides = [1, 1]} : vector<8x512xf32> to vector<8x128xf32>
    %295 = math.tanh %294 : vector<8x128xf32>
    %296 = vector.extract_strided_slice %293 {offsets = [0, 0], sizes = [8, 128], strides = [1, 1]} : vector<8x384xf32> to vector<8x128xf32>
    %297 = vector.extract_strided_slice %293 {offsets = [0, 128], sizes = [8, 128], strides = [1, 1]} : vector<8x384xf32> to vector<8x128xf32>
    %298 = vector.extract_strided_slice %293 {offsets = [0, 256], sizes = [8, 128], strides = [1, 1]} : vector<8x384xf32> to vector<8x128xf32>
    %299 = arith.mulf %297, %279 : vector<8x128xf32>
    %300 = arith.mulf %296, %295 : vector<8x128xf32>
    %301 = arith.addf %299, %300 : vector<8x128xf32>
    %302 = math.tanh %301 : vector<8x128xf32>
    %303 = arith.mulf %298, %302 : vector<8x128xf32>
    %c32_115 = arith.constant 32 : index
    %c0_116 = arith.constant 0 : index
    %304 = vector.load %arg14[%c32_115, %c0_116] : memref<64x128xf32, #tpu.memory_space<vmem>>, vector<8x128xf32>
    tpu.vector_store %arg14[%c32_115, %c0_116], %303 {strides = array<i32>} : memref<64x128xf32, #tpu.memory_space<vmem>>, vector<8x128xf32>,
    %c40_117 = arith.constant 40 : index
    %c0_118 = arith.constant 0 : index
    %305 = vector.load %arg13[%c40_117, %c0_118] : memref<64x512xf32, #tpu.memory_space<vmem>>, vector<8x512xf32>
    %306 = arith.truncf %303 : vector<8x128xf32> to vector<8x128xbf16>
    %c0_119 = arith.constant 0 : index
    %c0_120 = arith.constant 0 : index
    %307 = vector.load %arg5[%c0_119, %c0_120] : memref<128x512xbf16, #tpu.memory_space<vmem>>, vector<128x512xbf16>
    %cst_121 = arith.constant dense<0.000000e+00> : vector<8x512xf32>
    %308 = tpu.matmul %306, %307, %cst_121 {dimension_numbers = #tpu.dot_dimension_numbers<[1], [0], [0], [1], [0, 0, 1, 1], [], []>} : vector<8x128xbf16>, vector<128x512xbf16>, vector<8x512xf32> -> vector<8x512xf32>
    %309 = arith.addf %305, %308 : vector<8x512xf32>
    %310 = vector.extract_strided_slice %309 {offsets = [0, 0], sizes = [8, 384], strides = [1, 1]} : vector<8x512xf32> to vector<8x384xf32>
    %311 = arith.negf %310 : vector<8x384xf32>
    %312 = math.exp %311 : vector<8x384xf32>
    %cst_122 = arith.constant 1.000000e+00 : f32
    %313 = vector.broadcast %cst_122 : f32 to vector<8x384xf32>
    %314 = arith.addf %313, %312 : vector<8x384xf32>
    %315 = arith.divf %313, %314 : vector<8x384xf32>
    %316 = vector.extract_strided_slice %309 {offsets = [0, 384], sizes = [8, 128], strides = [1, 1]} : vector<8x512xf32> to vector<8x128xf32>
    %317 = math.tanh %316 : vector<8x128xf32>
    %318 = vector.extract_strided_slice %315 {offsets = [0, 0], sizes = [8, 128], strides = [1, 1]} : vector<8x384xf32> to vector<8x128xf32>
    %319 = vector.extract_strided_slice %315 {offsets = [0, 128], sizes = [8, 128], strides = [1, 1]} : vector<8x384xf32> to vector<8x128xf32>
    %320 = vector.extract_strided_slice %315 {offsets = [0, 256], sizes = [8, 128], strides = [1, 1]} : vector<8x384xf32> to vector<8x128xf32>
    %321 = arith.mulf %319, %301 : vector<8x128xf32>
    %322 = arith.mulf %318, %317 : vector<8x128xf32>
    %323 = arith.addf %321, %322 : vector<8x128xf32>
    %324 = math.tanh %323 : vector<8x128xf32>
    %325 = arith.mulf %320, %324 : vector<8x128xf32>
    %c40_123 = arith.constant 40 : index
    %c0_124 = arith.constant 0 : index
    %326 = vector.load %arg14[%c40_123, %c0_124] : memref<64x128xf32, #tpu.memory_space<vmem>>, vector<8x128xf32>
    tpu.vector_store %arg14[%c40_123, %c0_124], %325 {strides = array<i32>} : memref<64x128xf32, #tpu.memory_space<vmem>>, vector<8x128xf32>,
    %c48_125 = arith.constant 48 : index
    %c0_126 = arith.constant 0 : index
    %327 = vector.load %arg13[%c48_125, %c0_126] : memref<64x512xf32, #tpu.memory_space<vmem>>, vector<8x512xf32>
    %328 = arith.truncf %325 : vector<8x128xf32> to vector<8x128xbf16>
    %c0_127 = arith.constant 0 : index
    %c0_128 = arith.constant 0 : index
    %329 = vector.load %arg5[%c0_127, %c0_128] : memref<128x512xbf16, #tpu.memory_space<vmem>>, vector<128x512xbf16>
    %cst_129 = arith.constant dense<0.000000e+00> : vector<8x512xf32>
    %330 = tpu.matmul %328, %329, %cst_129 {dimension_numbers = #tpu.dot_dimension_numbers<[1], [0], [0], [1], [0, 0, 1, 1], [], []>} : vector<8x128xbf16>, vector<128x512xbf16>, vector<8x512xf32> -> vector<8x512xf32>
    %331 = arith.addf %327, %330 : vector<8x512xf32>
    %332 = vector.extract_strided_slice %331 {offsets = [0, 0], sizes = [8, 384], strides = [1, 1]} : vector<8x512xf32> to vector<8x384xf32>
    %333 = arith.negf %332 : vector<8x384xf32>
    %334 = math.exp %333 : vector<8x384xf32>
    %cst_130 = arith.constant 1.000000e+00 : f32
    %335 = vector.broadcast %cst_130 : f32 to vector<8x384xf32>
    %336 = arith.addf %335, %334 : vector<8x384xf32>
    %337 = arith.divf %335, %336 : vector<8x384xf32>
    %338 = vector.extract_strided_slice %331 {offsets = [0, 384], sizes = [8, 128], strides = [1, 1]} : vector<8x512xf32> to vector<8x128xf32>
    %339 = math.tanh %338 : vector<8x128xf32>
    %340 = vector.extract_strided_slice %337 {offsets = [0, 0], sizes = [8, 128], strides = [1, 1]} : vector<8x384xf32> to vector<8x128xf32>
    %341 = vector.extract_strided_slice %337 {offsets = [0, 128], sizes = [8, 128], strides = [1, 1]} : vector<8x384xf32> to vector<8x128xf32>
    %342 = vector.extract_strided_slice %337 {offsets = [0, 256], sizes = [8, 128], strides = [1, 1]} : vector<8x384xf32> to vector<8x128xf32>
    %343 = arith.mulf %341, %323 : vector<8x128xf32>
    %344 = arith.mulf %340, %339 : vector<8x128xf32>
    %345 = arith.addf %343, %344 : vector<8x128xf32>
    %346 = math.tanh %345 : vector<8x128xf32>
    %347 = arith.mulf %342, %346 : vector<8x128xf32>
    %c48_131 = arith.constant 48 : index
    %c0_132 = arith.constant 0 : index
    %348 = vector.load %arg14[%c48_131, %c0_132] : memref<64x128xf32, #tpu.memory_space<vmem>>, vector<8x128xf32>
    tpu.vector_store %arg14[%c48_131, %c0_132], %347 {strides = array<i32>} : memref<64x128xf32, #tpu.memory_space<vmem>>, vector<8x128xf32>,
    %c56_133 = arith.constant 56 : index
    %c0_134 = arith.constant 0 : index
    %349 = vector.load %arg13[%c56_133, %c0_134] : memref<64x512xf32, #tpu.memory_space<vmem>>, vector<8x512xf32>
    %350 = arith.truncf %347 : vector<8x128xf32> to vector<8x128xbf16>
    %c0_135 = arith.constant 0 : index
    %c0_136 = arith.constant 0 : index
    %351 = vector.load %arg5[%c0_135, %c0_136] : memref<128x512xbf16, #tpu.memory_space<vmem>>, vector<128x512xbf16>
    %cst_137 = arith.constant dense<0.000000e+00> : vector<8x512xf32>
    %352 = tpu.matmul %350, %351, %cst_137 {dimension_numbers = #tpu.dot_dimension_numbers<[1], [0], [0], [1], [0, 0, 1, 1], [], []>} : vector<8x128xbf16>, vector<128x512xbf16>, vector<8x512xf32> -> vector<8x512xf32>
    %353 = arith.addf %349, %352 : vector<8x512xf32>
    %354 = vector.extract_strided_slice %353 {offsets = [0, 0], sizes = [8, 384], strides = [1, 1]} : vector<8x512xf32> to vector<8x384xf32>
    %355 = arith.negf %354 : vector<8x384xf32>
    %356 = math.exp %355 : vector<8x384xf32>
    %cst_138 = arith.constant 1.000000e+00 : f32
    %357 = vector.broadcast %cst_138 : f32 to vector<8x384xf32>
    %358 = arith.addf %357, %356 : vector<8x384xf32>
    %359 = arith.divf %357, %358 : vector<8x384xf32>
    %360 = vector.extract_strided_slice %353 {offsets = [0, 384], sizes = [8, 128], strides = [1, 1]} : vector<8x512xf32> to vector<8x128xf32>
    %361 = math.tanh %360 : vector<8x128xf32>
    %362 = vector.extract_strided_slice %359 {offsets = [0, 0], sizes = [8, 128], strides = [1, 1]} : vector<8x384xf32> to vector<8x128xf32>
    %363 = vector.extract_strided_slice %359 {offsets = [0, 128], sizes = [8, 128], strides = [1, 1]} : vector<8x384xf32> to vector<8x128xf32>
    %364 = vector.extract_strided_slice %359 {offsets = [0, 256], sizes = [8, 128], strides = [1, 1]} : vector<8x384xf32> to vector<8x128xf32>
    %365 = arith.mulf %363, %345 : vector<8x128xf32>
    %366 = arith.mulf %362, %361 : vector<8x128xf32>
    %367 = arith.addf %365, %366 : vector<8x128xf32>
    %368 = math.tanh %367 : vector<8x128xf32>
    %369 = arith.mulf %364, %368 : vector<8x128xf32>
    %c56_139 = arith.constant 56 : index
    %c0_140 = arith.constant 0 : index
    %370 = vector.load %arg14[%c56_139, %c0_140] : memref<64x128xf32, #tpu.memory_space<vmem>>, vector<8x128xf32>
    tpu.vector_store %arg14[%c56_139, %c0_140], %369 {strides = array<i32>} : memref<64x128xf32, #tpu.memory_space<vmem>>, vector<8x128xf32>,
    %c0_141 = arith.constant 0 : index
    %c0_142 = arith.constant 0 : index
    %371 = vector.load %arg14[%c0_141, %c0_142] : memref<64x128xf32, #tpu.memory_space<vmem>>, vector<64x128xf32>
    %372 = arith.truncf %371 : vector<64x128xf32> to vector<64x128xbf16>
    %c0_143 = arith.constant 0 : index
    %c0_144 = arith.constant 0 : index
    %373 = vector.load %arg7[%c0_143, %c0_144] : memref<128x512xbf16, #tpu.memory_space<vmem>>, vector<128x512xbf16>
    %cst_145 = arith.constant dense<0.000000e+00> : vector<64x512xf32>
    %374 = tpu.matmul %372, %373, %cst_145 {dimension_numbers = #tpu.dot_dimension_numbers<[1], [0], [0], [1], [0, 0, 1, 1], [], []>} : vector<64x128xbf16>, vector<128x512xbf16>, vector<64x512xf32> -> vector<64x512xf32>
    %c0_146 = arith.constant 0 : index
    %c0_147 = arith.constant 0 : index
    %375 = vector.load %arg9[%c0_146, %c0_147] : memref<1x512xf32, #tpu.memory_space<vmem>>, vector<1x512xf32>
    %376 = vector.broadcast %375 : vector<1x512xf32> to vector<64x512xf32>
    %377 = arith.addf %374, %376 : vector<64x512xf32>
    %c0_148 = arith.constant 0 : index
    %c0_149 = arith.constant 0 : index
    %378 = vector.load %arg13[%c0_148, %c0_149] : memref<64x512xf32, #tpu.memory_space<vmem>>, vector<64x512xf32>
    tpu.vector_store %arg13[%c0_148, %c0_149], %377 {strides = array<i32>} : memref<64x512xf32, #tpu.memory_space<vmem>>, vector<64x512xf32>,
    %cst_150 = arith.constant 0.000000e+00 : f32
    %379 = vector.broadcast %cst_150 : f32 to vector<8x128xf32>
    %cst_151 = arith.constant 0.000000e+00 : f32
    %380 = vector.broadcast %cst_151 : f32 to vector<8x128xf32>
    %c0_152 = arith.constant 0 : index
    %c0_153 = arith.constant 0 : index
    %381 = vector.load %arg13[%c0_152, %c0_153] : memref<64x512xf32, #tpu.memory_space<vmem>>, vector<8x512xf32>
    %382 = arith.truncf %379 : vector<8x128xf32> to vector<8x128xbf16>
    %c0_154 = arith.constant 0 : index
    %c0_155 = arith.constant 0 : index
    %383 = vector.load %arg8[%c0_154, %c0_155] : memref<128x512xbf16, #tpu.memory_space<vmem>>, vector<128x512xbf16>
    %cst_156 = arith.constant dense<0.000000e+00> : vector<8x512xf32>
    %384 = tpu.matmul %382, %383, %cst_156 {dimension_numbers = #tpu.dot_dimension_numbers<[1], [0], [0], [1], [0, 0, 1, 1], [], []>} : vector<8x128xbf16>, vector<128x512xbf16>, vector<8x512xf32> -> vector<8x512xf32>
    %385 = arith.addf %381, %384 : vector<8x512xf32>
    %386 = vector.extract_strided_slice %385 {offsets = [0, 0], sizes = [8, 384], strides = [1, 1]} : vector<8x512xf32> to vector<8x384xf32>
    %387 = arith.negf %386 : vector<8x384xf32>
    %388 = math.exp %387 : vector<8x384xf32>
    %cst_157 = arith.constant 1.000000e+00 : f32
    %389 = vector.broadcast %cst_157 : f32 to vector<8x384xf32>
    %390 = arith.addf %389, %388 : vector<8x384xf32>
    %391 = arith.divf %389, %390 : vector<8x384xf32>
    %392 = vector.extract_strided_slice %385 {offsets = [0, 384], sizes = [8, 128], strides = [1, 1]} : vector<8x512xf32> to vector<8x128xf32>
    %393 = math.tanh %392 : vector<8x128xf32>
    %394 = vector.extract_strided_slice %391 {offsets = [0, 0], sizes = [8, 128], strides = [1, 1]} : vector<8x384xf32> to vector<8x128xf32>
    %395 = vector.extract_strided_slice %391 {offsets = [0, 128], sizes = [8, 128], strides = [1, 1]} : vector<8x384xf32> to vector<8x128xf32>
    %396 = vector.extract_strided_slice %391 {offsets = [0, 256], sizes = [8, 128], strides = [1, 1]} : vector<8x384xf32> to vector<8x128xf32>
    %397 = arith.mulf %395, %380 : vector<8x128xf32>
    %398 = arith.mulf %394, %393 : vector<8x128xf32>
    %399 = arith.addf %397, %398 : vector<8x128xf32>
    %400 = math.tanh %399 : vector<8x128xf32>
    %401 = arith.mulf %396, %400 : vector<8x128xf32>
    %c8_158 = arith.constant 8 : index
    %c0_159 = arith.constant 0 : index
    %402 = vector.load %arg13[%c8_158, %c0_159] : memref<64x512xf32, #tpu.memory_space<vmem>>, vector<8x512xf32>
    %403 = arith.truncf %401 : vector<8x128xf32> to vector<8x128xbf16>
    %c0_160 = arith.constant 0 : index
    %c0_161 = arith.constant 0 : index
    %404 = vector.load %arg8[%c0_160, %c0_161] : memref<128x512xbf16, #tpu.memory_space<vmem>>, vector<128x512xbf16>
    %cst_162 = arith.constant dense<0.000000e+00> : vector<8x512xf32>
    %405 = tpu.matmul %403, %404, %cst_162 {dimension_numbers = #tpu.dot_dimension_numbers<[1], [0], [0], [1], [0, 0, 1, 1], [], []>} : vector<8x128xbf16>, vector<128x512xbf16>, vector<8x512xf32> -> vector<8x512xf32>
    %406 = arith.addf %402, %405 : vector<8x512xf32>
    %407 = vector.extract_strided_slice %406 {offsets = [0, 0], sizes = [8, 384], strides = [1, 1]} : vector<8x512xf32> to vector<8x384xf32>
    %408 = arith.negf %407 : vector<8x384xf32>
    %409 = math.exp %408 : vector<8x384xf32>
    %cst_163 = arith.constant 1.000000e+00 : f32
    %410 = vector.broadcast %cst_163 : f32 to vector<8x384xf32>
    %411 = arith.addf %410, %409 : vector<8x384xf32>
    %412 = arith.divf %410, %411 : vector<8x384xf32>
    %413 = vector.extract_strided_slice %406 {offsets = [0, 384], sizes = [8, 128], strides = [1, 1]} : vector<8x512xf32> to vector<8x128xf32>
    %414 = math.tanh %413 : vector<8x128xf32>
    %415 = vector.extract_strided_slice %412 {offsets = [0, 0], sizes = [8, 128], strides = [1, 1]} : vector<8x384xf32> to vector<8x128xf32>
    %416 = vector.extract_strided_slice %412 {offsets = [0, 128], sizes = [8, 128], strides = [1, 1]} : vector<8x384xf32> to vector<8x128xf32>
    %417 = vector.extract_strided_slice %412 {offsets = [0, 256], sizes = [8, 128], strides = [1, 1]} : vector<8x384xf32> to vector<8x128xf32>
    %418 = arith.mulf %416, %399 : vector<8x128xf32>
    %419 = arith.mulf %415, %414 : vector<8x128xf32>
    %420 = arith.addf %418, %419 : vector<8x128xf32>
    %421 = math.tanh %420 : vector<8x128xf32>
    %422 = arith.mulf %417, %421 : vector<8x128xf32>
    %c16_164 = arith.constant 16 : index
    %c0_165 = arith.constant 0 : index
    %423 = vector.load %arg13[%c16_164, %c0_165] : memref<64x512xf32, #tpu.memory_space<vmem>>, vector<8x512xf32>
    %424 = arith.truncf %422 : vector<8x128xf32> to vector<8x128xbf16>
    %c0_166 = arith.constant 0 : index
    %c0_167 = arith.constant 0 : index
    %425 = vector.load %arg8[%c0_166, %c0_167] : memref<128x512xbf16, #tpu.memory_space<vmem>>, vector<128x512xbf16>
    %cst_168 = arith.constant dense<0.000000e+00> : vector<8x512xf32>
    %426 = tpu.matmul %424, %425, %cst_168 {dimension_numbers = #tpu.dot_dimension_numbers<[1], [0], [0], [1], [0, 0, 1, 1], [], []>} : vector<8x128xbf16>, vector<128x512xbf16>, vector<8x512xf32> -> vector<8x512xf32>
    %427 = arith.addf %423, %426 : vector<8x512xf32>
    %428 = vector.extract_strided_slice %427 {offsets = [0, 0], sizes = [8, 384], strides = [1, 1]} : vector<8x512xf32> to vector<8x384xf32>
    %429 = arith.negf %428 : vector<8x384xf32>
    %430 = math.exp %429 : vector<8x384xf32>
    %cst_169 = arith.constant 1.000000e+00 : f32
    %431 = vector.broadcast %cst_169 : f32 to vector<8x384xf32>
    %432 = arith.addf %431, %430 : vector<8x384xf32>
    %433 = arith.divf %431, %432 : vector<8x384xf32>
    %434 = vector.extract_strided_slice %427 {offsets = [0, 384], sizes = [8, 128], strides = [1, 1]} : vector<8x512xf32> to vector<8x128xf32>
    %435 = math.tanh %434 : vector<8x128xf32>
    %436 = vector.extract_strided_slice %433 {offsets = [0, 0], sizes = [8, 128], strides = [1, 1]} : vector<8x384xf32> to vector<8x128xf32>
    %437 = vector.extract_strided_slice %433 {offsets = [0, 128], sizes = [8, 128], strides = [1, 1]} : vector<8x384xf32> to vector<8x128xf32>
    %438 = vector.extract_strided_slice %433 {offsets = [0, 256], sizes = [8, 128], strides = [1, 1]} : vector<8x384xf32> to vector<8x128xf32>
    %439 = arith.mulf %437, %420 : vector<8x128xf32>
    %440 = arith.mulf %436, %435 : vector<8x128xf32>
    %441 = arith.addf %439, %440 : vector<8x128xf32>
    %442 = math.tanh %441 : vector<8x128xf32>
    %443 = arith.mulf %438, %442 : vector<8x128xf32>
    %c24_170 = arith.constant 24 : index
    %c0_171 = arith.constant 0 : index
    %444 = vector.load %arg13[%c24_170, %c0_171] : memref<64x512xf32, #tpu.memory_space<vmem>>, vector<8x512xf32>
    %445 = arith.truncf %443 : vector<8x128xf32> to vector<8x128xbf16>
    %c0_172 = arith.constant 0 : index
    %c0_173 = arith.constant 0 : index
    %446 = vector.load %arg8[%c0_172, %c0_173] : memref<128x512xbf16, #tpu.memory_space<vmem>>, vector<128x512xbf16>
    %cst_174 = arith.constant dense<0.000000e+00> : vector<8x512xf32>
    %447 = tpu.matmul %445, %446, %cst_174 {dimension_numbers = #tpu.dot_dimension_numbers<[1], [0], [0], [1], [0, 0, 1, 1], [], []>} : vector<8x128xbf16>, vector<128x512xbf16>, vector<8x512xf32> -> vector<8x512xf32>
    %448 = arith.addf %444, %447 : vector<8x512xf32>
    %449 = vector.extract_strided_slice %448 {offsets = [0, 0], sizes = [8, 384], strides = [1, 1]} : vector<8x512xf32> to vector<8x384xf32>
    %450 = arith.negf %449 : vector<8x384xf32>
    %451 = math.exp %450 : vector<8x384xf32>
    %cst_175 = arith.constant 1.000000e+00 : f32
    %452 = vector.broadcast %cst_175 : f32 to vector<8x384xf32>
    %453 = arith.addf %452, %451 : vector<8x384xf32>
    %454 = arith.divf %452, %453 : vector<8x384xf32>
    %455 = vector.extract_strided_slice %448 {offsets = [0, 384], sizes = [8, 128], strides = [1, 1]} : vector<8x512xf32> to vector<8x128xf32>
    %456 = math.tanh %455 : vector<8x128xf32>
    %457 = vector.extract_strided_slice %454 {offsets = [0, 0], sizes = [8, 128], strides = [1, 1]} : vector<8x384xf32> to vector<8x128xf32>
    %458 = vector.extract_strided_slice %454 {offsets = [0, 128], sizes = [8, 128], strides = [1, 1]} : vector<8x384xf32> to vector<8x128xf32>
    %459 = vector.extract_strided_slice %454 {offsets = [0, 256], sizes = [8, 128], strides = [1, 1]} : vector<8x384xf32> to vector<8x128xf32>
    %460 = arith.mulf %458, %441 : vector<8x128xf32>
    %461 = arith.mulf %457, %456 : vector<8x128xf32>
    %462 = arith.addf %460, %461 : vector<8x128xf32>
    %463 = math.tanh %462 : vector<8x128xf32>
    %464 = arith.mulf %459, %463 : vector<8x128xf32>
    %c32_176 = arith.constant 32 : index
    %c0_177 = arith.constant 0 : index
    %465 = vector.load %arg13[%c32_176, %c0_177] : memref<64x512xf32, #tpu.memory_space<vmem>>, vector<8x512xf32>
    %466 = arith.truncf %464 : vector<8x128xf32> to vector<8x128xbf16>
    %c0_178 = arith.constant 0 : index
    %c0_179 = arith.constant 0 : index
    %467 = vector.load %arg8[%c0_178, %c0_179] : memref<128x512xbf16, #tpu.memory_space<vmem>>, vector<128x512xbf16>
    %cst_180 = arith.constant dense<0.000000e+00> : vector<8x512xf32>
    %468 = tpu.matmul %466, %467, %cst_180 {dimension_numbers = #tpu.dot_dimension_numbers<[1], [0], [0], [1], [0, 0, 1, 1], [], []>} : vector<8x128xbf16>, vector<128x512xbf16>, vector<8x512xf32> -> vector<8x512xf32>
    %469 = arith.addf %465, %468 : vector<8x512xf32>
    %470 = vector.extract_strided_slice %469 {offsets = [0, 0], sizes = [8, 384], strides = [1, 1]} : vector<8x512xf32> to vector<8x384xf32>
    %471 = arith.negf %470 : vector<8x384xf32>
    %472 = math.exp %471 : vector<8x384xf32>
    %cst_181 = arith.constant 1.000000e+00 : f32
    %473 = vector.broadcast %cst_181 : f32 to vector<8x384xf32>
    %474 = arith.addf %473, %472 : vector<8x384xf32>
    %475 = arith.divf %473, %474 : vector<8x384xf32>
    %476 = vector.extract_strided_slice %469 {offsets = [0, 384], sizes = [8, 128], strides = [1, 1]} : vector<8x512xf32> to vector<8x128xf32>
    %477 = math.tanh %476 : vector<8x128xf32>
    %478 = vector.extract_strided_slice %475 {offsets = [0, 0], sizes = [8, 128], strides = [1, 1]} : vector<8x384xf32> to vector<8x128xf32>
    %479 = vector.extract_strided_slice %475 {offsets = [0, 128], sizes = [8, 128], strides = [1, 1]} : vector<8x384xf32> to vector<8x128xf32>
    %480 = vector.extract_strided_slice %475 {offsets = [0, 256], sizes = [8, 128], strides = [1, 1]} : vector<8x384xf32> to vector<8x128xf32>
    %481 = arith.mulf %479, %462 : vector<8x128xf32>
    %482 = arith.mulf %478, %477 : vector<8x128xf32>
    %483 = arith.addf %481, %482 : vector<8x128xf32>
    %484 = math.tanh %483 : vector<8x128xf32>
    %485 = arith.mulf %480, %484 : vector<8x128xf32>
    %c40_182 = arith.constant 40 : index
    %c0_183 = arith.constant 0 : index
    %486 = vector.load %arg13[%c40_182, %c0_183] : memref<64x512xf32, #tpu.memory_space<vmem>>, vector<8x512xf32>
    %487 = arith.truncf %485 : vector<8x128xf32> to vector<8x128xbf16>
    %c0_184 = arith.constant 0 : index
    %c0_185 = arith.constant 0 : index
    %488 = vector.load %arg8[%c0_184, %c0_185] : memref<128x512xbf16, #tpu.memory_space<vmem>>, vector<128x512xbf16>
    %cst_186 = arith.constant dense<0.000000e+00> : vector<8x512xf32>
    %489 = tpu.matmul %487, %488, %cst_186 {dimension_numbers = #tpu.dot_dimension_numbers<[1], [0], [0], [1], [0, 0, 1, 1], [], []>} : vector<8x128xbf16>, vector<128x512xbf16>, vector<8x512xf32> -> vector<8x512xf32>
    %490 = arith.addf %486, %489 : vector<8x512xf32>
    %491 = vector.extract_strided_slice %490 {offsets = [0, 0], sizes = [8, 384], strides = [1, 1]} : vector<8x512xf32> to vector<8x384xf32>
    %492 = arith.negf %491 : vector<8x384xf32>
    %493 = math.exp %492 : vector<8x384xf32>
    %cst_187 = arith.constant 1.000000e+00 : f32
    %494 = vector.broadcast %cst_187 : f32 to vector<8x384xf32>
    %495 = arith.addf %494, %493 : vector<8x384xf32>
    %496 = arith.divf %494, %495 : vector<8x384xf32>
    %497 = vector.extract_strided_slice %490 {offsets = [0, 384], sizes = [8, 128], strides = [1, 1]} : vector<8x512xf32> to vector<8x128xf32>
    %498 = math.tanh %497 : vector<8x128xf32>
    %499 = vector.extract_strided_slice %496 {offsets = [0, 0], sizes = [8, 128], strides = [1, 1]} : vector<8x384xf32> to vector<8x128xf32>
    %500 = vector.extract_strided_slice %496 {offsets = [0, 128], sizes = [8, 128], strides = [1, 1]} : vector<8x384xf32> to vector<8x128xf32>
    %501 = vector.extract_strided_slice %496 {offsets = [0, 256], sizes = [8, 128], strides = [1, 1]} : vector<8x384xf32> to vector<8x128xf32>
    %502 = arith.mulf %500, %483 : vector<8x128xf32>
    %503 = arith.mulf %499, %498 : vector<8x128xf32>
    %504 = arith.addf %502, %503 : vector<8x128xf32>
    %505 = math.tanh %504 : vector<8x128xf32>
    %506 = arith.mulf %501, %505 : vector<8x128xf32>
    %c48_188 = arith.constant 48 : index
    %c0_189 = arith.constant 0 : index
    %507 = vector.load %arg13[%c48_188, %c0_189] : memref<64x512xf32, #tpu.memory_space<vmem>>, vector<8x512xf32>
    %508 = arith.truncf %506 : vector<8x128xf32> to vector<8x128xbf16>
    %c0_190 = arith.constant 0 : index
    %c0_191 = arith.constant 0 : index
    %509 = vector.load %arg8[%c0_190, %c0_191] : memref<128x512xbf16, #tpu.memory_space<vmem>>, vector<128x512xbf16>
    %cst_192 = arith.constant dense<0.000000e+00> : vector<8x512xf32>
    %510 = tpu.matmul %508, %509, %cst_192 {dimension_numbers = #tpu.dot_dimension_numbers<[1], [0], [0], [1], [0, 0, 1, 1], [], []>} : vector<8x128xbf16>, vector<128x512xbf16>, vector<8x512xf32> -> vector<8x512xf32>
    %511 = arith.addf %507, %510 : vector<8x512xf32>
    %512 = vector.extract_strided_slice %511 {offsets = [0, 0], sizes = [8, 384], strides = [1, 1]} : vector<8x512xf32> to vector<8x384xf32>
    %513 = arith.negf %512 : vector<8x384xf32>
    %514 = math.exp %513 : vector<8x384xf32>
    %cst_193 = arith.constant 1.000000e+00 : f32
    %515 = vector.broadcast %cst_193 : f32 to vector<8x384xf32>
    %516 = arith.addf %515, %514 : vector<8x384xf32>
    %517 = arith.divf %515, %516 : vector<8x384xf32>
    %518 = vector.extract_strided_slice %511 {offsets = [0, 384], sizes = [8, 128], strides = [1, 1]} : vector<8x512xf32> to vector<8x128xf32>
    %519 = math.tanh %518 : vector<8x128xf32>
    %520 = vector.extract_strided_slice %517 {offsets = [0, 0], sizes = [8, 128], strides = [1, 1]} : vector<8x384xf32> to vector<8x128xf32>
    %521 = vector.extract_strided_slice %517 {offsets = [0, 128], sizes = [8, 128], strides = [1, 1]} : vector<8x384xf32> to vector<8x128xf32>
    %522 = vector.extract_strided_slice %517 {offsets = [0, 256], sizes = [8, 128], strides = [1, 1]} : vector<8x384xf32> to vector<8x128xf32>
    %523 = arith.mulf %521, %504 : vector<8x128xf32>
    %524 = arith.mulf %520, %519 : vector<8x128xf32>
    %525 = arith.addf %523, %524 : vector<8x128xf32>
    %526 = math.tanh %525 : vector<8x128xf32>
    %527 = arith.mulf %522, %526 : vector<8x128xf32>
    %c56_194 = arith.constant 56 : index
    %c0_195 = arith.constant 0 : index
    %528 = vector.load %arg13[%c56_194, %c0_195] : memref<64x512xf32, #tpu.memory_space<vmem>>, vector<8x512xf32>
    %529 = arith.truncf %527 : vector<8x128xf32> to vector<8x128xbf16>
    %c0_196 = arith.constant 0 : index
    %c0_197 = arith.constant 0 : index
    %530 = vector.load %arg8[%c0_196, %c0_197] : memref<128x512xbf16, #tpu.memory_space<vmem>>, vector<128x512xbf16>
    %cst_198 = arith.constant dense<0.000000e+00> : vector<8x512xf32>
    %531 = tpu.matmul %529, %530, %cst_198 {dimension_numbers = #tpu.dot_dimension_numbers<[1], [0], [0], [1], [0, 0, 1, 1], [], []>} : vector<8x128xbf16>, vector<128x512xbf16>, vector<8x512xf32> -> vector<8x512xf32>
    %532 = arith.addf %528, %531 : vector<8x512xf32>
    %533 = vector.extract_strided_slice %532 {offsets = [0, 0], sizes = [8, 384], strides = [1, 1]} : vector<8x512xf32> to vector<8x384xf32>
    %534 = arith.negf %533 : vector<8x384xf32>
    %535 = math.exp %534 : vector<8x384xf32>
    %cst_199 = arith.constant 1.000000e+00 : f32
    %536 = vector.broadcast %cst_199 : f32 to vector<8x384xf32>
    %537 = arith.addf %536, %535 : vector<8x384xf32>
    %538 = arith.divf %536, %537 : vector<8x384xf32>
    %539 = vector.extract_strided_slice %532 {offsets = [0, 384], sizes = [8, 128], strides = [1, 1]} : vector<8x512xf32> to vector<8x128xf32>
    %540 = math.tanh %539 : vector<8x128xf32>
    %541 = vector.extract_strided_slice %538 {offsets = [0, 0], sizes = [8, 128], strides = [1, 1]} : vector<8x384xf32> to vector<8x128xf32>
    %542 = vector.extract_strided_slice %538 {offsets = [0, 128], sizes = [8, 128], strides = [1, 1]} : vector<8x384xf32> to vector<8x128xf32>
    %543 = vector.extract_strided_slice %538 {offsets = [0, 256], sizes = [8, 128], strides = [1, 1]} : vector<8x384xf32> to vector<8x128xf32>
    %544 = arith.mulf %542, %525 : vector<8x128xf32>
    %545 = arith.mulf %541, %540 : vector<8x128xf32>
    %546 = arith.addf %544, %545 : vector<8x128xf32>
    %547 = math.tanh %546 : vector<8x128xf32>
    %548 = arith.mulf %543, %547 : vector<8x128xf32>
    %549 = arith.truncf %548 : vector<8x128xf32> to vector<8x128xbf16>
    %c0_200 = arith.constant 0 : index
    %c0_201 = arith.constant 0 : index
    %550 = vector.load %arg10[%c0_200, %c0_201] : memref<128x1xbf16, #tpu.memory_space<vmem>>, vector<128x1xbf16>
    %cst_202 = arith.constant dense<0.000000e+00> : vector<8x1xf32>
    %551 = tpu.matmul %549, %550, %cst_202 {dimension_numbers = #tpu.dot_dimension_numbers<[1], [0], [0], [1], [0, 0, 1, 1], [], []>} : vector<8x128xbf16>, vector<128x1xbf16>, vector<8x1xf32> -> vector<8x1xf32>
    %c0_203 = arith.constant 0 : index
    %c0_204 = arith.constant 0 : index
    %552 = vector.load %arg11[%c0_203, %c0_204] : memref<1x1xf32, #tpu.memory_space<vmem>>, vector<1x1xf32>
    %553 = vector.broadcast %552 : vector<1x1xf32> to vector<8x1xf32>
    %554 = arith.addf %551, %553 : vector<8x1xf32>
    %c0_205 = arith.constant 0 : index
    %c0_206 = arith.constant 0 : index
    %555 = vector.load %arg12[%c0_205, %c0_206] : memref<8x1xf32, #tpu.memory_space<vmem>>, vector<8x1xf32>
    tpu.vector_store %arg12[%c0_205, %c0_206], %554 {strides = array<i32>} : memref<8x1xf32, #tpu.memory_space<vmem>>, vector<8x1xf32>,
    return
  }
}

</mosaic_0001>

<bundles_post_ra>
// kernel: tpu_custom_call.1
= control target key start
LH: loop header
LB: loop body
LE: loop exit
PB: predicated region body
PF: predicated region fallthrough
CT: control target
= control target key end

     0   :  { %s10909_s0 = inlined_call_operand.vmem [shape: bf16[64,3], index: 0, kind: input, shape index: {}]   ;;  %s10910_s1 = inlined_call_operand.vmem [shape: bf16[3,512], index: 1, kind: input, shape index: {}]   ;;  %s10911_s2 = inlined_call_operand.hbm [shape: bf16[128,512], index: 2, kind: input, shape index: {}]   ;;  %s10912_s3 = inlined_call_operand.vmem [shape: f32[1,512], index: 3, kind: input, shape index: {}]   ;;  %s10913_s4 = inlined_call_operand.hbm [shape: bf16[128,512], index: 4, kind: input, shape index: {}]   ;;  %s10914_s5 = inlined_call_operand.hbm [shape: bf16[128,512], index: 5, kind: input, shape index: {}]   ;;  %s10915_s6 = inlined_call_operand.vmem [shape: f32[1,512], index: 6, kind: input, shape index: {}]   ;;  %s10916_s7 = inlined_call_operand.hbm [shape: bf16[128,512], index: 7, kind: input, shape index: {}]   ;;  %s10917_s8 = inlined_call_operand.hbm [shape: bf16[128,512], index: 8, kind: input, shape index: {}]   ;;  %s10918_s9 = inlined_call_operand.vmem [shape: f32[1,512], index: 9, kind: input, shape index: {}]   ;;  %s10919_s10 = inlined_call_operand.vmem [shape: bf16[128,1], index: 10, kind: input, shape index: {}]   ;;  %s10920_s11 = inlined_call_operand.<no memory space> [shape: f32[1,1], index: 11, kind: input, shape index: {}]   ;;  %s10921_s12 = inlined_call_operand.vmem [shape: f32[8,1], index: 12, kind: output, shape index: {}]  }
   0x1   :  { %v17_v0 = vstv %s10920_s11 }
   0x2   :  { %18 = vst [vmem:[#allocation4] sm:$0x1] %v17_v0 }
   0x3   :  { %19 = vsyncpa [#allocation6], 0 }
   0x4   :  { %20 = vsyncpa [#allocation8], 0 }
   0x5   :  { %21 = vsyncpa [#allocation11], 0  ;;  %s8977_s23 = smov [#allocation7]   ;;  %s8978_s25 = smov [#allocation10]  }
   0x6   :  { %s45_s24 = sshll.u32 %s8977_s23, 4  ;;  %s71_s26 = sshll.u32 %s8978_s25, 4  ;;  %s46_s24 = int_to_ptr.vmem [resolvable:$true] %s45_s24  ;;  %s72_s26 = int_to_ptr.vmem [resolvable:$true] %s71_s26 }
   0x7   :  { %s8879_s27 = scalar_lea.vmem %s46_s24, 4096  ;;  %p8884_p1 = scmp.lt.s32.totalorder %s46_s24, %s46_s24 }
   0x8   :  { %p8880_p0 = scmp.ne.s32.totalorder %s46_s24, %s8879_s27  ;;  %p8885_p2 = scmp.lt.s32.totalorder %s8879_s27, %s8879_s27 }
   0xa   :  { %p8886_p3 = por %p8885_p2, %p8884_p1 }
   0xc   :  { %p8887_p4 = pnand %p8886_p3, %p8880_p0 }
   0xe   :  { %8890 = shalt.err (!%p8887_p4)
}
   0xf   :  { %s8979_s28 = smov 256   ;;  %s8980_s29 = smov 16  }
  0x10   :  { %51 = dma.hbm_to_vmem [thread:$0]  %s10913_s4, 4096, %s46_s24, [#allocation8], %s8979_s28, %s8979_s28, %s8980_s29  }
  0x11   :  { %s8899_s13 = scalar_lea.vmem %s72_s26, 4096  ;;  %p8904_p6 = scmp.lt.s32.totalorder %s72_s26, %s72_s26 }
  0x12   :  { %p8900_p5 = scmp.ne.s32.totalorder %s72_s26, %s8899_s13  ;;  %p8905_p7 = scmp.lt.s32.totalorder %s8899_s13, %s8899_s13 }
  0x14   :  { %p8906_p8 = por %p8905_p7, %p8904_p6 }
  0x16   :  { %p8907_p9 = pnand %p8906_p8, %p8900_p5 }
  0x18   :  { %8910 = shalt.err (!%p8907_p9)
}
  0x19   :  { %77 = dma.hbm_to_vmem [thread:$0]  %s10916_s7, 4096, %s72_s26, [#allocation11], %s8979_s28, %s8979_s28, %s8980_s29  }
  0x1a   :  { %s8981_s16 = smov [#allocation5]   ;;  %s8982_s18 = smov [#allocation9]  }
  0x1b   :  { %s31_s17 = sshll.u32 %s8981_s16, 4  ;;  %s57_s19 = sshll.u32 %s8982_s18, 4  ;;  %s32_s17 = int_to_ptr.vmem [resolvable:$true] %s31_s17  ;;  %s58_s19 = int_to_ptr.vmem [resolvable:$true] %s57_s19 }
  0x1c   :  { %s8919_s4 = scalar_lea.vmem %s32_s17, 4096  ;;  %p8924_p11 = scmp.lt.s32.totalorder %s32_s17, %s32_s17 }
  0x1d   :  { %p8920_p10 = scmp.ne.s32.totalorder %s32_s17, %s8919_s4  ;;  %p8925_p12 = scmp.lt.s32.totalorder %s8919_s4, %s8919_s4 }
  0x1f   :  { %p8926_p13 = por %p8925_p12, %p8924_p11 }
  0x21   :  { %p8927_p0 = pnand %p8926_p13, %p8920_p10 }
  0x23   :  { %8930 = shalt.err (!%p8927_p0)
}
  0x24   :  { %37 = dma.hbm_to_vmem [thread:$0]  %s10911_s2, 4096, %s32_s17, [#allocation6], %s8979_s28, %s8979_s28, %s8980_s29  }
  0x25   :  { %s8939_s7 = scalar_lea.vmem %s58_s19, 4096  ;;  %p8944_p2 = scmp.lt.s32.totalorder %s58_s19, %s58_s19 }
  0x26   :  { %p8940_p1 = scmp.ne.s32.totalorder %s58_s19, %s8939_s7  ;;  %p8945_p3 = scmp.lt.s32.totalorder %s8939_s7, %s8939_s7 }
  0x28   :  { %p8946_p4 = por %p8945_p3, %p8944_p2 }
  0x2a   :  { %p8947_p5 = pnand %p8946_p4, %p8940_p1 }
  0x2c   :  { %8950 = shalt.err (!%p8947_p5)
}
  0x2d   :  { %63 = dma.hbm_to_vmem [thread:$0]  %s10914_s5, 4096, %s58_s19, [#allocation8], %s8979_s28, %s8979_s28, %s8980_s29  }
  0x2e   :  { %s8983_s24 = smov [#allocation12]  }
  0x2f   :  { %s83_s25 = sshll.u32 %s8983_s24, 4  ;;  %s84_s25 = int_to_ptr.vmem [resolvable:$true] %s83_s25 }
  0x30   :  { %s8959_s26 = scalar_lea.vmem %s84_s25, 4096  ;;  %p8964_p7 = scmp.lt.s32.totalorder %s84_s25, %s84_s25 }
  0x31   :  { %p8960_p6 = scmp.ne.s32.totalorder %s84_s25, %s8959_s26  ;;  %p8965_p8 = scmp.lt.s32.totalorder %s8959_s26, %s8959_s26 }
  0x33   :  { %p8966_p9 = por %p8965_p8, %p8964_p7 }
  0x35   :  { %p8967_p10 = pnand %p8966_p9, %p8960_p6 }
  0x37   :  { %8970 = shalt.err (!%p8967_p10)
}
  0x38   :  { %89 = dma.hbm_to_vmem [thread:$0]  %s10917_s8, 4096, %s84_s25, [#allocation11], %s8979_s28, %s8979_s28, %s8980_s29  }
  0x39   :  { %8971 = dma.done.wait [#allocation6], 4096  }
  0x3a   :  { %8972 = vsyncadd [#allocation6], 4294963200 }
  0x3b   :  { %8973 = dma.done.wait [#allocation8], 8192  }
  0x3c   :  { %8974 = vsyncadd [#allocation8], 4294959104 }
  0x3d   :  { %8975 = dma.done.wait [#allocation11], 8192  }
  0x3e   :  { %8976 = vsyncadd [#allocation11], 4294959104  ;;  %v123_v1 = vlaneseq  ;;  %v8984_v2 = vmov 1983009808   ;;  %vm194_vm0 = vcmask 1040384   ;;  %v10922_v5 = vmov 0  }
  0x3f   :  { %v166_v3 = vunpack.c.l.s4 %v8984_v2  ;;  %242 = vmatprep.mubr.bf16.mxu0 %v10922_v5  ;;  %315 = vmatprep.mubr.bf16.mxu1 %v10922_v5  ;;  %vm195_vm1 = vcmask 1041408   ;;  %v8986_v8 = vmov 65535   ;;  %v120_v10 = vld [vmem:[%s10910_s1] sm:$0xff]  ;;  %vm181_vm2 = vcmask 23552   ;;  %v9107_v26 = vld [vmem:[#allocation5 + $0xe8] ss:$16 sps:$4 sm:$0xff]  }
  0x40   :  { %v9087_v4 = vshrl.u32 %v123_v1, 7  ;;  %v196_v9 = vsel %vm194_vm0, 4294967295, %v8986_v8  ;;  %v164_v13 = vcombine.high %v120_v10, %v120_v10  ;;  %v9095_v19 = vld [vmem:[#allocation5 + $0xe4] ss:$16 sps:$4 sm:$0xff]   ;;  %v9100_v23 = vld [vmem:[#allocation5 + $0xec] ss:$16 sps:$4 sm:$0xff]  }
  0x41   :  { %v167_v6 = vunpack.c.0.s8 %v166_v3  ;;  %v197_v12 = vsel %vm195_vm1, %v196_v9, 0  ;;  %v8097_v21 = vld [vmem:[%s10909_s0] sm:$0xff]   ;;  %v9116_v29 = vld [vmem:[#allocation5 + $0xc8] ss:$16 sps:$4 sm:$0xff]   ;;  %v8123_v40 = vld [vmem:[%s10909_s0 + $0x10] sm:$0xff]   ;;  %vm8988_vm3 = vmmov 0  }
  0x42   :  { %v9102_v24 = vld [vmem:[#allocation5 + $0xe0] ss:$16 sps:$4 sm:$0xff]   ;;  %v9105_v25 = vld [vmem:[#allocation5 + $0xc4] ss:$16 sps:$4 sm:$0xff]   ;;  %v9111_v27 = vld [vmem:[#allocation5 + $0xcc] ss:$16 sps:$4 sm:$0xff]  }
  0x43   :  { %v170_v7 = vsub.s32 %v167_v6, %v9087_v4  ;;  %v9114_v28 = vld [vmem:[#allocation5 + $0xc0] ss:$16 sps:$4 sm:$0xff]   ;;  %v9121_v30 = vld [vmem:[#allocation5 + $0xa4] ss:$16 sps:$4 sm:$0xff]   ;;  %v9129_v32 = vld [vmem:[#allocation5 + $0xac] ss:$16 sps:$4 sm:$0xff]  }
  0x44   :  { %v8110_v31 = vld [vmem:[%s10909_s0 + $0x8] sm:$0xff]   ;;  %v9132_v33 = vld [vmem:[#allocation5 + $0xa0] ss:$16 sps:$4 sm:$0xff]   ;;  %v8136_v49 = vld [vmem:[%s10909_s0 + $0x18] sm:$0xff]   ;;  %v9258_v57 = vsub.s32 0, %v9087_v4  ;;  %v9261_v58 = vsub.s32 2, %v9087_v4 }
  0x45   :  { %v171_v11 = vrot.slane %v120_v10, %v170_v7  ;;  %v178_v15 = vrot.slane %v164_v13, %v170_v7  ;;  %v9135_v34 = vld [vmem:[#allocation5 + $0x84] ss:$16 sps:$4 sm:$0xff]   ;;  %v9138_v35 = vld [vmem:[#allocation5 + $0xa8] ss:$16 sps:$4 sm:$0xff]   ;;  %v9142_v36 = vld [vmem:[#allocation5 + $0x8c] ss:$16 sps:$4 sm:$0xff]  }
  0x46   :  { %v9145_v37 = vld [vmem:[#allocation5 + $0x80] ss:$16 sps:$4 sm:$0xff]   ;;  %v9150_v38 = vld [vmem:[#allocation5 + $0x64] ss:$16 sps:$4 sm:$0xff]   ;;  %v9153_v39 = vld [vmem:[#allocation5 + $0x88] ss:$16 sps:$4 sm:$0xff]  }
  0x47   :  { %v179_v14 = vcombine.high %v171_v11, %v171_v11  ;;  %v199_v16 = vand.u32 %v197_v12, %v171_v11  ;;  %v180_v18 = vcombine.high %v178_v15, %v178_v15  ;;  %v205_v20 = vand.u32 %v197_v12, %v178_v15  ;;  %v9160_v41 = vld [vmem:[#allocation5 + $0x6c] ss:$16 sps:$4 sm:$0xff]   ;;  %v9163_v42 = vld [vmem:[#allocation5 + $0x60] ss:$16 sps:$4 sm:$0xff]   ;;  %v9166_v43 = vld [vmem:[#allocation5 + $0x68] ss:$16 sps:$4 sm:$0xff]  }
  0x48   :  { %v9168_v44 = vld [vmem:[#allocation5 + $0x44] ss:$16 sps:$4 sm:$0xff]   ;;  %v9170_v45 = vld [vmem:[#allocation5 + $0x4c] ss:$16 sps:$4 sm:$0xff]   ;;  %v9173_v46 = vld [vmem:[#allocation5 + $0x40] ss:$16 sps:$4 sm:$0xff]  }
  0x49   :  { %v202_v17 = vand.u32 %v197_v12, %v179_v14  ;;  %v208_v22 = vand.u32 %v197_v12, %v180_v18  ;;  %v9177_v47 = vld [vmem:[#allocation5 + $0x24] ss:$16 sps:$4 sm:$0xff]   ;;  %v9180_v48 = vld [vmem:[#allocation5 + $0x48] ss:$16 sps:$4 sm:$0xff]   ;;  %v9188_v50 = vld [vmem:[#allocation5 + $0x2c] ss:$16 sps:$4 sm:$0xff]  }
  0x4a   :  { %v9191_v51 = vld [vmem:[#allocation5 + $0x20] ss:$16 sps:$4 sm:$0xff]   ;;  %v9195_v52 = vld [vmem:[#allocation5 + $0x4] ss:$16 sps:$4 sm:$0xff]   ;;  %v9198_v53 = vld [vmem:[#allocation5 + $0x28] ss:$16 sps:$4 sm:$0xff]  }
  0x4b   :  { %224 = vmatprep.subr.bf16.mxu0 %v202_v17  ;;  %297 = vmatprep.subr.bf16.mxu1 %v208_v22  ;;  %v9201_v54 = vld [vmem:[#allocation5 + $0xc] ss:$16 sps:$4 sm:$0xff]   ;;  %v9204_v55 = vld [vmem:[#allocation5] ss:$16 sps:$4 sm:$0xff]   ;;  %v9209_v56 = vld [vmem:[#allocation5 + $0x8] ss:$16 sps:$4 sm:$0xff]  }
  0x4c   :  { %225 = vmatpush1.bf16.msra.mxu0 %v199_v16  ;;  %298 = vmatpush1.bf16.msra.mxu1 %v205_v20  ;;  %10932 = vst [vmem:[#allocation16_spill] sm:$0xff] %v9258_v57  ;;  %10933 = vst [vmem:[#allocation17_spill] sm:$0xff] %v9261_v58  ;;  %v121_v59 = vld [vmem:[%s10912_s3] sm:$0xf]  ;;  %v9275_v3 = vsub.s32 1, %v9087_v4  ;;  %v9282_v9 = vsub.s32 3, %v9087_v4 }
  0x4d   :  { %584 = vmatprep.subr.bf16.mxu0 %v9095_v19  ;;  %625 = vmatprep.subr.bf16.mxu1 %v9100_v23  ;;  %v126_v63 = vrot.slane %v121_v59, %v9258_v57  ;;  %v9270_v0 = vrot.slane %v121_v59, %v9261_v58  ;;  %vm7345_vm4 = vcmask 7168  }
  0x4e   :  { %10934 = vst [vmem:[#allocation18_spill] sm:$0xff] %v9275_v3  ;;  %10935 = vst [vmem:[#allocation19_spill] sm:$0xff] %v9282_v9  ;;  %v9290_v13 = vrot.slane %v121_v59, %v9275_v3  ;;  %v9295_v17 = vrot.slane %v121_v59, %v9282_v9 }
  0x4f   :  { %7358 = vmatmul.mubr.msk.bf16.vlgmr.msra.gmra.mxu0 %vm181_vm2, %v8097_v21  ;;  %7362 = vmatmul.mubr.msk.bf16.vlgmr.msra.gmra.mxu1 %vm181_vm2, %v8097_v21 }
  0x50   :  { %585 = vmatpush1.bf16.msra.mxu0 %v9102_v24  ;;  %252 = vmatprep.mubr.bf16.mxu0 %v10922_v5 }
  0x51   :  { %586 = vmatprep.subr.bf16.mxu0 %v9105_v25  ;;  %626 = vmatpush1.bf16.msra.mxu1 %v9107_v26 }
  0x52   :  { %325 = vmatprep.mubr.bf16.mxu1 %v10922_v5  ;;  %627 = vmatprep.subr.bf16.mxu1 %v9111_v27 }
  0x54   :  { %587 = vmatpush1.bf16.msra.mxu0 %v9114_v28 }
  0x55   :  { %588 = vmatprep.subr.bf16.mxu0 %v9121_v30  ;;  %628 = vmatpush1.bf16.msra.mxu1 %v9116_v29 }
  0x56   :  { %629 = vmatprep.subr.bf16.mxu1 %v9129_v32 }
  0x57   :  { %7359 = vmatmul.mubr.msk.bf16.gmra.mxu0 %vm181_vm2, %v8110_v31  ;;  %7363 = vmatmul.mubr.msk.bf16.gmra.mxu1 %vm181_vm2, %v8110_v31 }
  0x58   :  { %589 = vmatpush1.bf16.msra.mxu0 %v9132_v33  ;;  %262 = vmatprep.mubr.bf16.mxu0 %v10922_v5 }
  0x59   :  { %590 = vmatprep.subr.bf16.mxu0 %v9135_v34  ;;  %630 = vmatpush1.bf16.msra.mxu1 %v9138_v35 }
  0x5a   :  { %335 = vmatprep.mubr.bf16.mxu1 %v10922_v5  ;;  %631 = vmatprep.subr.bf16.mxu1 %v9142_v36 }
  0x5c   :  { %591 = vmatpush1.bf16.msra.mxu0 %v9145_v37 }
  0x5d   :  { %592 = vmatprep.subr.bf16.mxu0 %v9150_v38  ;;  %632 = vmatpush1.bf16.msra.mxu1 %v9153_v39 }
  0x5e   :  { %633 = vmatprep.subr.bf16.mxu1 %v9160_v41 }
  0x5f   :  { %7360 = vmatmul.mubr.msk.bf16.gmra.mxu0 %vm181_vm2, %v8123_v40  ;;  %7364 = vmatmul.mubr.msk.bf16.gmra.mxu1 %vm181_vm2, %v8123_v40 }
  0x60   :  { %593 = vmatpush1.bf16.msra.mxu0 %v9163_v42  ;;  %272 = vmatprep.mubr.bf16.mxu0 %v10922_v5 }
  0x61   :  { %594 = vmatprep.subr.bf16.mxu0 %v9168_v44  ;;  %634 = vmatpush1.bf16.msra.mxu1 %v9166_v43 }
  0x62   :  { %345 = vmatprep.mubr.bf16.mxu1 %v10922_v5  ;;  %635 = vmatprep.subr.bf16.mxu1 %v9170_v45 }
  0x64   :  { %595 = vmatpush1.bf16.msra.mxu0 %v9173_v46 }
  0x65   :  { %596 = vmatprep.subr.bf16.mxu0 %v9177_v47  ;;  %636 = vmatpush1.bf16.msra.mxu1 %v9180_v48 }
  0x66   :  { %637 = vmatprep.subr.bf16.mxu1 %v9188_v50 }
  0x67   :  { %7361 = vmatmul.mubr.msk.bf16.gmra.mxu0 %vm181_vm2, %v8136_v49  ;;  %7365 = vmatmul.mubr.msk.bf16.gmra.mxu1 %vm181_vm2, %v8136_v49 }
  0x68   :  { %597 = vmatpush1.bf16.msra.mxu0 %v9191_v51  ;;  %616 = vmatprep.mubr.bf16.mxu0 %v10922_v5 }
  0x69   :  { %598 = vmatprep.subr.bf16.mxu0 %v9195_v52  ;;  %638 = vmatpush1.bf16.msra.mxu1 %v9198_v53 }
  0x6a   :  { %657 = vmatprep.mubr.bf16.mxu1 %v10922_v5  ;;  %639 = vmatprep.subr.bf16.mxu1 %v9201_v54 }
  0x6c   :  { %599 = vmatpush1.bf16.msra.mxu0 %v9204_v55 }
  0x6d   :  { %892 = vmatprep.subr.bf16.mxu0 %v9095_v19  ;;  %640 = vmatpush1.bf16.msra.mxu1 %v9209_v56 }
  0x6e   :  { %933 = vmatprep.subr.bf16.mxu1 %v9100_v23 }
  0x6f   :  { %617 = vmatmul.mubr.bf16.vlgmr.msra.gmra.mxu0 %v10922_v5 }
  0x70   :  { %893 = vmatpush1.bf16.msra.mxu0 %v9102_v24  ;;  %924 = vmatprep.mubr.bf16.mxu0 %v10922_v5 }
  0x71   :  { %658 = vmatmul.mubr.bf16.vlgmr.msra.gmra.mxu1 %v10922_v5  ;;  %894 = vmatprep.subr.bf16.mxu0 %v9105_v25 }
  0x72   :  { %934 = vmatpush1.bf16.msra.mxu1 %v9107_v26  ;;  %965 = vmatprep.mubr.bf16.mxu1 %v10922_v5 }
  0x73   :  { %935 = vmatprep.subr.bf16.mxu1 %v9111_v27 }
  0x74   :  { %895 = vmatpush1.bf16.msra.mxu0 %v9114_v28 }
  0x75   :  { %896 = vmatprep.subr.bf16.mxu0 %v9121_v30 }
  0x76   :  { %936 = vmatpush1.bf16.msra.mxu1 %v9116_v29 }
  0x77   :  { %937 = vmatprep.subr.bf16.mxu1 %v9129_v32 }
  0x78   :  { %897 = vmatpush1.bf16.msra.mxu0 %v9132_v33 }
  0x79   :  { %898 = vmatprep.subr.bf16.mxu0 %v9135_v34 }
  0x7a   :  { %938 = vmatpush1.bf16.msra.mxu1 %v9138_v35 }
  0x7b   :  { %939 = vmatprep.subr.bf16.mxu1 %v9142_v36 }
  0x7c   :  { %899 = vmatpush1.bf16.msra.mxu0 %v9145_v37 }
  0x7d   :  { %900 = vmatprep.subr.bf16.mxu0 %v9150_v38 }
  0x7e   :  { %940 = vmatpush1.bf16.msra.mxu1 %v9153_v39 }
  0x7f   :  { %941 = vmatprep.subr.bf16.mxu1 %v9160_v41 }
  0x80   :  { %901 = vmatpush1.bf16.msra.mxu0 %v9163_v42 }
  0x81   :  { %902 = vmatprep.subr.bf16.mxu0 %v9168_v44 }
  0x82   :  { %942 = vmatpush1.bf16.msra.mxu1 %v9166_v43 }
  0x83   :  { %943 = vmatprep.subr.bf16.mxu1 %v9170_v45 }
  0x84   :  { %903 = vmatpush1.bf16.msra.mxu0 %v9173_v46 }
  0x85   :  { %904 = vmatprep.subr.bf16.mxu0 %v9177_v47 }
  0x86   :  { %944 = vmatpush1.bf16.msra.mxu1 %v9180_v48 }
  0x87   :  { %945 = vmatprep.subr.bf16.mxu1 %v9188_v50 }
  0x88   :  { %905 = vmatpush1.bf16.msra.mxu0 %v9191_v51 }
  0x89   :  { %906 = vmatprep.subr.bf16.mxu0 %v9195_v52 }
  0x8a   :  { %946 = vmatpush1.bf16.msra.mxu1 %v9198_v53 }
  0x8b   :  { %947 = vmatprep.subr.bf16.mxu1 %v9201_v54 }
  0x8c   :  { %907 = vmatpush1.bf16.msra.mxu0 %v9204_v55 }
  0x8d   :  { %1200 = vmatprep.subr.bf16.mxu0 %v9095_v19 }
  0x8e   :  { %948 = vmatpush1.bf16.msra.mxu1 %v9209_v56 }
  0x8f   :  { %1241 = vmatprep.subr.bf16.mxu1 %v9100_v23 }
 0x10f   :  { %v244_v60 = vpop.f32.mrf.mxu0  ;;  %v9266_v62 = vpop.f32.mrf.mxu1 }
 0x111   :  { %v246_v61 = vpop.f32.mrf.mxu0  ;;  %v9272_v2 = vpop.f32.mrf.mxu1 }
 0x113   :  { %v248_v1 = vpop.f32.mrf.mxu0  ;;  %v321_v8 = vpop.f32.mrf.mxu1 }
 0x114   :  { %v9277_v6 = vadd.f32 %v248_v1, %v126_v63  ;;  %v9285_v10 = vadd.f32 %v321_v8, %v9270_v0 }
 0x115   :  { %v9279_v7 = vpop.f32.mrf.mxu0  ;;  %v9287_v12 = vpop.f32.mrf.mxu1 }
 0x117   :  { %v254_v11 = vpop.f32.mrf.mxu0  ;;  %v327_v16 = vpop.f32.mrf.mxu1 }
 0x118   :  { %v9292_v14 = vadd.f32 %v254_v11, %v126_v63  ;;  %v9301_v4 = vadd.f32 %v327_v16, %v9270_v0 }
 0x119   :  { %v256_v15 = vpop.f32.mrf.mxu0  ;;  %v329_v21 = vpop.f32.mrf.mxu1 }
 0x11a   :  { %v9298_v18 = vadd.f32 %v256_v15, %v9290_v13  ;;  %v9306_v31 = vadd.f32 %v329_v21, %v9295_v17 }
 0x11b   :  { %v258_v20 = vpop.f32.mrf.mxu0  ;;  %v331_v49 = vpop.f32.mrf.mxu1 }
 0x11c   :  { %v9303_v22 = vadd.f32 %v258_v20, %v126_v63  ;;  %v9311_v1 = vadd.f32 %v331_v49, %v9270_v0 }
 0x11d   :  { %v9308_v40 = vpop.f32.mrf.mxu0  ;;  %v9313_v8 = vpop.f32.mrf.mxu1 }
 0x11e   :  { %10936 = vst [vmem:[#allocation20_spill] sm:$0xff] %v9303_v22  ;;  %10937 = vst [vmem:[#allocation21_spill] sm:$0xff] %v9308_v40 }
 0x11f   :  { %10938 = vst [vmem:[#allocation22_spill] sm:$0xff] %v9311_v1  ;;  %v264_v59 = vpop.f32.mrf.mxu0  ;;  %10939 = vst [vmem:[#allocation23_spill] sm:$0xff] %v9313_v8  ;;  %v337_v16 = vpop.f32.mrf.mxu1 }
 0x120   :  { %v9315_v11 = vadd.f32 %v264_v59, %v126_v63  ;;  %v9321_v20 = vadd.f32 %v337_v16, %v9270_v0 }
 0x121   :  { %v266_v15 = vpop.f32.mrf.mxu0  ;;  %v339_v9 = vpop.f32.mrf.mxu1 }
 0x122   :  { %10940 = vst [vmem:[#allocation24_spill] sm:$0xff] %v9315_v11  ;;  %v9318_v5 = vadd.f32 %v266_v15, %v9290_v13  ;;  %10942 = vst [vmem:[#allocation26_spill] sm:$0xff] %v9321_v20  ;;  %v9326_v49 = vadd.f32 %v339_v9, %v9295_v17 }
 0x123   :  { %v268_v21 = vpop.f32.mrf.mxu0  ;;  %v341_v57 = vpop.f32.mrf.mxu1 }
 0x124   :  { %10941 = vst [vmem:[#allocation25_spill] sm:$0xff] %v9318_v5  ;;  %v9323_v58 = vadd.f32 %v268_v21, %v126_v63  ;;  %10944 = vst [vmem:[#allocation28_spill] sm:$0xff] %v9326_v49  ;;  %v9331_v59 = vadd.f32 %v341_v57, %v9270_v0 }
 0x125   :  { %v9328_v3 = vpop.f32.mrf.mxu0  ;;  %v9333_v8 = vpop.f32.mrf.mxu1 }
 0x126   :  { %10943 = vst [vmem:[#allocation27_spill] sm:$0xff] %v9323_v58  ;;  %10945 = vst [vmem:[#allocation29_spill] sm:$0xff] %v9328_v3 }
 0x127   :  { %10946 = vst [vmem:[#allocation30_spill] sm:$0xff] %v9331_v59  ;;  %v274_v11 = vpop.f32.mrf.mxu0  ;;  %10947 = vst [vmem:[#allocation31_spill] sm:$0xff] %v9333_v8  ;;  %v347_v20 = vpop.f32.mrf.mxu1 }
 0x128   :  { %v9335_v15 = vadd.f32 %v274_v11, %v126_v63  ;;  %v9341_v21 = vadd.f32 %v347_v20, %v9270_v0  ;;  %v245_v11 = vadd.f32 %v244_v60, %v126_v63  ;;  %v247_v20 = vadd.f32 %v246_v61, %v9290_v13 }
 0x129   :  { %v276_v16 = vpop.f32.mrf.mxu0  ;;  %v349_v58 = vpop.f32.mrf.mxu1  ;;  %v320_v61 = vadd.f32 %v9272_v2, %v9295_v17 }
 0x12a   :  { %10948 = vst [vmem:[#allocation32_spill] sm:$0xff] %v9335_v15  ;;  %v9338_v5 = vadd.f32 %v276_v16, %v9290_v13  ;;  %10950 = vst [vmem:[#allocation34_spill] sm:$0xff] %v9341_v21  ;;  %v9346_v57 = vadd.f32 %v349_v58, %v9295_v17 }
 0x12b   :  { %v278_v9 = vpop.f32.mrf.mxu0  ;;  %v351_v8 = vpop.f32.mrf.mxu1 }
 0x12c   :  { %10949 = vst [vmem:[#allocation33_spill] sm:$0xff] %v9338_v5  ;;  %v9343_v3 = vadd.f32 %v278_v9, %v126_v63  ;;  %10952 = vst [vmem:[#allocation36_spill] sm:$0xff] %v9346_v57  ;;  %v9351_v15 = vadd.f32 %v351_v8, %v9270_v0  ;;  %v318_v63 = vadd.f32 %v9266_v62, %v9270_v0 }
 0x12d   :  { %v9348_v59 = vpop.f32.mrf.mxu0  ;;  %v9353_v49 = vpop.f32.mrf.mxu1 }
 0x12e   :  { %10951 = vst [vmem:[#allocation35_spill] sm:$0xff] %v9343_v3  ;;  %10953 = vst [vmem:[#allocation37_spill] sm:$0xff] %v9348_v59 }
 0x12f   :  { %10954 = vst [vmem:[#allocation38_spill] sm:$0xff] %v9353_v49  ;;  %v618_v16 = vpop.f32.mrf.mxu0 }
 0x130   :  { %v666_v21 = vadd.f32 %v618_v16, %v245_v11 }
 0x131   :  { %v620_v5 = vpop.f32.mrf.mxu0  ;;  %v659_v1 = vpop.f32.mrf.mxu1 }
 0x132   :  { %v7398_v9 = vmul.f32 -1.442695, %v666_v21  ;;  %v667_v3 = vadd.f32 %v620_v5, %v247_v20  ;;  %v668_v8 = vadd.f32 %v659_v1, %v318_v63 }
 0x133   :  { %v622_v22 = vpop.f32.mrf.mxu0  ;;  %v661_v58 = vpop.f32.mrf.mxu1 }
 0x134   :  { %8445 = vpow2.f32 %v7398_v9  ;;  %v7399_v57 = vmul.f32 -1.442695, %v667_v3  ;;  %v7400_v11 = vmul.f32 -1.442695, %v668_v8  ;;  %v669_v49 = vadd.f32 %v661_v58, %v320_v61 }
 0x135   :  { %v623_v59 = vpop.f32.mrf.mxu0  ;;  %v663_v40 = vpop.f32.mrf.mxu1 }
 0x136   :  { %8447 = vpow2.f32 %v7399_v57 }
 0x137   :  { %v664_v60 = vpop.f32.mrf.mxu1  ;;  %8449 = vpow2.f32 %v7400_v11 }
 0x138   :  { %v10955_v60 = vmov 0  }
 0x141   :  { %v8446_v16 = vpop.eup %8445 }
 0x142   :  { %v679_v21 = vadd.f32 1.0, %v8446_v16 }
 0x143   :  { %v8448_v5 = vpop.eup %8447 }
 0x144   :  { %8451 = vrcp.f32 %v679_v21  ;;  %v680_v22 = vadd.f32 1.0, %v8448_v5  ;;  %v8450_v3 = vpop.eup %8449 }
 0x145   :  { %8453 = vtanh.f32 %v669_v49  ;;  %v681_v20 = vadd.f32 1.0, %v8450_v3 }
 0x146   :  { %8455 = vrcp.f32 %v680_v22 }
 0x147   :  { %8457 = vrcp.f32 %v681_v20 }
 0x151   :  { %v8452_v40 = vpop.eup %8451 }
 0x152   :  { %v8454_v59 = vpop.eup %8453 }
 0x153   :  { %v8456_v57 = vpop.eup %8455  ;;  %v690_v0 = vmul.f32 %v8454_v59, %v8452_v40 }
 0x154   :  { %v689_v62 = vmul.f32 0.0, %v8456_v57  ;;  %v8458_v2 = vpop.eup %8457 }
 0x156   :  { %v9360_v1 = vadd.f32 %v690_v0, %v689_v62 }
 0x158   :  { %8459 = vtanh.f32 %v9360_v1 }
 0x165   :  { %v8460_v9 = vpop.eup %8459 }
 0x166   :  { %v9363_v58 = vmul.f32 %v8460_v9, %v8458_v2 }
 0x168   :  { %v699_v49 = vpack.c.bf16 %v9363_v58, %v9363_v58 }
 0x16a   :  { %925 = vmatmul.mubr.bf16.vlgmr.msra.gmra.mxu0 %v699_v49  ;;  %966 = vmatmul.mubr.bf16.vlgmr.msra.gmra.mxu1 %v699_v49  ;;  %v8829_v49 = vld [vmem:[#allocation5 + $0xe0] ss:$16 sps:$4 sm:$0xff]  }
 0x16b   :  { %1201 = vmatpush1.bf16.msra.mxu0 %v9102_v24  ;;  %1242 = vmatpush1.bf16.msra.mxu1 %v9107_v26  ;;  %v251_v26 = vadd.f32 %v9279_v7, %v9290_v13 }
 0x16c   :  { %1202 = vmatprep.subr.bf16.mxu0 %v9105_v25  ;;  %1243 = vmatprep.subr.bf16.mxu1 %v9111_v27 }
 0x16d   :  { %1232 = vmatprep.mubr.bf16.mxu0 %v10955_v60  ;;  %1273 = vmatprep.mubr.bf16.mxu1 %v10955_v60 }
 0x16f   :  { %1203 = vmatpush1.bf16.msra.mxu0 %v9114_v28  ;;  %1244 = vmatpush1.bf16.msra.mxu1 %v9116_v29 }
 0x170   :  { %1204 = vmatprep.subr.bf16.mxu0 %v9121_v30  ;;  %1245 = vmatprep.subr.bf16.mxu1 %v9129_v32 }
 0x173   :  { %1205 = vmatpush1.bf16.msra.mxu0 %v9132_v33  ;;  %1246 = vmatpush1.bf16.msra.mxu1 %v9138_v35 }
 0x174   :  { %1206 = vmatprep.subr.bf16.mxu0 %v9135_v34  ;;  %1247 = vmatprep.subr.bf16.mxu1 %v9142_v36 }
 0x177   :  { %1207 = vmatpush1.bf16.msra.mxu0 %v9145_v37  ;;  %1248 = vmatpush1.bf16.msra.mxu1 %v9153_v39 }
 0x178   :  { %1208 = vmatprep.subr.bf16.mxu0 %v9150_v38  ;;  %1249 = vmatprep.subr.bf16.mxu1 %v9160_v41 }
 0x17b   :  { %1209 = vmatpush1.bf16.msra.mxu0 %v9163_v42  ;;  %1250 = vmatpush1.bf16.msra.mxu1 %v9166_v43 }
 0x17c   :  { %1210 = vmatprep.subr.bf16.mxu0 %v9168_v44  ;;  %1251 = vmatprep.subr.bf16.mxu1 %v9170_v45 }
 0x17f   :  { %1211 = vmatpush1.bf16.msra.mxu0 %v9173_v46  ;;  %1252 = vmatpush1.bf16.msra.mxu1 %v9180_v48 }
 0x180   :  { %1212 = vmatprep.subr.bf16.mxu0 %v9177_v47  ;;  %1253 = vmatprep.subr.bf16.mxu1 %v9188_v50 }
 0x183   :  { %1213 = vmatpush1.bf16.msra.mxu0 %v9191_v51  ;;  %1254 = vmatpush1.bf16.msra.mxu1 %v9198_v53 }
 0x184   :  { %1214 = vmatprep.subr.bf16.mxu0 %v9195_v52  ;;  %1255 = vmatprep.subr.bf16.mxu1 %v9201_v54 }
 0x187   :  { %1215 = vmatpush1.bf16.msra.mxu0 %v9204_v55  ;;  %1256 = vmatpush1.bf16.msra.mxu1 %v9209_v56 }
 0x188   :  { %1508 = vmatprep.subr.bf16.mxu0 %v9095_v19  ;;  %1549 = vmatprep.subr.bf16.mxu1 %v9100_v23  ;;  %v324_v23 = vadd.f32 %v9287_v12, %v9295_v17 }
 0x22a   :  { %v926_v24 = vpop.f32.mrf.mxu0  ;;  %v967_v25 = vpop.f32.mrf.mxu1 }
 0x22b   :  { %v974_v27 = vadd.f32 %v926_v24, %v9277_v6  ;;  %v976_v19 = vadd.f32 %v967_v25, %v9285_v10  ;;  %v8830_v24 = vld [vmem:[#allocation5 + $0xe8] ss:$16 sps:$4 sm:$0xff]   ;;  %v8831_v25 = vld [vmem:[#allocation5 + $0xc4] ss:$16 sps:$4 sm:$0xff]  }
 0x22c   :  { %v928_v28 = vpop.f32.mrf.mxu0  ;;  %v969_v29 = vpop.f32.mrf.mxu1 }
 0x22d   :  { %v7433_v30 = vmul.f32 -1.442695, %v974_v27  ;;  %v975_v32 = vadd.f32 %v928_v28, %v251_v26  ;;  %v7435_v11 = vmul.f32 -1.442695, %v976_v19  ;;  %v977_v7 = vadd.f32 %v969_v29, %v324_v23  ;;  %v8833_v26 = vld [vmem:[#allocation5 + $0xc0] ss:$16 sps:$4 sm:$0xff]  }
 0x22e   :  { %v930_v33 = vpop.f32.mrf.mxu0  ;;  %v971_v34 = vpop.f32.mrf.mxu1  ;;  %v8834_v27 = vld [vmem:[#allocation5 + $0xc8] ss:$16 sps:$4 sm:$0xff]   ;;  %v8835_v28 = vld [vmem:[#allocation5 + $0xa4] ss:$16 sps:$4 sm:$0xff]   ;;  %v8836_v29 = vld [vmem:[#allocation5 + $0xac] ss:$16 sps:$4 sm:$0xff]  }
 0x22f   :  { %8461 = vpow2.f32 %v7433_v30  ;;  %v7434_v63 = vmul.f32 -1.442695, %v975_v32  ;;  %v8837_v30 = vld [vmem:[#allocation5 + $0xa0] ss:$16 sps:$4 sm:$0xff]   ;;  %v8838_v32 = vld [vmem:[#allocation5 + $0x84] ss:$16 sps:$4 sm:$0xff]  }
 0x230   :  { %v931_v8 = vpop.f32.mrf.mxu0  ;;  %v972_v61 = vpop.f32.mrf.mxu1 }
 0x231   :  { %8463 = vpow2.f32 %v7434_v63 }
 0x232   :  { %8465 = vpow2.f32 %v7435_v11  ;;  %v9451_v11 = vld [vmem:[#allocation5 + $0xe4] ss:$16 sps:$4 sm:$0xff]  }
 0x233   :  { %8467 = vtanh.f32 %v977_v7  ;;  %v9453_v7 = vld [vmem:[#allocation5 + $0xec] ss:$16 sps:$4 sm:$0xff]  }
 0x23c   :  { %v8462_v16 = vpop.eup %8461 }
 0x23d   :  { %v987_v6 = vadd.f32 1.0, %v8462_v16  ;;  %v9455_v16 = vld [vmem:[#allocation5 + $0xe0] ss:$16 sps:$4 sm:$0xff]  }
 0x23e   :  { %v8464_v21 = vpop.eup %8463 }
 0x23f   :  { %8469 = vrcp.f32 %v987_v6  ;;  %v988_v5 = vadd.f32 1.0, %v8464_v21  ;;  %v8466_v22 = vpop.eup %8465  ;;  %v9457_v6 = vld [vmem:[#allocation5 + $0xe8] ss:$16 sps:$4 sm:$0xff]   ;;  %v9463_v21 = vld [vmem:[#allocation5 + $0xc4] ss:$16 sps:$4 sm:$0xff]  }
 0x240   :  { %v8468_v3 = vpop.eup %8467  ;;  %v989_v20 = vadd.f32 1.0, %v8466_v22  ;;  %v9467_v22 = vld [vmem:[#allocation5 + $0xc0] ss:$16 sps:$4 sm:$0xff]  }
 0x241   :  { %8471 = vrcp.f32 %v988_v5  ;;  %v9465_v5 = vld [vmem:[#allocation5 + $0xcc] ss:$16 sps:$4 sm:$0xff]  }
 0x242   :  { %8473 = vrcp.f32 %v989_v20  ;;  %v9481_v20 = vld [vmem:[#allocation5 + $0xa8] ss:$16 sps:$4 sm:$0xff]  }
 0x24c   :  { %v8470_v40 = vpop.eup %8469 }
 0x24d   :  { %v998_v59 = vmul.f32 %v8470_v40, %v8468_v3  ;;  %v9469_v3 = vld [vmem:[#allocation5 + $0xc8] ss:$16 sps:$4 sm:$0xff]   ;;  %v9475_v40 = vld [vmem:[#allocation5 + $0xa4] ss:$16 sps:$4 sm:$0xff]  }
 0x24e   :  { %v8472_v57 = vpop.eup %8471 }
 0x24f   :  { %v997_v10 = vmul.f32 %v8472_v57, %v9360_v1  ;;  %v8474_v12 = vpop.eup %8473  ;;  %v8832_v1 = vld [vmem:[#allocation5 + $0xcc] ss:$16 sps:$4 sm:$0xff]   ;;  %v9479_v57 = vld [vmem:[#allocation5 + $0xa0] ss:$16 sps:$4 sm:$0xff]  }
 0x251   :  { %v9408_v62 = vadd.f32 %v998_v59, %v997_v10  ;;  %v9477_v59 = vld [vmem:[#allocation5 + $0xac] ss:$16 sps:$4 sm:$0xff]   ;;  %v9487_v10 = vld [vmem:[#allocation5 + $0x84] ss:$16 sps:$4 sm:$0xff]  }
 0x253   :  { %8475 = vtanh.f32 %v9408_v62 }
 0x260   :  { %v8476_v0 = vpop.eup %8475 }
 0x261   :  { %v9411_v2 = vmul.f32 %v8476_v0, %v8474_v12  ;;  %v9491_v12 = vld [vmem:[#allocation5 + $0x80] ss:$16 sps:$4 sm:$0xff]   ;;  %v9493_v0 = vld [vmem:[#allocation5 + $0x88] ss:$16 sps:$4 sm:$0xff]  }
 0x263   :  { %v1007_v9 = vpack.c.bf16 %v9411_v2, %v9411_v2 }
 0x265   :  { %1233 = vmatmul.mubr.bf16.vlgmr.msra.gmra.mxu0 %v1007_v9  ;;  %1274 = vmatmul.mubr.bf16.vlgmr.msra.gmra.mxu1 %v1007_v9  ;;  %v9497_v9 = vld [vmem:[#allocation5 + $0x64] ss:$16 sps:$4 sm:$0xff]  }
 0x266   :  { %1509 = vmatpush1.bf16.msra.mxu0 %v8829_v49  ;;  %1550 = vmatpush1.bf16.msra.mxu1 %v8830_v24  ;;  %v9499_v49 = vld [vmem:[#allocation5 + $0x6c] ss:$16 sps:$4 sm:$0xff]   ;;  %v9503_v24 = vld [vmem:[#allocation5 + $0x60] ss:$16 sps:$4 sm:$0xff]  }
 0x267   :  { %1510 = vmatprep.subr.bf16.mxu0 %v8831_v25  ;;  %1551 = vmatprep.subr.bf16.mxu1 %v8832_v1  ;;  %v9505_v25 = vld [vmem:[#allocation5 + $0x68] ss:$16 sps:$4 sm:$0xff]   ;;  %v9509_v1 = vld [vmem:[#allocation5 + $0x44] ss:$16 sps:$4 sm:$0xff]  }
 0x268   :  { %1540 = vmatprep.mubr.bf16.mxu0 %v10955_v60  ;;  %1581 = vmatprep.mubr.bf16.mxu1 %v10955_v60 }
 0x26a   :  { %1511 = vmatpush1.bf16.msra.mxu0 %v8833_v26  ;;  %1552 = vmatpush1.bf16.msra.mxu1 %v8834_v27  ;;  %v9511_v26 = vld [vmem:[#allocation5 + $0x4c] ss:$16 sps:$4 sm:$0xff]   ;;  %v9515_v27 = vld [vmem:[#allocation5 + $0x40] ss:$16 sps:$4 sm:$0xff]  }
 0x26b   :  { %1512 = vmatprep.subr.bf16.mxu0 %v8835_v28  ;;  %1553 = vmatprep.subr.bf16.mxu1 %v8836_v29  ;;  %v9517_v28 = vld [vmem:[#allocation5 + $0x48] ss:$16 sps:$4 sm:$0xff]   ;;  %v9521_v29 = vld [vmem:[#allocation5 + $0x24] ss:$16 sps:$4 sm:$0xff]  }
 0x26e   :  { %1513 = vmatpush1.bf16.msra.mxu0 %v8837_v30  ;;  %1554 = vmatpush1.bf16.msra.mxu1 %v9138_v35  ;;  %v9523_v30 = vld [vmem:[#allocation5 + $0x2c] ss:$16 sps:$4 sm:$0xff]  }
 0x26f   :  { %1514 = vmatprep.subr.bf16.mxu0 %v8838_v32  ;;  %1555 = vmatprep.subr.bf16.mxu1 %v9142_v36  ;;  %v9527_v32 = vld [vmem:[#allocation5 + $0x20] ss:$16 sps:$4 sm:$0xff]  }
 0x272   :  { %1515 = vmatpush1.bf16.msra.mxu0 %v9145_v37  ;;  %1556 = vmatpush1.bf16.msra.mxu1 %v9153_v39 }
 0x273   :  { %1516 = vmatprep.subr.bf16.mxu0 %v9150_v38  ;;  %1557 = vmatprep.subr.bf16.mxu1 %v9160_v41 }
 0x276   :  { %1517 = vmatpush1.bf16.msra.mxu0 %v9163_v42  ;;  %1558 = vmatpush1.bf16.msra.mxu1 %v9166_v43 }
 0x277   :  { %1518 = vmatprep.subr.bf16.mxu0 %v9168_v44  ;;  %1559 = vmatprep.subr.bf16.mxu1 %v9170_v45 }
 0x27a   :  { %1519 = vmatpush1.bf16.msra.mxu0 %v9173_v46  ;;  %1560 = vmatpush1.bf16.msra.mxu1 %v9180_v48 }
 0x27b   :  { %1520 = vmatprep.subr.bf16.mxu0 %v9177_v47  ;;  %1561 = vmatprep.subr.bf16.mxu1 %v9188_v50 }
 0x27e   :  { %1521 = vmatpush1.bf16.msra.mxu0 %v9191_v51  ;;  %1562 = vmatpush1.bf16.msra.mxu1 %v9198_v53 }
 0x27f   :  { %1522 = vmatprep.subr.bf16.mxu0 %v9195_v52  ;;  %1563 = vmatprep.subr.bf16.mxu1 %v9201_v54 }
 0x282   :  { %1523 = vmatpush1.bf16.msra.mxu0 %v9204_v55  ;;  %1564 = vmatpush1.bf16.msra.mxu1 %v9209_v56 }
 0x283   :  { %1816 = vmatprep.subr.bf16.mxu0 %v9451_v11  ;;  %1857 = vmatprep.subr.bf16.mxu1 %v9453_v7 }
 0x325   :  { %v1234_v35 = vpop.f32.mrf.mxu0  ;;  %v1275_v36 = vpop.f32.mrf.mxu1 }
 0x326   :  { %v1282_v37 = vadd.f32 %v1234_v35, %v9292_v14  ;;  %v1284_v48 = vadd.f32 %v1275_v36, %v9301_v4  ;;  %v9529_v35 = vld [vmem:[#allocation5 + $0x28] ss:$16 sps:$4 sm:$0xff]   ;;  %v9533_v36 = vld [vmem:[#allocation5 + $0x4] ss:$16 sps:$4 sm:$0xff]  }
 0x327   :  { %v1236_v38 = vpop.f32.mrf.mxu0  ;;  %v1277_v39 = vpop.f32.mrf.mxu1 }
 0x328   :  { %v7468_v41 = vmul.f32 -1.442695, %v1282_v37  ;;  %v1283_v42 = vadd.f32 %v1236_v38, %v9298_v18  ;;  %v7470_v50 = vmul.f32 -1.442695, %v1284_v48  ;;  %v1285_v51 = vadd.f32 %v1277_v39, %v9306_v31  ;;  %v9535_v37 = vld [vmem:[#allocation5 + $0xc] ss:$16 sps:$4 sm:$0xff]  }
 0x329   :  { %v1238_v43 = vpop.f32.mrf.mxu0  ;;  %v1279_v44 = vpop.f32.mrf.mxu1  ;;  %v9539_v38 = vld [vmem:[#allocation5] ss:$16 sps:$4 sm:$0xff]   ;;  %v9541_v39 = vld [vmem:[#allocation5 + $0x8] ss:$16 sps:$4 sm:$0xff]  }
 0x32a   :  { %8477 = vpow2.f32 %v7468_v41  ;;  %v7469_v45 = vmul.f32 -1.442695, %v1283_v42  ;;  %v10956_v43 = vld [vmem:[#allocation21_spill] sm:$0xff] }
 0x32b   :  { %v1239_v46 = vpop.f32.mrf.mxu0  ;;  %v1280_v47 = vpop.f32.mrf.mxu1  ;;  %v261_v44 = vadd.f32 %v10956_v43, %v9290_v13 }
 0x32c   :  { %8479 = vpow2.f32 %v7469_v45  ;;  %v10957_v45 = vld [vmem:[#allocation20_spill] sm:$0xff] }
 0x32d   :  { %8481 = vpow2.f32 %v7470_v50 }
 0x32e   :  { %8483 = vtanh.f32 %v1285_v51 }
 0x337   :  { %v8478_v52 = vpop.eup %8477 }
 0x338   :  { %v1295_v53 = vadd.f32 1.0, %v8478_v52 }
 0x339   :  { %v8480_v54 = vpop.eup %8479 }
 0x33a   :  { %8485 = vrcp.f32 %v1295_v53  ;;  %v1296_v55 = vadd.f32 1.0, %v8480_v54  ;;  %v8482_v56 = vpop.eup %8481 }
 0x33b   :  { %v8484_v14 = vpop.eup %8483  ;;  %v1297_v63 = vadd.f32 1.0, %v8482_v56 }
 0x33c   :  { %8487 = vrcp.f32 %v1296_v55 }
 0x33d   :  { %8489 = vrcp.f32 %v1297_v63 }
 0x347   :  { %v8486_v18 = vpop.eup %8485 }
 0x348   :  { %v1306_v33 = vmul.f32 %v8486_v18, %v8484_v14  ;;  %v10958_v14 = vld [vmem:[#allocation22_spill] sm:$0xff] }
 0x349   :  { %v8488_v34 = vpop.eup %8487 }
 0x34a   :  { %v1305_v8 = vmul.f32 %v8488_v34, %v9408_v62  ;;  %v8490_v31 = vpop.eup %8489  ;;  %v9489_v62 = vld [vmem:[#allocation5 + $0x8c] ss:$16 sps:$4 sm:$0xff]  }
 0x34c   :  { %v9442_v4 = vadd.f32 %v1306_v33, %v1305_v8  ;;  %v10959_v33 = vld [vmem:[#allocation23_spill] sm:$0xff] }
 0x34d   :  { %v334_v34 = vadd.f32 %v10959_v33, %v9295_v17 }
 0x34e   :  { %8491 = vtanh.f32 %v9442_v4 }
 0x35b   :  { %v8492_v61 = vpop.eup %8491 }
 0x35c   :  { %v9445_v19 = vmul.f32 %v8492_v61, %v8490_v31 }
 0x35e   :  { %v1315_v23 = vpack.c.bf16 %v9445_v19, %v9445_v19 }
 0x360   :  { %1541 = vmatmul.mubr.bf16.vlgmr.msra.gmra.mxu0 %v1315_v23  ;;  %1582 = vmatmul.mubr.bf16.vlgmr.msra.gmra.mxu1 %v1315_v23 }
 0x361   :  { %1848 = vmatprep.mubr.bf16.mxu0 %v10955_v60  ;;  %1889 = vmatprep.mubr.bf16.mxu1 %v10955_v60 }
 0x362   :  { %1817 = vmatpush1.bf16.msra.mxu0 %v9455_v16  ;;  %1858 = vmatpush1.bf16.msra.mxu1 %v9457_v6 }
 0x363   :  { %1818 = vmatprep.subr.bf16.mxu0 %v9463_v21  ;;  %1859 = vmatprep.subr.bf16.mxu1 %v9465_v5 }
 0x366   :  { %1819 = vmatpush1.bf16.msra.mxu0 %v9467_v22  ;;  %1860 = vmatpush1.bf16.msra.mxu1 %v9469_v3 }
 0x367   :  { %1820 = vmatprep.subr.bf16.mxu0 %v9475_v40  ;;  %1861 = vmatprep.subr.bf16.mxu1 %v9477_v59 }
 0x36a   :  { %1821 = vmatpush1.bf16.msra.mxu0 %v9479_v57  ;;  %1862 = vmatpush1.bf16.msra.mxu1 %v9481_v20 }
 0x36b   :  { %1822 = vmatprep.subr.bf16.mxu0 %v9487_v10  ;;  %1863 = vmatprep.subr.bf16.mxu1 %v9489_v62 }
 0x36e   :  { %1823 = vmatpush1.bf16.msra.mxu0 %v9491_v12  ;;  %1864 = vmatpush1.bf16.msra.mxu1 %v9493_v0 }
 0x36f   :  { %1824 = vmatprep.subr.bf16.mxu0 %v9497_v9  ;;  %1865 = vmatprep.subr.bf16.mxu1 %v9499_v49 }
 0x372   :  { %1825 = vmatpush1.bf16.msra.mxu0 %v9503_v24  ;;  %1866 = vmatpush1.bf16.msra.mxu1 %v9505_v25 }
 0x373   :  { %1826 = vmatprep.subr.bf16.mxu0 %v9509_v1  ;;  %1867 = vmatprep.subr.bf16.mxu1 %v9511_v26 }
 0x376   :  { %1827 = vmatpush1.bf16.msra.mxu0 %v9515_v27  ;;  %1868 = vmatpush1.bf16.msra.mxu1 %v9517_v28 }
 0x377   :  { %1828 = vmatprep.subr.bf16.mxu0 %v9521_v29  ;;  %1869 = vmatprep.subr.bf16.mxu1 %v9523_v30 }
 0x37a   :  { %1829 = vmatpush1.bf16.msra.mxu0 %v9527_v32  ;;  %1870 = vmatpush1.bf16.msra.mxu1 %v9529_v35 }
 0x37b   :  { %1830 = vmatprep.subr.bf16.mxu0 %v9533_v36  ;;  %1871 = vmatprep.subr.bf16.mxu1 %v9535_v37 }
 0x37e   :  { %1831 = vmatpush1.bf16.msra.mxu0 %v9539_v38  ;;  %1872 = vmatpush1.bf16.msra.mxu1 %v9541_v39 }
 0x37f   :  { %2124 = vmatprep.subr.bf16.mxu0 %v9451_v11  ;;  %2165 = vmatprep.subr.bf16.mxu1 %v9453_v7 }
 0x420   :  { %v1542_v41 = vpop.f32.mrf.mxu0  ;;  %v1583_v42 = vpop.f32.mrf.mxu1 }
 0x421   :  { %v1590_v46 = vadd.f32 %v1542_v41, %v10957_v45  ;;  %v1592_v18 = vadd.f32 %v1583_v42, %v10958_v14 }
 0x422   :  { %v1544_v47 = vpop.f32.mrf.mxu0  ;;  %v1585_v48 = vpop.f32.mrf.mxu1 }
 0x423   :  { %v7503_v50 = vmul.f32 -1.442695, %v1590_v46  ;;  %v1591_v51 = vadd.f32 %v1544_v47, %v261_v44  ;;  %v7505_v63 = vmul.f32 -1.442695, %v1592_v18  ;;  %v1593_v8 = vadd.f32 %v1585_v48, %v334_v34 }
 0x424   :  { %v1546_v52 = vpop.f32.mrf.mxu0  ;;  %v1587_v53 = vpop.f32.mrf.mxu1 }
 0x425   :  { %8493 = vpow2.f32 %v7503_v50  ;;  %v7504_v54 = vmul.f32 -1.442695, %v1591_v51 }
 0x426   :  { %v1547_v55 = vpop.f32.mrf.mxu0  ;;  %v1588_v56 = vpop.f32.mrf.mxu1 }
 0x427   :  { %8495 = vpow2.f32 %v7504_v54  ;;  %v10960_v56 = vld [vmem:[#allocation24_spill] sm:$0xff] }
 0x428   :  { %8497 = vpow2.f32 %v7505_v63  ;;  %v10961_v63 = vld [vmem:[#allocation25_spill] sm:$0xff] }
 0x429   :  { %8499 = vtanh.f32 %v1593_v8 }
 0x432   :  { %v8494_v31 = vpop.eup %8493 }
 0x433   :  { %v1603_v61 = vadd.f32 1.0, %v8494_v31 }
 0x434   :  { %v8496_v23 = vpop.eup %8495 }
 0x435   :  { %8501 = vrcp.f32 %v1603_v61  ;;  %v1604_v41 = vadd.f32 1.0, %v8496_v23  ;;  %v8498_v43 = vpop.eup %8497 }
 0x436   :  { %v8500_v44 = vpop.eup %8499  ;;  %v1605_v50 = vadd.f32 1.0, %v8498_v43 }
 0x437   :  { %8503 = vrcp.f32 %v1604_v41 }
 0x438   :  { %8505 = vrcp.f32 %v1605_v50 }
 0x442   :  { %v8502_v45 = vpop.eup %8501 }
 0x443   :  { %v1614_v46 = vmul.f32 %v8502_v45, %v8500_v44  ;;  %v10962_v44 = vld [vmem:[#allocation26_spill] sm:$0xff] }
 0x444   :  { %v8504_v47 = vpop.eup %8503 }
 0x445   :  { %v1613_v42 = vmul.f32 %v8504_v47, %v9442_v4  ;;  %v8506_v48 = vpop.eup %8505  ;;  %v10963_v47 = vld [vmem:[#allocation28_spill] sm:$0xff] }
 0x447   :  { %v9556_v51 = vadd.f32 %v1614_v46, %v1613_v42 }
 0x449   :  { %8507 = vtanh.f32 %v9556_v51 }
 0x456   :  { %v8508_v52 = vpop.eup %8507 }
 0x457   :  { %v9559_v53 = vmul.f32 %v8508_v52, %v8506_v48 }
 0x459   :  { %v1623_v54 = vpack.c.bf16 %v9559_v53, %v9559_v53 }
 0x45b   :  { %1849 = vmatmul.mubr.bf16.vlgmr.msra.gmra.mxu0 %v1623_v54  ;;  %1890 = vmatmul.mubr.bf16.vlgmr.msra.gmra.mxu1 %v1623_v54 }
 0x45c   :  { %2125 = vmatpush1.bf16.msra.mxu0 %v9455_v16  ;;  %2166 = vmatpush1.bf16.msra.mxu1 %v9457_v6 }
 0x45d   :  { %2126 = vmatprep.subr.bf16.mxu0 %v9463_v21  ;;  %2167 = vmatprep.subr.bf16.mxu1 %v9465_v5 }
 0x45e   :  { %2156 = vmatprep.mubr.bf16.mxu0 %v10955_v60  ;;  %2197 = vmatprep.mubr.bf16.mxu1 %v10955_v60 }
 0x460   :  { %2127 = vmatpush1.bf16.msra.mxu0 %v9467_v22  ;;  %2168 = vmatpush1.bf16.msra.mxu1 %v9469_v3 }
 0x461   :  { %2128 = vmatprep.subr.bf16.mxu0 %v9475_v40  ;;  %2169 = vmatprep.subr.bf16.mxu1 %v9477_v59 }
 0x464   :  { %2129 = vmatpush1.bf16.msra.mxu0 %v9479_v57  ;;  %2170 = vmatpush1.bf16.msra.mxu1 %v9481_v20 }
 0x465   :  { %2130 = vmatprep.subr.bf16.mxu0 %v9487_v10  ;;  %2171 = vmatprep.subr.bf16.mxu1 %v9489_v62 }
 0x468   :  { %2131 = vmatpush1.bf16.msra.mxu0 %v9491_v12  ;;  %2172 = vmatpush1.bf16.msra.mxu1 %v9493_v0 }
 0x469   :  { %2132 = vmatprep.subr.bf16.mxu0 %v9497_v9  ;;  %2173 = vmatprep.subr.bf16.mxu1 %v9499_v49 }
 0x46c   :  { %2133 = vmatpush1.bf16.msra.mxu0 %v9503_v24  ;;  %2174 = vmatpush1.bf16.msra.mxu1 %v9505_v25 }
 0x46d   :  { %2134 = vmatprep.subr.bf16.mxu0 %v9509_v1  ;;  %2175 = vmatprep.subr.bf16.mxu1 %v9511_v26 }
 0x470   :  { %2135 = vmatpush1.bf16.msra.mxu0 %v9515_v27  ;;  %2176 = vmatpush1.bf16.msra.mxu1 %v9517_v28 }
 0x471   :  { %2136 = vmatprep.subr.bf16.mxu0 %v9521_v29  ;;  %2177 = vmatprep.subr.bf16.mxu1 %v9523_v30 }
 0x474   :  { %2137 = vmatpush1.bf16.msra.mxu0 %v9527_v32  ;;  %2178 = vmatpush1.bf16.msra.mxu1 %v9529_v35 }
 0x475   :  { %2138 = vmatprep.subr.bf16.mxu0 %v9533_v36  ;;  %2179 = vmatprep.subr.bf16.mxu1 %v9535_v37 }
 0x478   :  { %2139 = vmatpush1.bf16.msra.mxu0 %v9539_v38  ;;  %2180 = vmatpush1.bf16.msra.mxu1 %v9541_v39 }
 0x479   :  { %2432 = vmatprep.subr.bf16.mxu0 %v9451_v11  ;;  %2473 = vmatprep.subr.bf16.mxu1 %v9453_v7 }
 0x51b   :  { %v1850_v4 = vpop.f32.mrf.mxu0  ;;  %v1891_v55 = vpop.f32.mrf.mxu1 }
 0x51c   :  { %v1898_v14 = vadd.f32 %v1850_v4, %v10960_v56  ;;  %v1900_v45 = vadd.f32 %v1891_v55, %v10962_v44 }
 0x51d   :  { %v1852_v18 = vpop.f32.mrf.mxu0  ;;  %v1893_v33 = vpop.f32.mrf.mxu1 }
 0x51e   :  { %v7538_v34 = vmul.f32 -1.442695, %v1898_v14  ;;  %v1899_v8 = vadd.f32 %v1852_v18, %v10961_v63  ;;  %v7540_v46 = vmul.f32 -1.442695, %v1900_v45  ;;  %v1901_v50 = vadd.f32 %v1893_v33, %v10963_v47  ;;  %v10965_v45 = vld [vmem:[#allocation27_spill] sm:$0xff] }
 0x51f   :  { %v1854_v31 = vpop.f32.mrf.mxu0  ;;  %v1895_v61 = vpop.f32.mrf.mxu1 }
 0x520   :  { %8509 = vpow2.f32 %v7538_v34  ;;  %v7539_v23 = vmul.f32 -1.442695, %v1899_v8 }
 0x521   :  { %v1855_v41 = vpop.f32.mrf.mxu0  ;;  %v1896_v43 = vpop.f32.mrf.mxu1 }
 0x522   :  { %8511 = vpow2.f32 %v7539_v23  ;;  %v10964_v43 = vld [vmem:[#allocation29_spill] sm:$0xff] }
 0x523   :  { %8513 = vpow2.f32 %v7540_v46  ;;  %v271_v44 = vadd.f32 %v10964_v43, %v9290_v13 }
 0x524   :  { %8515 = vtanh.f32 %v1901_v50 }
 0x52d   :  { %v8510_v42 = vpop.eup %8509 }
 0x52e   :  { %v1911_v48 = vadd.f32 1.0, %v8510_v42 }
 0x52f   :  { %v8512_v52 = vpop.eup %8511 }
 0x530   :  { %8517 = vrcp.f32 %v1911_v48  ;;  %v1912_v54 = vadd.f32 1.0, %v8512_v52  ;;  %v8514_v4 = vpop.eup %8513 }
 0x531   :  { %v8516_v56 = vpop.eup %8515  ;;  %v1913_v63 = vadd.f32 1.0, %v8514_v4 }
 0x532   :  { %8519 = vrcp.f32 %v1912_v54 }
 0x533   :  { %8521 = vrcp.f32 %v1913_v63 }
 0x53d   :  { %v8518_v14 = vpop.eup %8517 }
 0x53e   :  { %v1922_v18 = vmul.f32 %v8518_v14, %v8516_v56 }
 0x53f   :  { %v8520_v34 = vpop.eup %8519 }
 0x540   :  { %v1921_v8 = vmul.f32 %v8520_v34, %v9556_v51  ;;  %v8522_v33 = vpop.eup %8521 }
 0x542   :  { %v9602_v55 = vadd.f32 %v1922_v18, %v1921_v8  ;;  %v10967_v18 = vld [vmem:[#allocation31_spill] sm:$0xff] }
 0x543   :  { %v344_v34 = vadd.f32 %v10967_v18, %v9295_v17 }
 0x544   :  { %8523 = vtanh.f32 %v9602_v55 }
 0x551   :  { %v8524_v31 = vpop.eup %8523 }
 0x552   :  { %v9605_v61 = vmul.f32 %v8524_v31, %v8522_v33 }
 0x554   :  { %v1931_v23 = vpack.c.bf16 %v9605_v61, %v9605_v61 }
 0x556   :  { %2157 = vmatmul.mubr.bf16.vlgmr.msra.gmra.mxu0 %v1931_v23  ;;  %2198 = vmatmul.mubr.bf16.vlgmr.msra.gmra.mxu1 %v1931_v23 }
 0x557   :  { %2433 = vmatpush1.bf16.msra.mxu0 %v9455_v16  ;;  %2474 = vmatpush1.bf16.msra.mxu1 %v9457_v6 }
 0x558   :  { %2434 = vmatprep.subr.bf16.mxu0 %v9463_v21  ;;  %2475 = vmatprep.subr.bf16.mxu1 %v9465_v5 }
 0x559   :  { %2464 = vmatprep.mubr.bf16.mxu0 %v10955_v60  ;;  %2505 = vmatprep.mubr.bf16.mxu1 %v10955_v60 }
 0x55b   :  { %2435 = vmatpush1.bf16.msra.mxu0 %v9467_v22  ;;  %2476 = vmatpush1.bf16.msra.mxu1 %v9469_v3 }
 0x55c   :  { %2436 = vmatprep.subr.bf16.mxu0 %v9475_v40  ;;  %2477 = vmatprep.subr.bf16.mxu1 %v9477_v59 }
 0x55f   :  { %2437 = vmatpush1.bf16.msra.mxu0 %v9479_v57  ;;  %2478 = vmatpush1.bf16.msra.mxu1 %v9481_v20 }
 0x560   :  { %2438 = vmatprep.subr.bf16.mxu0 %v9487_v10  ;;  %2479 = vmatprep.subr.bf16.mxu1 %v9489_v62 }
 0x563   :  { %2439 = vmatpush1.bf16.msra.mxu0 %v9491_v12  ;;  %2480 = vmatpush1.bf16.msra.mxu1 %v9493_v0 }
 0x564   :  { %2440 = vmatprep.subr.bf16.mxu0 %v9497_v9  ;;  %2481 = vmatprep.subr.bf16.mxu1 %v9499_v49 }
 0x567   :  { %2441 = vmatpush1.bf16.msra.mxu0 %v9503_v24  ;;  %2482 = vmatpush1.bf16.msra.mxu1 %v9505_v25 }
 0x568   :  { %2442 = vmatprep.subr.bf16.mxu0 %v9509_v1  ;;  %2483 = vmatprep.subr.bf16.mxu1 %v9511_v26 }
 0x56b   :  { %2443 = vmatpush1.bf16.msra.mxu0 %v9515_v27  ;;  %2484 = vmatpush1.bf16.msra.mxu1 %v9517_v28 }
 0x56c   :  { %2444 = vmatprep.subr.bf16.mxu0 %v9521_v29  ;;  %2485 = vmatprep.subr.bf16.mxu1 %v9523_v30 }
 0x56f   :  { %2445 = vmatpush1.bf16.msra.mxu0 %v9527_v32  ;;  %2486 = vmatpush1.bf16.msra.mxu1 %v9529_v35 }
 0x570   :  { %2446 = vmatprep.subr.bf16.mxu0 %v9533_v36  ;;  %2487 = vmatprep.subr.bf16.mxu1 %v9535_v37 }
 0x573   :  { %2447 = vmatpush1.bf16.msra.mxu0 %v9539_v38  ;;  %2488 = vmatpush1.bf16.msra.mxu1 %v9541_v39 }
 0x574   :  { %2740 = vmatprep.subr.bf16.mxu0 %v9451_v11  ;;  %2781 = vmatprep.subr.bf16.mxu1 %v9453_v7  ;;  %v10966_v11 = vld [vmem:[#allocation30_spill] sm:$0xff] }
 0x616   :  { %v2158_v51 = vpop.f32.mrf.mxu0  ;;  %v2199_v41 = vpop.f32.mrf.mxu1 }
 0x617   :  { %v2206_v46 = vadd.f32 %v2158_v51, %v10965_v45  ;;  %v2208_v7 = vadd.f32 %v2199_v41, %v10966_v11 }
 0x618   :  { %v2160_v47 = vpop.f32.mrf.mxu0  ;;  %v2201_v50 = vpop.f32.mrf.mxu1 }
 0x619   :  { %v7573_v42 = vmul.f32 -1.442695, %v2206_v46  ;;  %v2207_v48 = vadd.f32 %v2160_v47, %v271_v44  ;;  %v7575_v63 = vmul.f32 -1.442695, %v2208_v7  ;;  %v2209_v8 = vadd.f32 %v2201_v50, %v344_v34  ;;  %v8197_v34 = vld [vmem:[#allocation7 + $0xe0] ss:$16 sps:$4 sm:$0xff]  }
 0x61a   :  { %v2162_v52 = vpop.f32.mrf.mxu0  ;;  %v2203_v54 = vpop.f32.mrf.mxu1 }
 0x61b   :  { %8525 = vpow2.f32 %v7573_v42  ;;  %v7574_v4 = vmul.f32 -1.442695, %v2207_v48 }
 0x61c   :  { %v2163_v56 = vpop.f32.mrf.mxu0  ;;  %v2204_v14 = vpop.f32.mrf.mxu1 }
 0x61d   :  { %8527 = vpow2.f32 %v7574_v4 }
 0x61e   :  { %8529 = vpow2.f32 %v7575_v63  ;;  %v8200_v63 = vld [vmem:[#allocation7 + $0xe8] ss:$16 sps:$4 sm:$0xff]  }
 0x61f   :  { %8531 = vtanh.f32 %v2209_v8 }
 0x628   :  { %v8526_v33 = vpop.eup %8525 }
 0x629   :  { %v2219_v31 = vadd.f32 1.0, %v8526_v33  ;;  %v8205_v33 = vld [vmem:[#allocation7 + $0xc4] ss:$16 sps:$4 sm:$0xff]  }
 0x62a   :  { %v8528_v23 = vpop.eup %8527 }
 0x62b   :  { %8533 = vrcp.f32 %v2219_v31  ;;  %v2220_v51 = vadd.f32 1.0, %v8528_v23  ;;  %v8530_v43 = vpop.eup %8529  ;;  %v8208_v31 = vld [vmem:[#allocation7 + $0xcc] ss:$16 sps:$4 sm:$0xff]   ;;  %v8203_v23 = vld [vmem:[#allocation7 + $0xc0] ss:$16 sps:$4 sm:$0xff]  }
 0x62c   :  { %v8532_v44 = vpop.eup %8531  ;;  %v2221_v42 = vadd.f32 1.0, %v8530_v43  ;;  %v8211_v43 = vld [vmem:[#allocation7 + $0xa4] ss:$16 sps:$4 sm:$0xff]  }
 0x62d   :  { %8535 = vrcp.f32 %v2220_v51  ;;  %v8206_v51 = vld [vmem:[#allocation7 + $0xc8] ss:$16 sps:$4 sm:$0xff]  }
 0x62e   :  { %8537 = vrcp.f32 %v2221_v42  ;;  %v8220_v42 = vld [vmem:[#allocation7 + $0x8c] ss:$16 sps:$4 sm:$0xff]  }
 0x638   :  { %v8534_v45 = vpop.eup %8533 }
 0x639   :  { %v2230_v46 = vmul.f32 %v8534_v45, %v8532_v44  ;;  %v8214_v44 = vld [vmem:[#allocation7 + $0xac] ss:$16 sps:$4 sm:$0xff]   ;;  %v8209_v45 = vld [vmem:[#allocation7 + $0xa0] ss:$16 sps:$4 sm:$0xff]  }
 0x63a   :  { %v8536_v47 = vpop.eup %8535 }
 0x63b   :  { %v2229_v41 = vmul.f32 %v8536_v47, %v9602_v55  ;;  %v8538_v50 = vpop.eup %8537  ;;  %v8217_v47 = vld [vmem:[#allocation7 + $0x84] ss:$16 sps:$4 sm:$0xff]  }
 0x63d   :  { %v9650_v48 = vadd.f32 %v2230_v46, %v2229_v41  ;;  %v8212_v46 = vld [vmem:[#allocation7 + $0xa8] ss:$16 sps:$4 sm:$0xff]   ;;  %v8215_v41 = vld [vmem:[#allocation7 + $0x80] ss:$16 sps:$4 sm:$0xff]  }
 0x63f   :  { %8539 = vtanh.f32 %v9650_v48 }
 0x64c   :  { %v8540_v52 = vpop.eup %8539 }
 0x64d   :  { %v9653_v54 = vmul.f32 %v8540_v52, %v8538_v50  ;;  %v8223_v50 = vld [vmem:[#allocation7 + $0x64] ss:$16 sps:$4 sm:$0xff]   ;;  %v8226_v52 = vld [vmem:[#allocation7 + $0x6c] ss:$16 sps:$4 sm:$0xff]  }
 0x64f   :  { %v2239_v4 = vpack.c.bf16 %v9653_v54, %v9653_v54 }
 0x651   :  { %2465 = vmatmul.mubr.bf16.vlgmr.msra.gmra.mxu0 %v2239_v4  ;;  %2506 = vmatmul.mubr.bf16.vlgmr.msra.gmra.mxu1 %v2239_v4  ;;  %v8221_v4 = vld [vmem:[#allocation7 + $0x60] ss:$16 sps:$4 sm:$0xff]  }
 0x652   :  { %2741 = vmatpush1.bf16.msra.mxu0 %v9455_v16  ;;  %2782 = vmatpush1.bf16.msra.mxu1 %v9457_v6  ;;  %v8199_v16 = vld [vmem:[#allocation7 + $0xe4] ss:$16 sps:$4 sm:$0xff]   ;;  %v8202_v6 = vld [vmem:[#allocation7 + $0xec] ss:$16 sps:$4 sm:$0xff]  }
 0x653   :  { %2742 = vmatprep.subr.bf16.mxu0 %v9463_v21  ;;  %2783 = vmatprep.subr.bf16.mxu1 %v9465_v5 }
 0x654   :  { %2772 = vmatprep.mubr.bf16.mxu0 %v10955_v60  ;;  %2813 = vmatprep.mubr.bf16.mxu1 %v10955_v60 }
 0x656   :  { %2743 = vmatpush1.bf16.msra.mxu0 %v9467_v22  ;;  %2784 = vmatpush1.bf16.msra.mxu1 %v9469_v3  ;;  %v10968_v22 = vld [vmem:[#allocation32_spill] sm:$0xff] }
 0x657   :  { %2744 = vmatprep.subr.bf16.mxu0 %v9475_v40  ;;  %2785 = vmatprep.subr.bf16.mxu1 %v9477_v59 }
 0x65a   :  { %2745 = vmatpush1.bf16.msra.mxu0 %v9479_v57  ;;  %2786 = vmatpush1.bf16.msra.mxu1 %v9481_v20  ;;  %v10969_v20 = vld [vmem:[#allocation33_spill] sm:$0xff] }
 0x65b   :  { %2746 = vmatprep.subr.bf16.mxu0 %v9487_v10  ;;  %2787 = vmatprep.subr.bf16.mxu1 %v9489_v62 }
 0x65e   :  { %2747 = vmatpush1.bf16.msra.mxu0 %v9491_v12  ;;  %2788 = vmatpush1.bf16.msra.mxu1 %v9493_v0 }
 0x65f   :  { %2748 = vmatprep.subr.bf16.mxu0 %v9497_v9  ;;  %2789 = vmatprep.subr.bf16.mxu1 %v9499_v49 }
 0x662   :  { %2749 = vmatpush1.bf16.msra.mxu0 %v9503_v24  ;;  %2790 = vmatpush1.bf16.msra.mxu1 %v9505_v25  ;;  %v10970_v24 = vld [vmem:[#allocation34_spill] sm:$0xff] }
 0x663   :  { %2750 = vmatprep.subr.bf16.mxu0 %v9509_v1  ;;  %2791 = vmatprep.subr.bf16.mxu1 %v9511_v26  ;;  %v10971_v26 = vld [vmem:[#allocation36_spill] sm:$0xff] }
 0x666   :  { %2751 = vmatpush1.bf16.msra.mxu0 %v9515_v27  ;;  %2792 = vmatpush1.bf16.msra.mxu1 %v9517_v28 }
 0x667   :  { %2752 = vmatprep.subr.bf16.mxu0 %v9521_v29  ;;  %2793 = vmatprep.subr.bf16.mxu1 %v9523_v30 }
 0x66a   :  { %2753 = vmatpush1.bf16.msra.mxu0 %v9527_v32  ;;  %2794 = vmatpush1.bf16.msra.mxu1 %v9529_v35 }
 0x66b   :  { %2754 = vmatprep.subr.bf16.mxu0 %v9533_v36  ;;  %2795 = vmatprep.subr.bf16.mxu1 %v9535_v37 }
 0x66e   :  { %2755 = vmatpush1.bf16.msra.mxu0 %v9539_v38  ;;  %2796 = vmatpush1.bf16.msra.mxu1 %v9541_v39 }
 0x66f   :  { %3077 = vmatprep.subr.bf16.mxu0 %v8199_v16  ;;  %3150 = vmatprep.subr.bf16.mxu1 %v8202_v6  ;;  %v8224_v16 = vld [vmem:[#allocation7 + $0x68] ss:$16 sps:$4 sm:$0xff]   ;;  %v8229_v6 = vld [vmem:[#allocation7 + $0x44] ss:$16 sps:$4 sm:$0xff]  }
 0x711   :  { %v2466_v21 = vpop.f32.mrf.mxu0  ;;  %v2507_v5 = vpop.f32.mrf.mxu1 }
 0x712   :  { %v2514_v3 = vadd.f32 %v2466_v21, %v10968_v22  ;;  %v2516_v25 = vadd.f32 %v2507_v5, %v10970_v24  ;;  %v8232_v21 = vld [vmem:[#allocation7 + $0x4c] ss:$16 sps:$4 sm:$0xff]   ;;  %v8227_v5 = vld [vmem:[#allocation7 + $0x40] ss:$16 sps:$4 sm:$0xff]   ;;  %v8230_v22 = vld [vmem:[#allocation7 + $0x48] ss:$16 sps:$4 sm:$0xff]  }
 0x713   :  { %v2468_v40 = vpop.f32.mrf.mxu0  ;;  %v2509_v59 = vpop.f32.mrf.mxu1  ;;  %v9731_v24 = vld [vmem:[#allocation9 + $0xc0] ss:$16 sps:$4 sm:$0xff]  }
 0x714   :  { %v7608_v57 = vmul.f32 -1.442695, %v2514_v3  ;;  %v2515_v10 = vadd.f32 %v2468_v40, %v10969_v20  ;;  %v7610_v1 = vmul.f32 -1.442695, %v2516_v25  ;;  %v2517_v27 = vadd.f32 %v2509_v59, %v10971_v26  ;;  %v8235_v3 = vld [vmem:[#allocation7 + $0x24] ss:$16 sps:$4 sm:$0xff]  }
 0x715   :  { %v2470_v62 = vpop.f32.mrf.mxu0  ;;  %v2511_v12 = vpop.f32.mrf.mxu1  ;;  %v8238_v40 = vld [vmem:[#allocation7 + $0x2c] ss:$16 sps:$4 sm:$0xff]   ;;  %v8233_v59 = vld [vmem:[#allocation7 + $0x20] ss:$16 sps:$4 sm:$0xff]   ;;  %v8241_v20 = vld [vmem:[#allocation7 + $0x4] ss:$16 sps:$4 sm:$0xff]  }
 0x716   :  { %8541 = vpow2.f32 %v7608_v57  ;;  %v7609_v0 = vmul.f32 -1.442695, %v2515_v10  ;;  %v8236_v57 = vld [vmem:[#allocation7 + $0x28] ss:$16 sps:$4 sm:$0xff]   ;;  %v8244_v10 = vld [vmem:[#allocation7 + $0xc] ss:$16 sps:$4 sm:$0xff]  }
 0x717   :  { %v2471_v9 = vpop.f32.mrf.mxu0  ;;  %v2512_v49 = vpop.f32.mrf.mxu1  ;;  %v8239_v62 = vld [vmem:[#allocation7] ss:$16 sps:$4 sm:$0xff]   ;;  %v8242_v12 = vld [vmem:[#allocation7 + $0x8] ss:$16 sps:$4 sm:$0xff]   ;;  %v9741_v26 = vld [vmem:[#allocation9 + $0xac] ss:$16 sps:$4 sm:$0xff]  }
 0x718   :  { %8543 = vpow2.f32 %v7609_v0  ;;  %v2859_v0 = vpack.c.bf16 %v9411_v2, %v9363_v58  ;;  %v2860_v9 = vpack.c.bf16 %v9559_v53, %v9445_v19  ;;  %v2861_v49 = vpack.c.bf16 %v9653_v54, %v9605_v61  ;;  %v9715_v58 = vld [vmem:[#allocation9 + $0xe4] ss:$16 sps:$4 sm:$0xff]   ;;  %v9717_v2 = vld [vmem:[#allocation9 + $0xec] ss:$16 sps:$4 sm:$0xff]   ;;  %v9719_v19 = vld [vmem:[#allocation9 + $0xe0] ss:$16 sps:$4 sm:$0xff]  }
 0x719   :  { %8545 = vpow2.f32 %v7610_v1  ;;  %v9721_v53 = vld [vmem:[#allocation9 + $0xe8] ss:$16 sps:$4 sm:$0xff]   ;;  %v9727_v61 = vld [vmem:[#allocation9 + $0xc4] ss:$16 sps:$4 sm:$0xff]   ;;  %v9729_v54 = vld [vmem:[#allocation9 + $0xcc] ss:$16 sps:$4 sm:$0xff]  }
 0x71a   :  { %8547 = vtanh.f32 %v2517_v27  ;;  %v9733_v25 = vld [vmem:[#allocation9 + $0xc8] ss:$16 sps:$4 sm:$0xff]   ;;  %v9739_v1 = vld [vmem:[#allocation9 + $0xa4] ss:$16 sps:$4 sm:$0xff]   ;;  %v9743_v27 = vld [vmem:[#allocation9 + $0xa0] ss:$16 sps:$4 sm:$0xff]  }
 0x723   :  { %v8542_v28 = vpop.eup %8541 }
 0x724   :  { %v2527_v29 = vadd.f32 1.0, %v8542_v28  ;;  %v9745_v28 = vld [vmem:[#allocation9 + $0xa8] ss:$16 sps:$4 sm:$0xff]  }
 0x725   :  { %v8544_v30 = vpop.eup %8543 }
 0x726   :  { %8549 = vrcp.f32 %v2527_v29  ;;  %v2528_v32 = vadd.f32 1.0, %v8544_v30  ;;  %v8546_v35 = vpop.eup %8545  ;;  %v9751_v29 = vld [vmem:[#allocation9 + $0x84] ss:$16 sps:$4 sm:$0xff]   ;;  %v9753_v30 = vld [vmem:[#allocation9 + $0x8c] ss:$16 sps:$4 sm:$0xff]  }
 0x727   :  { %v8548_v36 = vpop.eup %8547  ;;  %v2529_v55 = vadd.f32 1.0, %v8546_v35  ;;  %v9757_v35 = vld [vmem:[#allocation9 + $0x88] ss:$16 sps:$4 sm:$0xff]  }
 0x728   :  { %8551 = vrcp.f32 %v2528_v32  ;;  %v9755_v32 = vld [vmem:[#allocation9 + $0x80] ss:$16 sps:$4 sm:$0xff]  }
 0x729   :  { %8553 = vrcp.f32 %v2529_v55  ;;  %v9775_v55 = vld [vmem:[#allocation9 + $0x40] ss:$16 sps:$4 sm:$0xff]  }
 0x733   :  { %v8550_v37 = vpop.eup %8549 }
 0x734   :  { %v2538_v38 = vmul.f32 %v8550_v37, %v8548_v36  ;;  %v9763_v36 = vld [vmem:[#allocation9 + $0x64] ss:$16 sps:$4 sm:$0xff]   ;;  %v9765_v37 = vld [vmem:[#allocation9 + $0x6c] ss:$16 sps:$4 sm:$0xff]  }
 0x735   :  { %v8552_v39 = vpop.eup %8551 }
 0x736   :  { %v2537_v56 = vmul.f32 %v8552_v39, %v9650_v48  ;;  %v8554_v11 = vpop.eup %8553  ;;  %v8218_v48 = vld [vmem:[#allocation7 + $0x88] ss:$16 sps:$4 sm:$0xff]  }
 0x737   :  { %v9769_v39 = vld [vmem:[#allocation9 + $0x68] ss:$16 sps:$4 sm:$0xff]  }
 0x738   :  { %v9694_v14 = vadd.f32 %v2538_v38, %v2537_v56  ;;  %v9767_v38 = vld [vmem:[#allocation9 + $0x60] ss:$16 sps:$4 sm:$0xff]   ;;  %v9777_v56 = vld [vmem:[#allocation9 + $0x44] ss:$16 sps:$4 sm:$0xff]  }
 0x73a   :  { %8555 = vtanh.f32 %v9694_v14 }
 0x747   :  { %v8556_v7 = vpop.eup %8555 }
 0x748   :  { %v9697_v18 = vmul.f32 %v8556_v7, %v8554_v11  ;;  %v9779_v11 = vld [vmem:[#allocation9 + $0x48] ss:$16 sps:$4 sm:$0xff]   ;;  %v9781_v7 = vld [vmem:[#allocation9 + $0x4c] ss:$16 sps:$4 sm:$0xff]  }
 0x74a   :  { %v2547_v8 = vpack.c.bf16 %v9697_v18, %v9697_v18 }
 0x74c   :  { %2773 = vmatmul.mubr.bf16.vlgmr.msra.gmra.mxu0 %v2547_v8  ;;  %2814 = vmatmul.mubr.bf16.vlgmr.msra.gmra.mxu1 %v2547_v8  ;;  %v9791_v8 = vld [vmem:[#allocation9 + $0x28] ss:$16 sps:$4 sm:$0xff]  }
 0x74d   :  { %3078 = vmatpush1.bf16.msra.mxu0 %v8197_v34  ;;  %3151 = vmatpush1.bf16.msra.mxu1 %v8200_v63  ;;  %v9787_v34 = vld [vmem:[#allocation9 + $0x20] ss:$16 sps:$4 sm:$0xff]   ;;  %v9789_v63 = vld [vmem:[#allocation9 + $0x24] ss:$16 sps:$4 sm:$0xff]  }
 0x74e   :  { %3079 = vmatprep.subr.bf16.mxu0 %v8205_v33  ;;  %3152 = vmatprep.subr.bf16.mxu1 %v8208_v31  ;;  %v9793_v33 = vld [vmem:[#allocation9 + $0x2c] ss:$16 sps:$4 sm:$0xff]   ;;  %v9795_v31 = vld [vmem:[#allocation9 + $0x4] ss:$16 sps:$4 sm:$0xff]  }
 0x74f   :  { %3109 = vmatprep.mubr.bf16.mxu0 %v10955_v60  ;;  %3182 = vmatprep.mubr.bf16.mxu1 %v10955_v60 }
 0x751   :  { %3080 = vmatpush1.bf16.msra.mxu0 %v8203_v23  ;;  %3153 = vmatpush1.bf16.msra.mxu1 %v8206_v51  ;;  %v9798_v23 = vld [vmem:[#allocation9 + $0xc] ss:$16 sps:$4 sm:$0xff]   ;;  %v9803_v51 = vld [vmem:[#allocation9] ss:$16 sps:$4 sm:$0xff]  }
 0x752   :  { %3081 = vmatprep.subr.bf16.mxu0 %v8211_v43  ;;  %3154 = vmatprep.subr.bf16.mxu1 %v8214_v44  ;;  %v9805_v43 = vld [vmem:[#allocation9 + $0x8] ss:$16 sps:$4 sm:$0xff]  }
 0x755   :  { %3082 = vmatpush1.bf16.msra.mxu0 %v8209_v45  ;;  %3155 = vmatpush1.bf16.msra.mxu1 %v8212_v46  ;;  %v10972_v46 = vld [vmem:[#allocation37_spill] sm:$0xff] }
 0x756   :  { %3083 = vmatprep.subr.bf16.mxu0 %v8217_v47  ;;  %3156 = vmatprep.subr.bf16.mxu1 %v8220_v42  ;;  %v281_v47 = vadd.f32 %v10972_v46, %v9290_v13  ;;  %v10973_v42 = vld [vmem:[#allocation35_spill] sm:$0xff] }
 0x759   :  { %3084 = vmatpush1.bf16.msra.mxu0 %v8215_v41  ;;  %3157 = vmatpush1.bf16.msra.mxu1 %v8218_v48 }
 0x75a   :  { %3085 = vmatprep.subr.bf16.mxu0 %v8223_v50  ;;  %3158 = vmatprep.subr.bf16.mxu1 %v8226_v52 }
 0x75d   :  { %3086 = vmatpush1.bf16.msra.mxu0 %v8221_v4  ;;  %3159 = vmatpush1.bf16.msra.mxu1 %v8224_v16 }
 0x75e   :  { %3087 = vmatprep.subr.bf16.mxu0 %v8229_v6  ;;  %3160 = vmatprep.subr.bf16.mxu1 %v8232_v21 }
 0x761   :  { %3088 = vmatpush1.bf16.msra.mxu0 %v8227_v5  ;;  %3161 = vmatpush1.bf16.msra.mxu1 %v8230_v22 }
 0x762   :  { %3089 = vmatprep.subr.bf16.mxu0 %v8235_v3  ;;  %3162 = vmatprep.subr.bf16.mxu1 %v8238_v40  ;;  %v10974_v40 = vld [vmem:[#allocation38_spill] sm:$0xff] }
 0x765   :  { %3090 = vmatpush1.bf16.msra.mxu0 %v8233_v59  ;;  %3163 = vmatpush1.bf16.msra.mxu1 %v8236_v57  ;;  %v354_v59 = vadd.f32 %v10974_v40, %v9295_v17 }
 0x766   :  { %3091 = vmatprep.subr.bf16.mxu0 %v8241_v20  ;;  %3164 = vmatprep.subr.bf16.mxu1 %v8244_v10 }
 0x769   :  { %3092 = vmatpush1.bf16.msra.mxu0 %v8239_v62  ;;  %3165 = vmatpush1.bf16.msra.mxu1 %v8242_v12 }
 0x76a   :  { %3451 = vmatprep.subr.bf16.mxu0 %v9715_v58  ;;  %3492 = vmatprep.subr.bf16.mxu1 %v9717_v2 }
 0x76c   :  { %3110 = vmatmul.mubr.bf16.vlgmr.msra.gmra.mxu0 %v2859_v0  ;;  %3183 = vmatmul.mubr.bf16.vlgmr.msra.gmra.mxu1 %v2859_v0 }
 0x76d   :  { %3119 = vmatprep.mubr.bf16.mxu0 %v10955_v60  ;;  %3192 = vmatprep.mubr.bf16.mxu1 %v10955_v60 }
 0x76e   :  { %3452 = vmatpush1.bf16.msra.mxu0 %v9719_v19  ;;  %3493 = vmatpush1.bf16.msra.mxu1 %v9721_v53 }
 0x76f   :  { %3453 = vmatprep.subr.bf16.mxu0 %v9727_v61  ;;  %3494 = vmatprep.subr.bf16.mxu1 %v9729_v54 }
 0x772   :  { %3454 = vmatpush1.bf16.msra.mxu0 %v9731_v24  ;;  %3495 = vmatpush1.bf16.msra.mxu1 %v9733_v25 }
 0x773   :  { %3455 = vmatprep.subr.bf16.mxu0 %v9739_v1  ;;  %3496 = vmatprep.subr.bf16.mxu1 %v9741_v26 }
 0x774   :  { %3120 = vmatmul.mubr.bf16.gmra.mxu0 %v2860_v9  ;;  %3193 = vmatmul.mubr.bf16.gmra.mxu1 %v2860_v9 }
 0x775   :  { %3129 = vmatprep.mubr.bf16.mxu0 %v10955_v60  ;;  %3202 = vmatprep.mubr.bf16.mxu1 %v10955_v60 }
 0x776   :  { %3456 = vmatpush1.bf16.msra.mxu0 %v9743_v27  ;;  %3497 = vmatpush1.bf16.msra.mxu1 %v9745_v28 }
 0x777   :  { %3457 = vmatprep.subr.bf16.mxu0 %v9751_v29  ;;  %3498 = vmatprep.subr.bf16.mxu1 %v9753_v30 }
 0x77a   :  { %3458 = vmatpush1.bf16.msra.mxu0 %v9755_v32  ;;  %3499 = vmatpush1.bf16.msra.mxu1 %v9757_v35 }
 0x77b   :  { %3459 = vmatprep.subr.bf16.mxu0 %v9763_v36  ;;  %3500 = vmatprep.subr.bf16.mxu1 %v9765_v37 }
 0x77c   :  { %3130 = vmatmul.mubr.bf16.gmra.mxu0 %v2861_v49  ;;  %3203 = vmatmul.mubr.bf16.gmra.mxu1 %v2861_v49 }
 0x77d   :  { %3139 = vmatprep.mubr.bf16.mxu0 %v10955_v60  ;;  %3212 = vmatprep.mubr.bf16.mxu1 %v10955_v60 }
 0x77e   :  { %3460 = vmatpush1.bf16.msra.mxu0 %v9767_v38  ;;  %3501 = vmatpush1.bf16.msra.mxu1 %v9769_v39 }
 0x77f   :  { %3461 = vmatprep.subr.bf16.mxu0 %v9777_v56  ;;  %3502 = vmatprep.subr.bf16.mxu1 %v9781_v7 }
 0x782   :  { %3462 = vmatpush1.bf16.msra.mxu0 %v9775_v55  ;;  %3503 = vmatpush1.bf16.msra.mxu1 %v9779_v11 }
 0x783   :  { %3463 = vmatprep.subr.bf16.mxu0 %v9789_v63  ;;  %3504 = vmatprep.subr.bf16.mxu1 %v9793_v33 }
 0x786   :  { %3464 = vmatpush1.bf16.msra.mxu0 %v9787_v34  ;;  %3505 = vmatpush1.bf16.msra.mxu1 %v9791_v8 }
 0x787   :  { %3465 = vmatprep.subr.bf16.mxu0 %v9795_v31  ;;  %3506 = vmatprep.subr.bf16.mxu1 %v9798_v23 }
 0x78a   :  { %3466 = vmatpush1.bf16.msra.mxu0 %v9803_v51  ;;  %3507 = vmatpush1.bf16.msra.mxu1 %v9805_v43 }
 0x78b   :  { %3759 = vmatprep.subr.bf16.mxu0 %v9715_v58  ;;  %3800 = vmatprep.subr.bf16.mxu1 %v9717_v2 }
 0x80c   :  { %v2774_v44 = vpop.f32.mrf.mxu0  ;;  %v2815_v45 = vpop.f32.mrf.mxu1 }
 0x80d   :  { %v2822_v41 = vadd.f32 %v2774_v44, %v10973_v42  ;;  %v2824_v3 = vadd.f32 %v2815_v45, %v9351_v15 }
 0x80e   :  { %v2776_v48 = vpop.f32.mrf.mxu0  ;;  %v2817_v50 = vpop.f32.mrf.mxu1 }
 0x80f   :  { %v7643_v52 = vmul.f32 -1.442695, %v2822_v41  ;;  %v2823_v4 = vadd.f32 %v2776_v48, %v281_v47  ;;  %v7645_v57 = vmul.f32 -1.442695, %v2824_v3  ;;  %v2825_v13 = vadd.f32 %v2817_v50, %v354_v59 }
 0x810   :  { %v2778_v16 = vpop.f32.mrf.mxu0  ;;  %v2819_v6 = vpop.f32.mrf.mxu1 }
 0x811   :  { %8557 = vpow2.f32 %v7643_v52  ;;  %v7644_v21 = vmul.f32 -1.442695, %v2823_v4 }
 0x812   :  { %v2779_v5 = vpop.f32.mrf.mxu0  ;;  %v2820_v22 = vpop.f32.mrf.mxu1 }
 0x813   :  { %8559 = vpow2.f32 %v7644_v21 }
 0x814   :  { %8561 = vpow2.f32 %v7645_v57 }
 0x815   :  { %8563 = vtanh.f32 %v2825_v13 }
 0x81e   :  { %v8558_v20 = vpop.eup %8557 }
 0x81f   :  { %v2835_v10 = vadd.f32 1.0, %v8558_v20 }
 0x820   :  { %v8560_v62 = vpop.eup %8559 }
 0x821   :  { %8565 = vrcp.f32 %v2835_v10  ;;  %v2836_v12 = vadd.f32 1.0, %v8560_v62  ;;  %v8562_v0 = vpop.eup %8561 }
 0x822   :  { %v8564_v9 = vpop.eup %8563  ;;  %v2837_v47 = vadd.f32 1.0, %v8562_v0 }
 0x823   :  { %8567 = vrcp.f32 %v2836_v12 }
 0x824   :  { %8569 = vrcp.f32 %v2837_v47  ;;  %v2895_v47 = vld [vmem:[%s10915_s6] sm:$0xf] }
 0x82e   :  { %v8566_v49 = vpop.eup %8565 }
 0x82f   :  { %v2846_v44 = vmul.f32 %v8566_v49, %v8564_v9 }
 0x830   :  { %v8568_v46 = vpop.eup %8567 }
 0x831   :  { %v2845_v15 = vmul.f32 %v8568_v46, %v9694_v14  ;;  %v8570_v17 = vpop.eup %8569  ;;  %v3111_v14 = vpop.f32.mrf.mxu0 }
 0x833   :  { %v2847_v45 = vadd.f32 %v2846_v44, %v2845_v15  ;;  %v3113_v50 = vpop.f32.mrf.mxu0 }
 0x835   :  { %8571 = vtanh.f32 %v2847_v45  ;;  %v9859_v4 = vpop.f32.mrf.mxu0 }
 0x837   :  { %v9863_v6 = vpop.f32.mrf.mxu0 }
 0x839   :  { %v9867_v5 = vpop.f32.mrf.mxu0 }
 0x83b   :  { %v9871_v3 = vpop.f32.mrf.mxu0 }
 0x83d   :  { %v9875_v59 = vpop.f32.mrf.mxu0 }
 0x83e   :  { %10977 = vst [vmem:[#allocation22_spill] sm:$0xff] %v9875_v59 }
 0x83f   :  { %v9879_v13 = vpop.f32.mrf.mxu0 }
 0x840   :  { %10979 = vst [vmem:[#allocation24_spill] sm:$0xff] %v9879_v13  ;;  %v10999_v13 = vld [vmem:[#allocation17_spill] sm:$0xff] }
 0x841   :  { %v9883_v10 = vpop.f32.mrf.mxu0  ;;  %v9927_v59 = vrot.slane %v2895_v47, %v10999_v13 }
 0x842   :  { %v8572_v42 = vpop.eup %8571  ;;  %10981 = vst [vmem:[#allocation26_spill] sm:$0xff] %v9883_v10 }
 0x843   :  { %v2849_v41 = vmul.f32 %v8572_v42, %v8570_v17  ;;  %v9887_v12 = vpop.f32.mrf.mxu0 }
 0x844   :  { %10983 = vst [vmem:[#allocation29_spill] sm:$0xff] %v9887_v12 }
 0x845   :  { %v2862_v48 = vpack.c.bf16 %v2849_v41, %v9697_v18  ;;  %v3184_v18 = vpop.f32.mrf.mxu1  ;;  %v9891_v9 = vpop.f32.mrf.mxu0  ;;  %v10993_v41 = vld [vmem:[#allocation16_spill] sm:$0xff] }
 0x846   :  { %10985 = vst [vmem:[#allocation30_spill] sm:$0xff] %v9891_v9 }
 0x847   :  { %3140 = vmatmul.mubr.bf16.gmra.mxu0 %v2862_v48  ;;  %3213 = vmatmul.mubr.bf16.gmra.mxu1 %v2862_v48  ;;  %v3186_v52 = vpop.f32.mrf.mxu1  ;;  %v9895_v44 = vpop.f32.mrf.mxu0  ;;  %v9911_v48 = vrot.slane %v2895_v47, %v10993_v41 }
 0x848   :  { %3483 = vmatprep.mubr.bf16.mxu0 %v10955_v60  ;;  %3524 = vmatprep.mubr.bf16.mxu1 %v10955_v60  ;;  %10987 = vst [vmem:[#allocation32_spill] sm:$0xff] %v9895_v44 }
 0x849   :  { %v9861_v16 = vpop.f32.mrf.mxu1 }
 0x84b   :  { %v9865_v21 = vpop.f32.mrf.mxu1 }
 0x84d   :  { %v9869_v22 = vpop.f32.mrf.mxu1 }
 0x84e   :  { %10975 = vst [vmem:[#allocation21_spill] sm:$0xff] %v9869_v22 }
 0x84f   :  { %3484 = vmatmul.mubr.bf16.vlgmr.msra.gmra.mxu0 %v10955_v60  ;;  %3525 = vmatmul.mubr.bf16.vlgmr.msra.gmra.mxu1 %v10955_v60  ;;  %v9873_v40 = vpop.f32.mrf.mxu1 }
 0x850   :  { %3760 = vmatpush1.bf16.msra.mxu0 %v9719_v19  ;;  %3801 = vmatpush1.bf16.msra.mxu1 %v9721_v53  ;;  %10976 = vst [vmem:[#allocation20_spill] sm:$0xff] %v9873_v40  ;;  %v11000_v40 = vld [vmem:[#allocation19_spill] sm:$0xff] }
 0x851   :  { %3761 = vmatprep.subr.bf16.mxu0 %v9727_v61  ;;  %3802 = vmatprep.subr.bf16.mxu1 %v9729_v54  ;;  %v9877_v57 = vpop.f32.mrf.mxu1  ;;  %v9931_v22 = vrot.slane %v2895_v47, %v11000_v40 }
 0x852   :  { %3791 = vmatprep.mubr.bf16.mxu0 %v10955_v60  ;;  %3832 = vmatprep.mubr.bf16.mxu1 %v10955_v60  ;;  %10978 = vst [vmem:[#allocation23_spill] sm:$0xff] %v9877_v57 }
 0x853   :  { %v9881_v20 = vpop.f32.mrf.mxu1 }
 0x854   :  { %3762 = vmatpush1.bf16.msra.mxu0 %v9731_v24  ;;  %3803 = vmatpush1.bf16.msra.mxu1 %v9733_v25  ;;  %10980 = vst [vmem:[#allocation25_spill] sm:$0xff] %v9881_v20 }
 0x855   :  { %3763 = vmatprep.subr.bf16.mxu0 %v9739_v1  ;;  %3804 = vmatprep.subr.bf16.mxu1 %v9741_v26  ;;  %v9885_v62 = vpop.f32.mrf.mxu1 }
 0x856   :  { %10982 = vst [vmem:[#allocation28_spill] sm:$0xff] %v9885_v62 }
 0x857   :  { %v9889_v0 = vpop.f32.mrf.mxu1 }
 0x858   :  { %3764 = vmatpush1.bf16.msra.mxu0 %v9743_v27  ;;  %3805 = vmatpush1.bf16.msra.mxu1 %v9745_v28  ;;  %10984 = vst [vmem:[#allocation27_spill] sm:$0xff] %v9889_v0 }
 0x859   :  { %3765 = vmatprep.subr.bf16.mxu0 %v9751_v29  ;;  %3806 = vmatprep.subr.bf16.mxu1 %v9753_v30  ;;  %v9893_v49 = vpop.f32.mrf.mxu1 }
 0x85a   :  { %10986 = vst [vmem:[#allocation31_spill] sm:$0xff] %v9893_v49 }
 0x85b   :  { %v9897_v46 = vpop.f32.mrf.mxu1 }
 0x85c   :  { %3766 = vmatpush1.bf16.msra.mxu0 %v9755_v32  ;;  %3807 = vmatpush1.bf16.msra.mxu1 %v9757_v35  ;;  %10988 = vst [vmem:[#allocation33_spill] sm:$0xff] %v9897_v46  ;;  %v10996_v46 = vld [vmem:[#allocation18_spill] sm:$0xff] }
 0x85d   :  { %3767 = vmatprep.subr.bf16.mxu0 %v9763_v36  ;;  %3808 = vmatprep.subr.bf16.mxu1 %v9765_v37  ;;  %v9918_v9 = vrot.slane %v2895_v47, %v10996_v46 }
 0x860   :  { %3768 = vmatpush1.bf16.msra.mxu0 %v9767_v38  ;;  %3809 = vmatpush1.bf16.msra.mxu1 %v9769_v39 }
 0x861   :  { %3769 = vmatprep.subr.bf16.mxu0 %v9777_v56  ;;  %3810 = vmatprep.subr.bf16.mxu1 %v9781_v7 }
 0x864   :  { %3770 = vmatpush1.bf16.msra.mxu0 %v9775_v55  ;;  %3811 = vmatpush1.bf16.msra.mxu1 %v9779_v11 }
 0x865   :  { %3771 = vmatprep.subr.bf16.mxu0 %v9789_v63  ;;  %3812 = vmatprep.subr.bf16.mxu1 %v9793_v33 }
 0x868   :  { %3772 = vmatpush1.bf16.msra.mxu0 %v9787_v34  ;;  %3813 = vmatpush1.bf16.msra.mxu1 %v9791_v8 }
 0x869   :  { %3773 = vmatprep.subr.bf16.mxu0 %v9795_v31  ;;  %3814 = vmatprep.subr.bf16.mxu1 %v9798_v23 }
 0x86c   :  { %3774 = vmatpush1.bf16.msra.mxu0 %v9803_v51  ;;  %3815 = vmatpush1.bf16.msra.mxu1 %v9805_v43 }
 0x86d   :  { %4067 = vmatprep.subr.bf16.mxu0 %v9715_v58  ;;  %4108 = vmatprep.subr.bf16.mxu1 %v9717_v2 }
 0x907   :  { %v9902_v15 = vpop.f32.mrf.mxu0  ;;  %v9904_v45 = vpop.f32.mrf.mxu1 }
 0x908   :  { %10989 = vst [vmem:[#allocation34_spill] sm:$0xff] %v9902_v15  ;;  %10990 = vst [vmem:[#allocation36_spill] sm:$0xff] %v9904_v45  ;;  %v3112_v45 = vadd.f32 %v3111_v14, %v9911_v48  ;;  %v3185_v14 = vadd.f32 %v3184_v18, %v9927_v59 }
 0x909   :  { %v9906_v17 = vpop.f32.mrf.mxu0  ;;  %v9908_v42 = vpop.f32.mrf.mxu1 }
 0x90a   :  { %10991 = vst [vmem:[#allocation37_spill] sm:$0xff] %v9906_v17  ;;  %10992 = vst [vmem:[#allocation35_spill] sm:$0xff] %v9908_v42  ;;  %v3114_v42 = vadd.f32 %v3113_v50, %v9918_v9 }
 0x90b   :  { %v9913_v49 = vpop.f32.mrf.mxu0  ;;  %v9915_v44 = vpop.f32.mrf.mxu1 }
 0x90c   :  { %10994 = vst [vmem:[#allocation38_spill] sm:$0xff] %v9913_v49  ;;  %10995 = vst [vmem:[#allocation39_spill] sm:$0xff] %v9915_v44 }
 0x90d   :  { %v9920_v0 = vpop.f32.mrf.mxu0  ;;  %v9922_v62 = vpop.f32.mrf.mxu1 }
 0x90e   :  { %10997 = vst [vmem:[#allocation40_spill] sm:$0xff] %v9920_v0  ;;  %10998 = vst [vmem:[#allocation41_spill] sm:$0xff] %v9922_v62 }
 0x90f   :  { %v3485_v15 = vpop.f32.mrf.mxu0  ;;  %v3526_v17 = vpop.f32.mrf.mxu1 }
 0x910   :  { %v3533_v12 = vadd.f32 %v3485_v15, %v3112_v45  ;;  %v3535_v50 = vadd.f32 %v3526_v17, %v3185_v14  ;;  %v3187_v15 = vadd.f32 %v3186_v52, %v9931_v22 }
 0x911   :  { %v3487_v41 = vpop.f32.mrf.mxu0  ;;  %v3528_v10 = vpop.f32.mrf.mxu1 }
 0x912   :  { %v7710_v20 = vmul.f32 -1.442695, %v3533_v12  ;;  %v3534_v49 = vadd.f32 %v3487_v41, %v3114_v42  ;;  %v7712_v12 = vmul.f32 -1.442695, %v3535_v50 }
 0x913   :  { %v3489_v57 = vpop.f32.mrf.mxu0  ;;  %v3530_v44 = vpop.f32.mrf.mxu1 }
 0x914   :  { %8573 = vpow2.f32 %v7710_v20  ;;  %v7711_v46 = vmul.f32 -1.442695, %v3534_v49  ;;  %v3536_v57 = vadd.f32 %v3528_v10, %v3187_v15  ;;  %v3116_v15 = vadd.f32 %v9859_v4, %v9911_v48 }
 0x915   :  { %v3490_v0 = vpop.f32.mrf.mxu0  ;;  %v3531_v62 = vpop.f32.mrf.mxu1 }
 0x916   :  { %8575 = vpow2.f32 %v7711_v46 }
 0x917   :  { %8577 = vpow2.f32 %v7712_v12 }
 0x921   :  { %v8574_v45 = vpop.eup %8573 }
 0x922   :  { %v3546_v44 = vadd.f32 1.0, %v8574_v45 }
 0x923   :  { %v8576_v20 = vpop.eup %8575 }
 0x924   :  { %8579 = vrcp.f32 %v3546_v44  ;;  %v3547_v49 = vadd.f32 1.0, %v8576_v20  ;;  %v8578_v62 = vpop.eup %8577 }
 0x925   :  { %8581 = vtanh.f32 %v3536_v57  ;;  %v3548_v42 = vadd.f32 1.0, %v8578_v62  ;;  %v3118_v57 = vadd.f32 %v9863_v6, %v9918_v9 }
 0x926   :  { %8583 = vrcp.f32 %v3547_v49 }
 0x927   :  { %8585 = vrcp.f32 %v3548_v42 }
 0x931   :  { %v8580_v0 = vpop.eup %8579 }
 0x932   :  { %v8582_v46 = vpop.eup %8581 }
 0x933   :  { %v8584_v18 = vpop.eup %8583  ;;  %v3557_v41 = vmul.f32 %v8582_v46, %v8580_v0 }
 0x934   :  { %v3556_v47 = vmul.f32 0.0, %v8584_v18  ;;  %v8586_v52 = vpop.eup %8585 }
 0x936   :  { %v9934_v17 = vadd.f32 %v3557_v41, %v3556_v47  ;;  %v3191_v41 = vadd.f32 %v9865_v21, %v9931_v22 }
 0x938   :  { %8587 = vtanh.f32 %v9934_v17 }
 0x945   :  { %v8588_v10 = vpop.eup %8587 }
 0x946   :  { %v9937_v14 = vmul.f32 %v8588_v10, %v8586_v52 }
 0x948   :  { %v3566_v50 = vpack.c.bf16 %v9937_v14, %v9937_v14 }
 0x94a   :  { %3792 = vmatmul.mubr.bf16.vlgmr.msra.gmra.mxu0 %v3566_v50  ;;  %3833 = vmatmul.mubr.bf16.vlgmr.msra.gmra.mxu1 %v3566_v50 }
 0x94b   :  { %4068 = vmatpush1.bf16.msra.mxu0 %v9719_v19  ;;  %4109 = vmatpush1.bf16.msra.mxu1 %v9721_v53 }
 0x94c   :  { %4069 = vmatprep.subr.bf16.mxu0 %v9727_v61  ;;  %4110 = vmatprep.subr.bf16.mxu1 %v9729_v54 }
 0x94d   :  { %4099 = vmatprep.mubr.bf16.mxu0 %v10955_v60  ;;  %4140 = vmatprep.mubr.bf16.mxu1 %v10955_v60 }
 0x94f   :  { %4070 = vmatpush1.bf16.msra.mxu0 %v9731_v24  ;;  %4111 = vmatpush1.bf16.msra.mxu1 %v9733_v25 }
 0x950   :  { %4071 = vmatprep.subr.bf16.mxu0 %v9739_v1  ;;  %4112 = vmatprep.subr.bf16.mxu1 %v9741_v26 }
 0x953   :  { %4072 = vmatpush1.bf16.msra.mxu0 %v9743_v27  ;;  %4113 = vmatpush1.bf16.msra.mxu1 %v9745_v28 }
 0x954   :  { %4073 = vmatprep.subr.bf16.mxu0 %v9751_v29  ;;  %4114 = vmatprep.subr.bf16.mxu1 %v9753_v30 }
 0x957   :  { %4074 = vmatpush1.bf16.msra.mxu0 %v9755_v32  ;;  %4115 = vmatpush1.bf16.msra.mxu1 %v9757_v35 }
 0x958   :  { %4075 = vmatprep.subr.bf16.mxu0 %v9763_v36  ;;  %4116 = vmatprep.subr.bf16.mxu1 %v9765_v37 }
 0x95b   :  { %4076 = vmatpush1.bf16.msra.mxu0 %v9767_v38  ;;  %4117 = vmatpush1.bf16.msra.mxu1 %v9769_v39 }
 0x95c   :  { %4077 = vmatprep.subr.bf16.mxu0 %v9777_v56  ;;  %4118 = vmatprep.subr.bf16.mxu1 %v9781_v7 }
 0x95f   :  { %4078 = vmatpush1.bf16.msra.mxu0 %v9775_v55  ;;  %4119 = vmatpush1.bf16.msra.mxu1 %v9779_v11 }
 0x960   :  { %4079 = vmatprep.subr.bf16.mxu0 %v9789_v63  ;;  %4120 = vmatprep.subr.bf16.mxu1 %v9793_v33 }
 0x963   :  { %4080 = vmatpush1.bf16.msra.mxu0 %v9787_v34  ;;  %4121 = vmatpush1.bf16.msra.mxu1 %v9791_v8 }
 0x964   :  { %4081 = vmatprep.subr.bf16.mxu0 %v9795_v31  ;;  %4122 = vmatprep.subr.bf16.mxu1 %v9798_v23 }
 0x967   :  { %4082 = vmatpush1.bf16.msra.mxu0 %v9803_v51  ;;  %4123 = vmatpush1.bf16.msra.mxu1 %v9805_v43 }
 0x968   :  { %4375 = vmatprep.subr.bf16.mxu0 %v9715_v58  ;;  %4416 = vmatprep.subr.bf16.mxu1 %v9717_v2  ;;  %v3189_v2 = vadd.f32 %v9861_v16, %v9927_v59 }
 0xa0a   :  { %v3793_v12 = vpop.f32.mrf.mxu0  ;;  %v3834_v45 = vpop.f32.mrf.mxu1 }
 0xa0b   :  { %v3841_v44 = vadd.f32 %v3793_v12, %v3116_v15  ;;  %v3843_v4 = vadd.f32 %v3834_v45, %v3189_v2 }
 0xa0c   :  { %v3795_v20 = vpop.f32.mrf.mxu0  ;;  %v3836_v49 = vpop.f32.mrf.mxu1 }
 0xa0d   :  { %v7745_v62 = vmul.f32 -1.442695, %v3841_v44  ;;  %v3842_v0 = vadd.f32 %v3795_v20, %v3118_v57  ;;  %v7747_v6 = vmul.f32 -1.442695, %v3843_v4  ;;  %v3844_v52 = vadd.f32 %v3836_v49, %v3191_v41  ;;  %v10041_v41 = vld [vmem:[#allocation9 + $0xe4] ss:$16 sps:$4 sm:$0xff]  }
 0xa0e   :  { %v3797_v46 = vpop.f32.mrf.mxu0  ;;  %v3838_v18 = vpop.f32.mrf.mxu1 }
 0xa0f   :  { %8589 = vpow2.f32 %v7745_v62  ;;  %v7746_v42 = vmul.f32 -1.442695, %v3842_v0 }
 0xa10   :  { %v3798_v58 = vpop.f32.mrf.mxu0  ;;  %v3839_v47 = vpop.f32.mrf.mxu1 }
 0xa11   :  { %8591 = vpow2.f32 %v7746_v42 }
 0xa12   :  { %8593 = vpow2.f32 %v7747_v6  ;;  %v10043_v6 = vld [vmem:[#allocation9 + $0xec] ss:$16 sps:$4 sm:$0xff]  }
 0xa13   :  { %8595 = vtanh.f32 %v3844_v52  ;;  %v10045_v52 = vld [vmem:[#allocation9 + $0xe0] ss:$16 sps:$4 sm:$0xff]  }
 0xa1c   :  { %v8590_v10 = vpop.eup %8589 }
 0xa1d   :  { %v3854_v50 = vadd.f32 1.0, %v8590_v10  ;;  %v10047_v10 = vld [vmem:[#allocation9 + $0xe8] ss:$16 sps:$4 sm:$0xff]  }
 0xa1e   :  { %v8592_v15 = vpop.eup %8591 }
 0xa1f   :  { %8597 = vrcp.f32 %v3854_v50  ;;  %v3855_v12 = vadd.f32 1.0, %v8592_v15  ;;  %v8594_v57 = vpop.eup %8593  ;;  %v10053_v50 = vld [vmem:[#allocation9 + $0xc4] ss:$16 sps:$4 sm:$0xff]   ;;  %v10055_v15 = vld [vmem:[#allocation9 + $0xcc] ss:$16 sps:$4 sm:$0xff]  }
 0xa20   :  { %v8596_v44 = vpop.eup %8595  ;;  %v3856_v16 = vadd.f32 1.0, %v8594_v57  ;;  %v10059_v57 = vld [vmem:[#allocation9 + $0xc8] ss:$16 sps:$4 sm:$0xff]  }
 0xa21   :  { %8599 = vrcp.f32 %v3855_v12  ;;  %v10057_v12 = vld [vmem:[#allocation9 + $0xc0] ss:$16 sps:$4 sm:$0xff]  }
 0xa22   :  { %8601 = vrcp.f32 %v3856_v16  ;;  %v10077_v16 = vld [vmem:[#allocation9 + $0x84] ss:$16 sps:$4 sm:$0xff]  }
 0xa2c   :  { %v8598_v20 = vpop.eup %8597 }
 0xa2d   :  { %v3865_v62 = vmul.f32 %v8598_v20, %v8596_v44  ;;  %v10065_v44 = vld [vmem:[#allocation9 + $0xa4] ss:$16 sps:$4 sm:$0xff]   ;;  %v10067_v20 = vld [vmem:[#allocation9 + $0xac] ss:$16 sps:$4 sm:$0xff]  }
 0xa2e   :  { %v8600_v0 = vpop.eup %8599 }
 0xa2f   :  { %v3864_v45 = vmul.f32 %v8600_v0, %v9934_v17  ;;  %v8602_v21 = vpop.eup %8601  ;;  %v10071_v0 = vld [vmem:[#allocation9 + $0xa8] ss:$16 sps:$4 sm:$0xff]  }
 0xa31   :  { %v9984_v46 = vadd.f32 %v3865_v62, %v3864_v45  ;;  %v10069_v62 = vld [vmem:[#allocation9 + $0xa0] ss:$16 sps:$4 sm:$0xff]   ;;  %v10079_v45 = vld [vmem:[#allocation9 + $0x8c] ss:$16 sps:$4 sm:$0xff]  }
 0xa33   :  { %8603 = vtanh.f32 %v9984_v46 }
 0xa40   :  { %v8604_v49 = vpop.eup %8603 }
 0xa41   :  { %v9987_v18 = vmul.f32 %v8604_v49, %v8602_v21  ;;  %v10083_v21 = vld [vmem:[#allocation9 + $0x88] ss:$16 sps:$4 sm:$0xff]   ;;  %v10087_v49 = vld [vmem:[#allocation9 + $0x64] ss:$16 sps:$4 sm:$0xff]  }
 0xa43   :  { %v3874_v42 = vpack.c.bf16 %v9987_v18, %v9987_v18 }
 0xa45   :  { %4100 = vmatmul.mubr.bf16.vlgmr.msra.gmra.mxu0 %v3874_v42  ;;  %4141 = vmatmul.mubr.bf16.vlgmr.msra.gmra.mxu1 %v3874_v42  ;;  %v10089_v42 = vld [vmem:[#allocation9 + $0x6c] ss:$16 sps:$4 sm:$0xff]  }
 0xa46   :  { %4376 = vmatpush1.bf16.msra.mxu0 %v9719_v19  ;;  %4417 = vmatpush1.bf16.msra.mxu1 %v9721_v53  ;;  %v3122_v19 = vadd.f32 %v9867_v5, %v9911_v48 }
 0xa47   :  { %4377 = vmatprep.subr.bf16.mxu0 %v9727_v61  ;;  %4418 = vmatprep.subr.bf16.mxu1 %v9729_v54  ;;  %v3124_v54 = vadd.f32 %v9871_v3, %v9918_v9 }
 0xa48   :  { %4407 = vmatprep.mubr.bf16.mxu0 %v10955_v60  ;;  %4448 = vmatprep.mubr.bf16.mxu1 %v10955_v60 }
 0xa4a   :  { %4378 = vmatpush1.bf16.msra.mxu0 %v9731_v24  ;;  %4419 = vmatpush1.bf16.msra.mxu1 %v9733_v25 }
 0xa4b   :  { %4379 = vmatprep.subr.bf16.mxu0 %v9739_v1  ;;  %4420 = vmatprep.subr.bf16.mxu1 %v9741_v26 }
 0xa4e   :  { %4380 = vmatpush1.bf16.msra.mxu0 %v9743_v27  ;;  %4421 = vmatpush1.bf16.msra.mxu1 %v9745_v28 }
 0xa4f   :  { %4381 = vmatprep.subr.bf16.mxu0 %v9751_v29  ;;  %4422 = vmatprep.subr.bf16.mxu1 %v9753_v30 }
 0xa52   :  { %4382 = vmatpush1.bf16.msra.mxu0 %v9755_v32  ;;  %4423 = vmatpush1.bf16.msra.mxu1 %v9757_v35 }
 0xa53   :  { %4383 = vmatprep.subr.bf16.mxu0 %v9763_v36  ;;  %4424 = vmatprep.subr.bf16.mxu1 %v9765_v37  ;;  %v11001_v36 = vld [vmem:[#allocation21_spill] sm:$0xff] }
 0xa54   :  { %v3195_v37 = vadd.f32 %v11001_v36, %v9927_v59  ;;  %v11003_v36 = vld [vmem:[#allocation22_spill] sm:$0xff] }
 0xa56   :  { %4384 = vmatpush1.bf16.msra.mxu0 %v9767_v38  ;;  %4425 = vmatpush1.bf16.msra.mxu1 %v9769_v39  ;;  %v11002_v39 = vld [vmem:[#allocation20_spill] sm:$0xff] }
 0xa57   :  { %4385 = vmatprep.subr.bf16.mxu0 %v9777_v56  ;;  %4426 = vmatprep.subr.bf16.mxu1 %v9781_v7 }
 0xa5a   :  { %4386 = vmatpush1.bf16.msra.mxu0 %v9775_v55  ;;  %4427 = vmatpush1.bf16.msra.mxu1 %v9779_v11  ;;  %v3197_v55 = vadd.f32 %v11002_v39, %v9931_v22 }
 0xa5b   :  { %4387 = vmatprep.subr.bf16.mxu0 %v9789_v63  ;;  %4428 = vmatprep.subr.bf16.mxu1 %v9793_v33 }
 0xa5e   :  { %4388 = vmatpush1.bf16.msra.mxu0 %v9787_v34  ;;  %4429 = vmatpush1.bf16.msra.mxu1 %v9791_v8 }
 0xa5f   :  { %4389 = vmatprep.subr.bf16.mxu0 %v9795_v31  ;;  %4430 = vmatprep.subr.bf16.mxu1 %v9798_v23 }
 0xa62   :  { %4390 = vmatpush1.bf16.msra.mxu0 %v9803_v51  ;;  %4431 = vmatpush1.bf16.msra.mxu1 %v9805_v43 }
 0xa63   :  { %4683 = vmatprep.subr.bf16.mxu0 %v10041_v41  ;;  %4724 = vmatprep.subr.bf16.mxu1 %v10043_v6 }
 0xb05   :  { %v4101_v53 = vpop.f32.mrf.mxu0  ;;  %v4142_v61 = vpop.f32.mrf.mxu1 }
 0xb06   :  { %v4149_v24 = vadd.f32 %v4101_v53, %v3122_v19  ;;  %v4151_v38 = vadd.f32 %v4142_v61, %v3195_v37  ;;  %v10093_v19 = vld [vmem:[#allocation9 + $0x60] ss:$16 sps:$4 sm:$0xff]   ;;  %v10095_v53 = vld [vmem:[#allocation9 + $0x68] ss:$16 sps:$4 sm:$0xff]   ;;  %v10099_v61 = vld [vmem:[#allocation9 + $0x44] ss:$16 sps:$4 sm:$0xff]   ;;  %v3126_v37 = vadd.f32 %v11003_v36, %v9911_v48 }
 0xb07   :  { %v4103_v25 = vpop.f32.mrf.mxu0  ;;  %v4144_v1 = vpop.f32.mrf.mxu1 }
 0xb08   :  { %v7780_v26 = vmul.f32 -1.442695, %v4149_v24  ;;  %v4150_v27 = vadd.f32 %v4103_v25, %v3124_v54  ;;  %v7782_v56 = vmul.f32 -1.442695, %v4151_v38  ;;  %v4152_v11 = vadd.f32 %v4144_v1, %v3197_v55  ;;  %v10101_v54 = vld [vmem:[#allocation9 + $0x4c] ss:$16 sps:$4 sm:$0xff]  }
 0xb09   :  { %v4105_v28 = vpop.f32.mrf.mxu0  ;;  %v4146_v29 = vpop.f32.mrf.mxu1  ;;  %v10105_v24 = vld [vmem:[#allocation9 + $0x40] ss:$16 sps:$4 sm:$0xff]   ;;  %v10107_v25 = vld [vmem:[#allocation9 + $0x48] ss:$16 sps:$4 sm:$0xff]   ;;  %v10111_v1 = vld [vmem:[#allocation9 + $0x24] ss:$16 sps:$4 sm:$0xff]  }
 0xb0a   :  { %8605 = vpow2.f32 %v7780_v26  ;;  %v7781_v30 = vmul.f32 -1.442695, %v4150_v27  ;;  %v10113_v26 = vld [vmem:[#allocation9 + $0x2c] ss:$16 sps:$4 sm:$0xff]   ;;  %v10117_v27 = vld [vmem:[#allocation9 + $0x20] ss:$16 sps:$4 sm:$0xff]  }
 0xb0b   :  { %v4106_v32 = vpop.f32.mrf.mxu0  ;;  %v4147_v35 = vpop.f32.mrf.mxu1  ;;  %v10119_v28 = vld [vmem:[#allocation9 + $0x28] ss:$16 sps:$4 sm:$0xff]   ;;  %v10123_v29 = vld [vmem:[#allocation9 + $0x4] ss:$16 sps:$4 sm:$0xff]  }
 0xb0c   :  { %8607 = vpow2.f32 %v7781_v30  ;;  %v10125_v30 = vld [vmem:[#allocation9 + $0xc] ss:$16 sps:$4 sm:$0xff]   ;;  %v10129_v32 = vld [vmem:[#allocation9] ss:$16 sps:$4 sm:$0xff]   ;;  %v10131_v35 = vld [vmem:[#allocation9 + $0x8] ss:$16 sps:$4 sm:$0xff]  }
 0xb0d   :  { %8609 = vpow2.f32 %v7782_v56  ;;  %v11004_v55 = vld [vmem:[#allocation24_spill] sm:$0xff] }
 0xb0e   :  { %8611 = vtanh.f32 %v4152_v11  ;;  %v3128_v56 = vadd.f32 %v11004_v55, %v9918_v9 }
 0xb17   :  { %v8606_v7 = vpop.eup %8605 }
 0xb18   :  { %v4162_v34 = vadd.f32 1.0, %v8606_v7 }
 0xb19   :  { %v8608_v63 = vpop.eup %8607 }
 0xb1a   :  { %8613 = vrcp.f32 %v4162_v34  ;;  %v4163_v8 = vadd.f32 1.0, %v8608_v63  ;;  %v8610_v33 = vpop.eup %8609 }
 0xb1b   :  { %v8612_v31 = vpop.eup %8611  ;;  %v4164_v5 = vadd.f32 1.0, %v8610_v33 }
 0xb1c   :  { %8615 = vrcp.f32 %v4163_v8 }
 0xb1d   :  { %8617 = vrcp.f32 %v4164_v5  ;;  %v11005_v5 = vld [vmem:[#allocation23_spill] sm:$0xff] }
 0xb27   :  { %v8614_v23 = vpop.eup %8613 }
 0xb28   :  { %v4173_v51 = vmul.f32 %v8614_v23, %v8612_v31 }
 0xb29   :  { %v8616_v43 = vpop.eup %8615 }
 0xb2a   :  { %v4172_v3 = vmul.f32 %v8616_v43, %v9984_v46  ;;  %v8618_v58 = vpop.eup %8617  ;;  %v10081_v46 = vld [vmem:[#allocation9 + $0x80] ss:$16 sps:$4 sm:$0xff]  }
 0xb2c   :  { %v10032_v17 = vadd.f32 %v4173_v51, %v4172_v3  ;;  %v3199_v3 = vadd.f32 %v11005_v5, %v9927_v59 }
 0xb2e   :  { %8619 = vtanh.f32 %v10032_v17 }
 0xb3b   :  { %v8620_v47 = vpop.eup %8619 }
 0xb3c   :  { %v10035_v2 = vmul.f32 %v8620_v47, %v8618_v58  ;;  %v11006_v47 = vld [vmem:[#allocation25_spill] sm:$0xff] }
 0xb3e   :  { %v4182_v4 = vpack.c.bf16 %v10035_v2, %v10035_v2 }
 0xb40   :  { %4408 = vmatmul.mubr.bf16.vlgmr.msra.gmra.mxu0 %v4182_v4  ;;  %4449 = vmatmul.mubr.bf16.vlgmr.msra.gmra.mxu1 %v4182_v4  ;;  %v3201_v4 = vadd.f32 %v11006_v47, %v9931_v22 }
 0xb41   :  { %4715 = vmatprep.mubr.bf16.mxu0 %v10955_v60  ;;  %4756 = vmatprep.mubr.bf16.mxu1 %v10955_v60 }
 0xb42   :  { %4684 = vmatpush1.bf16.msra.mxu0 %v10045_v52  ;;  %4725 = vmatpush1.bf16.msra.mxu1 %v10047_v10 }
 0xb43   :  { %4685 = vmatprep.subr.bf16.mxu0 %v10053_v50  ;;  %4726 = vmatprep.subr.bf16.mxu1 %v10055_v15 }
 0xb46   :  { %4686 = vmatpush1.bf16.msra.mxu0 %v10057_v12  ;;  %4727 = vmatpush1.bf16.msra.mxu1 %v10059_v57 }
 0xb47   :  { %4687 = vmatprep.subr.bf16.mxu0 %v10065_v44  ;;  %4728 = vmatprep.subr.bf16.mxu1 %v10067_v20 }
 0xb4a   :  { %4688 = vmatpush1.bf16.msra.mxu0 %v10069_v62  ;;  %4729 = vmatpush1.bf16.msra.mxu1 %v10071_v0 }
 0xb4b   :  { %4689 = vmatprep.subr.bf16.mxu0 %v10077_v16  ;;  %4730 = vmatprep.subr.bf16.mxu1 %v10079_v45 }
 0xb4e   :  { %4690 = vmatpush1.bf16.msra.mxu0 %v10081_v46  ;;  %4731 = vmatpush1.bf16.msra.mxu1 %v10083_v21 }
 0xb4f   :  { %4691 = vmatprep.subr.bf16.mxu0 %v10087_v49  ;;  %4732 = vmatprep.subr.bf16.mxu1 %v10089_v42 }
 0xb52   :  { %4692 = vmatpush1.bf16.msra.mxu0 %v10093_v19  ;;  %4733 = vmatpush1.bf16.msra.mxu1 %v10095_v53 }
 0xb53   :  { %4693 = vmatprep.subr.bf16.mxu0 %v10099_v61  ;;  %4734 = vmatprep.subr.bf16.mxu1 %v10101_v54 }
 0xb56   :  { %4694 = vmatpush1.bf16.msra.mxu0 %v10105_v24  ;;  %4735 = vmatpush1.bf16.msra.mxu1 %v10107_v25 }
 0xb57   :  { %4695 = vmatprep.subr.bf16.mxu0 %v10111_v1  ;;  %4736 = vmatprep.subr.bf16.mxu1 %v10113_v26 }
 0xb5a   :  { %4696 = vmatpush1.bf16.msra.mxu0 %v10117_v27  ;;  %4737 = vmatpush1.bf16.msra.mxu1 %v10119_v28 }
 0xb5b   :  { %4697 = vmatprep.subr.bf16.mxu0 %v10123_v29  ;;  %4738 = vmatprep.subr.bf16.mxu1 %v10125_v30 }
 0xb5e   :  { %4698 = vmatpush1.bf16.msra.mxu0 %v10129_v32  ;;  %4739 = vmatpush1.bf16.msra.mxu1 %v10131_v35 }
 0xb5f   :  { %4991 = vmatprep.subr.bf16.mxu0 %v10041_v41  ;;  %5032 = vmatprep.subr.bf16.mxu1 %v10043_v6 }
 0xc00   :  { %v4409_v38 = vpop.f32.mrf.mxu0  ;;  %v4450_v39 = vpop.f32.mrf.mxu1 }
 0xc01   :  { %v4457_v11 = vadd.f32 %v4409_v38, %v3126_v37  ;;  %v4459_v58 = vadd.f32 %v4450_v39, %v3199_v3 }
 0xc02   :  { %v4411_v7 = vpop.f32.mrf.mxu0  ;;  %v4452_v34 = vpop.f32.mrf.mxu1 }
 0xc03   :  { %v7815_v63 = vmul.f32 -1.442695, %v4457_v11  ;;  %v4458_v8 = vadd.f32 %v4411_v7, %v3128_v56  ;;  %v7817_v36 = vmul.f32 -1.442695, %v4459_v58  ;;  %v4460_v37 = vadd.f32 %v4452_v34, %v3201_v4 }
 0xc04   :  { %v4413_v33 = vpop.f32.mrf.mxu0  ;;  %v4454_v31 = vpop.f32.mrf.mxu1 }
 0xc05   :  { %8621 = vpow2.f32 %v7815_v63  ;;  %v7816_v23 = vmul.f32 -1.442695, %v4458_v8 }
 0xc06   :  { %v4414_v51 = vpop.f32.mrf.mxu0  ;;  %v4455_v43 = vpop.f32.mrf.mxu1 }
 0xc07   :  { %8623 = vpow2.f32 %v7816_v23 }
 0xc08   :  { %8625 = vpow2.f32 %v7817_v36  ;;  %v11008_v36 = vld [vmem:[#allocation29_spill] sm:$0xff] }
 0xc09   :  { %8627 = vtanh.f32 %v4460_v37  ;;  %v3134_v37 = vadd.f32 %v11008_v36, %v9918_v9 }
 0xc12   :  { %v8622_v38 = vpop.eup %8621 }
 0xc13   :  { %v4470_v55 = vadd.f32 1.0, %v8622_v38 }
 0xc14   :  { %v8624_v56 = vpop.eup %8623 }
 0xc15   :  { %8629 = vrcp.f32 %v4470_v55  ;;  %v4471_v11 = vadd.f32 1.0, %v8624_v56  ;;  %v8626_v7 = vpop.eup %8625 }
 0xc16   :  { %v8628_v63 = vpop.eup %8627  ;;  %v4472_v23 = vadd.f32 1.0, %v8626_v7 }
 0xc17   :  { %8631 = vrcp.f32 %v4471_v11 }
 0xc18   :  { %8633 = vrcp.f32 %v4472_v23 }
 0xc22   :  { %v8630_v8 = vpop.eup %8629 }
 0xc23   :  { %v4481_v33 = vmul.f32 %v8630_v8, %v8628_v63 }
 0xc24   :  { %v8632_v31 = vpop.eup %8631 }
 0xc25   :  { %v4480_v39 = vmul.f32 %v8632_v31, %v10032_v17  ;;  %v8634_v34 = vpop.eup %8633  ;;  %v11007_v17 = vld [vmem:[#allocation26_spill] sm:$0xff] }
 0xc26   :  { %v3132_v58 = vadd.f32 %v11007_v17, %v9911_v48 }
 0xc27   :  { %v10148_v51 = vadd.f32 %v4481_v33, %v4480_v39  ;;  %v11009_v39 = vld [vmem:[#allocation28_spill] sm:$0xff] }
 0xc29   :  { %8635 = vtanh.f32 %v10148_v51 }
 0xc36   :  { %v8636_v43 = vpop.eup %8635 }
 0xc37   :  { %v10151_v5 = vmul.f32 %v8636_v43, %v8634_v34  ;;  %v3205_v34 = vadd.f32 %v11009_v39, %v9927_v59 }
 0xc39   :  { %v4490_v3 = vpack.c.bf16 %v10151_v5, %v10151_v5 }
 0xc3b   :  { %4716 = vmatmul.mubr.bf16.vlgmr.msra.gmra.mxu0 %v4490_v3  ;;  %4757 = vmatmul.mubr.bf16.vlgmr.msra.gmra.mxu1 %v4490_v3  ;;  %v11010_v3 = vld [vmem:[#allocation27_spill] sm:$0xff] }
 0xc3c   :  { %4992 = vmatpush1.bf16.msra.mxu0 %v10045_v52  ;;  %5033 = vmatpush1.bf16.msra.mxu1 %v10047_v10  ;;  %v3207_v17 = vadd.f32 %v11010_v3, %v9931_v22 }
 0xc3d   :  { %4993 = vmatprep.subr.bf16.mxu0 %v10053_v50  ;;  %5034 = vmatprep.subr.bf16.mxu1 %v10055_v15 }
 0xc3e   :  { %5023 = vmatprep.mubr.bf16.mxu0 %v10955_v60  ;;  %5064 = vmatprep.mubr.bf16.mxu1 %v10955_v60 }
 0xc40   :  { %4994 = vmatpush1.bf16.msra.mxu0 %v10057_v12  ;;  %5035 = vmatpush1.bf16.msra.mxu1 %v10059_v57 }
 0xc41   :  { %4995 = vmatprep.subr.bf16.mxu0 %v10065_v44  ;;  %5036 = vmatprep.subr.bf16.mxu1 %v10067_v20 }
 0xc44   :  { %4996 = vmatpush1.bf16.msra.mxu0 %v10069_v62  ;;  %5037 = vmatpush1.bf16.msra.mxu1 %v10071_v0 }
 0xc45   :  { %4997 = vmatprep.subr.bf16.mxu0 %v10077_v16  ;;  %5038 = vmatprep.subr.bf16.mxu1 %v10079_v45 }
 0xc48   :  { %4998 = vmatpush1.bf16.msra.mxu0 %v10081_v46  ;;  %5039 = vmatpush1.bf16.msra.mxu1 %v10083_v21 }
 0xc49   :  { %4999 = vmatprep.subr.bf16.mxu0 %v10087_v49  ;;  %5040 = vmatprep.subr.bf16.mxu1 %v10089_v42 }
 0xc4c   :  { %5000 = vmatpush1.bf16.msra.mxu0 %v10093_v19  ;;  %5041 = vmatpush1.bf16.msra.mxu1 %v10095_v53 }
 0xc4d   :  { %5001 = vmatprep.subr.bf16.mxu0 %v10099_v61  ;;  %5042 = vmatprep.subr.bf16.mxu1 %v10101_v54 }
 0xc50   :  { %5002 = vmatpush1.bf16.msra.mxu0 %v10105_v24  ;;  %5043 = vmatpush1.bf16.msra.mxu1 %v10107_v25 }
 0xc51   :  { %5003 = vmatprep.subr.bf16.mxu0 %v10111_v1  ;;  %5044 = vmatprep.subr.bf16.mxu1 %v10113_v26 }
 0xc54   :  { %5004 = vmatpush1.bf16.msra.mxu0 %v10117_v27  ;;  %5045 = vmatpush1.bf16.msra.mxu1 %v10119_v28 }
 0xc55   :  { %5005 = vmatprep.subr.bf16.mxu0 %v10123_v29  ;;  %5046 = vmatprep.subr.bf16.mxu1 %v10125_v30 }
 0xc58   :  { %5006 = vmatpush1.bf16.msra.mxu0 %v10129_v32  ;;  %5047 = vmatpush1.bf16.msra.mxu1 %v10131_v35 }
 0xc59   :  { %5299 = vmatprep.subr.bf16.mxu0 %v10041_v41  ;;  %5340 = vmatprep.subr.bf16.mxu1 %v10043_v6 }
 0xcfb   :  { %v4717_v47 = vpop.f32.mrf.mxu0  ;;  %v4758_v4 = vpop.f32.mrf.mxu1 }
 0xcfc   :  { %v4765_v38 = vadd.f32 %v4717_v47, %v3132_v58  ;;  %v4767_v43 = vadd.f32 %v4758_v4, %v3205_v34 }
 0xcfd   :  { %v4719_v55 = vpop.f32.mrf.mxu0  ;;  %v4760_v56 = vpop.f32.mrf.mxu1 }
 0xcfe   :  { %v7850_v11 = vmul.f32 -1.442695, %v4765_v38  ;;  %v4766_v7 = vadd.f32 %v4719_v55, %v3134_v37  ;;  %v7852_v36 = vmul.f32 -1.442695, %v4767_v43  ;;  %v4768_v58 = vadd.f32 %v4760_v56, %v3207_v17  ;;  %v11012_v17 = vld [vmem:[#allocation32_spill] sm:$0xff] }
 0xcff   :  { %v4721_v63 = vpop.f32.mrf.mxu0  ;;  %v4762_v8 = vpop.f32.mrf.mxu1 }
 0xd00   :  { %8637 = vpow2.f32 %v7850_v11  ;;  %v7851_v33 = vmul.f32 -1.442695, %v4766_v7 }
 0xd01   :  { %v4722_v31 = vpop.f32.mrf.mxu0  ;;  %v4763_v23 = vpop.f32.mrf.mxu1 }
 0xd02   :  { %8639 = vpow2.f32 %v7851_v33 }
 0xd03   :  { %8641 = vpow2.f32 %v7852_v36  ;;  %v3138_v36 = vadd.f32 %v11012_v17, %v9918_v9 }
 0xd04   :  { %8643 = vtanh.f32 %v4768_v58 }
 0xd0d   :  { %v8638_v47 = vpop.eup %8637 }
 0xd0e   :  { %v4778_v40 = vadd.f32 1.0, %v8638_v47 }
 0xd0f   :  { %v8640_v37 = vpop.eup %8639 }
 0xd10   :  { %8645 = vrcp.f32 %v4778_v40  ;;  %v4779_v38 = vadd.f32 1.0, %v8640_v37  ;;  %v8642_v55 = vpop.eup %8641 }
 0xd11   :  { %v8644_v11 = vpop.eup %8643  ;;  %v4780_v33 = vadd.f32 1.0, %v8642_v55 }
 0xd12   :  { %8647 = vrcp.f32 %v4779_v38 }
 0xd13   :  { %8649 = vrcp.f32 %v4780_v33 }
 0xd1d   :  { %v8646_v7 = vpop.eup %8645 }
 0xd1e   :  { %v4789_v63 = vmul.f32 %v8646_v7, %v8644_v11 }
 0xd1f   :  { %v8648_v8 = vpop.eup %8647 }
 0xd20   :  { %v4788_v4 = vmul.f32 %v8648_v8, %v10148_v51  ;;  %v8650_v56 = vpop.eup %8649  ;;  %v11011_v51 = vld [vmem:[#allocation30_spill] sm:$0xff] }
 0xd21   :  { %v3136_v34 = vadd.f32 %v11011_v51, %v9911_v48 }
 0xd22   :  { %v10198_v31 = vadd.f32 %v4789_v63, %v4788_v4 }
 0xd24   :  { %8651 = vtanh.f32 %v10198_v31 }
 0xd31   :  { %v8652_v23 = vpop.eup %8651 }
 0xd32   :  { %v10201_v39 = vmul.f32 %v8652_v23, %v8650_v56  ;;  %v11014_v56 = vld [vmem:[#allocation33_spill] sm:$0xff] }
 0xd33   :  { %v3211_v23 = vadd.f32 %v11014_v56, %v9931_v22 }
 0xd34   :  { %v4798_v40 = vpack.c.bf16 %v10201_v39, %v10201_v39 }
 0xd36   :  { %5024 = vmatmul.mubr.bf16.vlgmr.msra.gmra.mxu0 %v4798_v40  ;;  %5065 = vmatmul.mubr.bf16.vlgmr.msra.gmra.mxu1 %v4798_v40 }
 0xd37   :  { %5300 = vmatpush1.bf16.msra.mxu0 %v10045_v52  ;;  %5341 = vmatpush1.bf16.msra.mxu1 %v10047_v10 }
 0xd38   :  { %5301 = vmatprep.subr.bf16.mxu0 %v10053_v50  ;;  %5342 = vmatprep.subr.bf16.mxu1 %v10055_v15 }
 0xd39   :  { %5331 = vmatprep.mubr.bf16.mxu0 %v10955_v60  ;;  %5372 = vmatprep.mubr.bf16.mxu1 %v10955_v60 }
 0xd3b   :  { %5302 = vmatpush1.bf16.msra.mxu0 %v10057_v12  ;;  %5343 = vmatpush1.bf16.msra.mxu1 %v10059_v57 }
 0xd3c   :  { %5303 = vmatprep.subr.bf16.mxu0 %v10065_v44  ;;  %5344 = vmatprep.subr.bf16.mxu1 %v10067_v20 }
 0xd3f   :  { %5304 = vmatpush1.bf16.msra.mxu0 %v10069_v62  ;;  %5345 = vmatpush1.bf16.msra.mxu1 %v10071_v0 }
 0xd40   :  { %5305 = vmatprep.subr.bf16.mxu0 %v10077_v16  ;;  %5346 = vmatprep.subr.bf16.mxu1 %v10079_v45 }
 0xd43   :  { %5306 = vmatpush1.bf16.msra.mxu0 %v10081_v46  ;;  %5347 = vmatpush1.bf16.msra.mxu1 %v10083_v21 }
 0xd44   :  { %5307 = vmatprep.subr.bf16.mxu0 %v10087_v49  ;;  %5348 = vmatprep.subr.bf16.mxu1 %v10089_v42 }
 0xd47   :  { %5308 = vmatpush1.bf16.msra.mxu0 %v10093_v19  ;;  %5349 = vmatpush1.bf16.msra.mxu1 %v10095_v53 }
 0xd48   :  { %5309 = vmatprep.subr.bf16.mxu0 %v10099_v61  ;;  %5350 = vmatprep.subr.bf16.mxu1 %v10101_v54 }
 0xd4b   :  { %5310 = vmatpush1.bf16.msra.mxu0 %v10105_v24  ;;  %5351 = vmatpush1.bf16.msra.mxu1 %v10107_v25 }
 0xd4c   :  { %5311 = vmatprep.subr.bf16.mxu0 %v10111_v1  ;;  %5352 = vmatprep.subr.bf16.mxu1 %v10113_v26 }
 0xd4f   :  { %5312 = vmatpush1.bf16.msra.mxu0 %v10117_v27  ;;  %5353 = vmatpush1.bf16.msra.mxu1 %v10119_v28 }
 0xd50   :  { %5313 = vmatprep.subr.bf16.mxu0 %v10123_v29  ;;  %5354 = vmatprep.subr.bf16.mxu1 %v10125_v30 }
 0xd53   :  { %5314 = vmatpush1.bf16.msra.mxu0 %v10129_v32  ;;  %5355 = vmatpush1.bf16.msra.mxu1 %v10131_v35 }
 0xd54   :  { %5607 = vmatprep.subr.bf16.mxu0 %v10041_v41  ;;  %5648 = vmatprep.subr.bf16.mxu1 %v10043_v6  ;;  %v11013_v6 = vld [vmem:[#allocation31_spill] sm:$0xff] }
 0xd55   :  { %v3209_v33 = vadd.f32 %v11013_v6, %v9927_v59 }
 0xdf6   :  { %v5025_v43 = vpop.f32.mrf.mxu0  ;;  %v5066_v3 = vpop.f32.mrf.mxu1 }
 0xdf7   :  { %v5073_v58 = vadd.f32 %v5025_v43, %v3136_v34  ;;  %v5075_v4 = vadd.f32 %v5066_v3, %v3209_v33 }
 0xdf8   :  { %v5027_v47 = vpop.f32.mrf.mxu0  ;;  %v5068_v37 = vpop.f32.mrf.mxu1 }
 0xdf9   :  { %v7885_v38 = vmul.f32 -1.442695, %v5073_v58  ;;  %v5074_v55 = vadd.f32 %v5027_v47, %v3138_v36  ;;  %v7887_v40 = vmul.f32 -1.442695, %v5075_v4  ;;  %v5076_v34 = vadd.f32 %v5068_v37, %v3211_v23 }
 0xdfa   :  { %v5029_v11 = vpop.f32.mrf.mxu0  ;;  %v5070_v7 = vpop.f32.mrf.mxu1 }
 0xdfb   :  { %8653 = vpow2.f32 %v7885_v38  ;;  %v7886_v63 = vmul.f32 -1.442695, %v5074_v55 }
 0xdfc   :  { %v5030_v41 = vpop.f32.mrf.mxu0  ;;  %v5071_v8 = vpop.f32.mrf.mxu1 }
 0xdfd   :  { %8655 = vpow2.f32 %v7886_v63 }
 0xdfe   :  { %8657 = vpow2.f32 %v7887_v40 }
 0xe08   :  { %v8654_v51 = vpop.eup %8653 }
 0xe09   :  { %v5086_v43 = vadd.f32 1.0, %v8654_v51 }
 0xe0a   :  { %v8656_v17 = vpop.eup %8655 }
 0xe0b   :  { %8659 = vrcp.f32 %v5086_v43  ;;  %v5087_v36 = vadd.f32 1.0, %v8656_v17  ;;  %v8658_v58 = vpop.eup %8657 }
 0xe0c   :  { %8661 = vtanh.f32 %v5076_v34  ;;  %v5088_v11 = vadd.f32 1.0, %v8658_v58  ;;  %v8344_v58 = vld [vmem:[#allocation10 + $0xe8] ss:$16 sps:$4 sm:$0xff]  }
 0xe0d   :  { %8663 = vrcp.f32 %v5087_v36  ;;  %v8341_v36 = vld [vmem:[#allocation10 + $0xe0] ss:$16 sps:$4 sm:$0xff]  }
 0xe0e   :  { %8665 = vrcp.f32 %v5088_v11  ;;  %v8347_v11 = vld [vmem:[#allocation10 + $0xc0] ss:$16 sps:$4 sm:$0xff]  }
 0xe18   :  { %v8660_v47 = vpop.eup %8659 }
 0xe19   :  { %v8662_v38 = vpop.eup %8661 }
 0xe1a   :  { %v8664_v55 = vpop.eup %8663  ;;  %v5097_v7 = vmul.f32 %v8662_v38, %v8660_v47  ;;  %v8349_v38 = vld [vmem:[#allocation10 + $0xc4] ss:$16 sps:$4 sm:$0xff]  }
 0xe1b   :  { %v5096_v3 = vmul.f32 %v8664_v55, %v10198_v31  ;;  %v8666_v37 = vpop.eup %8665  ;;  %v8352_v55 = vld [vmem:[#allocation10 + $0xcc] ss:$16 sps:$4 sm:$0xff]  }
 0xe1d   :  { %v10248_v63 = vadd.f32 %v5097_v7, %v5096_v3  ;;  %v8350_v3 = vld [vmem:[#allocation10 + $0xc8] ss:$16 sps:$4 sm:$0xff]   ;;  %v8355_v7 = vld [vmem:[#allocation10 + $0xa4] ss:$16 sps:$4 sm:$0xff]  }
 0xe1f   :  { %8667 = vtanh.f32 %v10248_v63 }
 0xe2c   :  { %v8668_v41 = vpop.eup %8667 }
 0xe2d   :  { %v10251_v8 = vmul.f32 %v8668_v41, %v8666_v37  ;;  %v8353_v37 = vld [vmem:[#allocation10 + $0xa0] ss:$16 sps:$4 sm:$0xff]   ;;  %v8356_v41 = vld [vmem:[#allocation10 + $0xa8] ss:$16 sps:$4 sm:$0xff]  }
 0xe2f   :  { %v5106_v6 = vpack.c.bf16 %v10251_v8, %v10251_v8 }
 0xe31   :  { %5332 = vmatmul.mubr.bf16.vlgmr.msra.gmra.mxu0 %v5106_v6  ;;  %5373 = vmatmul.mubr.bf16.vlgmr.msra.gmra.mxu1 %v5106_v6  ;;  %v8361_v6 = vld [vmem:[#allocation10 + $0x84] ss:$16 sps:$4 sm:$0xff]  }
 0xe32   :  { %5608 = vmatpush1.bf16.msra.mxu0 %v10045_v52  ;;  %5649 = vmatpush1.bf16.msra.mxu1 %v10047_v10  ;;  %v8343_v52 = vld [vmem:[#allocation10 + $0xe4] ss:$16 sps:$4 sm:$0xff]   ;;  %v8346_v10 = vld [vmem:[#allocation10 + $0xec] ss:$16 sps:$4 sm:$0xff]  }
 0xe33   :  { %5609 = vmatprep.subr.bf16.mxu0 %v10053_v50  ;;  %5650 = vmatprep.subr.bf16.mxu1 %v10055_v15  ;;  %v11015_v50 = vld [vmem:[#allocation34_spill] sm:$0xff] }
 0xe34   :  { %5639 = vmatprep.mubr.bf16.mxu0 %v10955_v60  ;;  %5680 = vmatprep.mubr.bf16.mxu1 %v10955_v60  ;;  %v3142_v15 = vadd.f32 %v11015_v50, %v9911_v48  ;;  %v8362_v50 = vld [vmem:[#allocation10 + $0x88] ss:$16 sps:$4 sm:$0xff]  }
 0xe36   :  { %5610 = vmatpush1.bf16.msra.mxu0 %v10057_v12  ;;  %5651 = vmatpush1.bf16.msra.mxu1 %v10059_v57 }
 0xe37   :  { %5611 = vmatprep.subr.bf16.mxu0 %v10065_v44  ;;  %5652 = vmatprep.subr.bf16.mxu1 %v10067_v20  ;;  %v11016_v44 = vld [vmem:[#allocation37_spill] sm:$0xff] }
 0xe38   :  { %v3144_v20 = vadd.f32 %v11016_v44, %v9918_v9  ;;  %v8368_v44 = vld [vmem:[#allocation10 + $0x68] ss:$16 sps:$4 sm:$0xff]  }
 0xe3a   :  { %5612 = vmatpush1.bf16.msra.mxu0 %v10069_v62  ;;  %5653 = vmatpush1.bf16.msra.mxu1 %v10071_v0 }
 0xe3b   :  { %5613 = vmatprep.subr.bf16.mxu0 %v10077_v16  ;;  %5654 = vmatprep.subr.bf16.mxu1 %v10079_v45 }
 0xe3e   :  { %5614 = vmatpush1.bf16.msra.mxu0 %v10081_v46  ;;  %5655 = vmatpush1.bf16.msra.mxu1 %v10083_v21 }
 0xe3f   :  { %5615 = vmatprep.subr.bf16.mxu0 %v10087_v49  ;;  %5656 = vmatprep.subr.bf16.mxu1 %v10089_v42 }
 0xe42   :  { %5616 = vmatpush1.bf16.msra.mxu0 %v10093_v19  ;;  %5657 = vmatpush1.bf16.msra.mxu1 %v10095_v53 }
 0xe43   :  { %5617 = vmatprep.subr.bf16.mxu0 %v10099_v61  ;;  %5658 = vmatprep.subr.bf16.mxu1 %v10101_v54  ;;  %v11017_v61 = vld [vmem:[#allocation36_spill] sm:$0xff] }
 0xe44   :  { %v3215_v54 = vadd.f32 %v11017_v61, %v9927_v59  ;;  %v8386_v61 = vld [vmem:[#allocation10 + $0x8] ss:$16 sps:$4 sm:$0xff]  }
 0xe46   :  { %5618 = vmatpush1.bf16.msra.mxu0 %v10105_v24  ;;  %5659 = vmatpush1.bf16.msra.mxu1 %v10107_v25  ;;  %v11018_v25 = vld [vmem:[#allocation35_spill] sm:$0xff] }
 0xe47   :  { %5619 = vmatprep.subr.bf16.mxu0 %v10111_v1  ;;  %5660 = vmatprep.subr.bf16.mxu1 %v10113_v26  ;;  %v3217_v1 = vadd.f32 %v11018_v25, %v9931_v22  ;;  %v5728_v25 = vpack.c.bf16 %v10251_v8, %v10201_v39  ;;  %v10329_v39 = vld [vmem:[#allocation12 + $0xc4] ss:$16 sps:$4 sm:$0xff]   ;;  %v10331_v8 = vld [vmem:[#allocation12 + $0xcc] ss:$16 sps:$4 sm:$0xff]  }
 0xe4a   :  { %5620 = vmatpush1.bf16.msra.mxu0 %v10117_v27  ;;  %5661 = vmatpush1.bf16.msra.mxu1 %v10119_v28 }
 0xe4b   :  { %5621 = vmatprep.subr.bf16.mxu0 %v10123_v29  ;;  %5662 = vmatprep.subr.bf16.mxu1 %v10125_v30 }
 0xe4e   :  { %5622 = vmatpush1.bf16.msra.mxu0 %v10129_v32  ;;  %5663 = vmatpush1.bf16.msra.mxu1 %v10131_v35 }
 0xe4f   :  { %5944 = vmatprep.subr.bf16.mxu0 %v8343_v52  ;;  %6017 = vmatprep.subr.bf16.mxu1 %v8346_v10  ;;  %v8364_v52 = vld [vmem:[#allocation10 + $0x8c] ss:$16 sps:$4 sm:$0xff]   ;;  %v8359_v10 = vld [vmem:[#allocation10 + $0x80] ss:$16 sps:$4 sm:$0xff]  }
 0xef1   :  { %v5333_v12 = vpop.f32.mrf.mxu0  ;;  %v5374_v57 = vpop.f32.mrf.mxu1 }
 0xef2   :  { %v5381_v62 = vadd.f32 %v5333_v12, %v3142_v15  ;;  %v5383_v24 = vadd.f32 %v5374_v57, %v3215_v54  ;;  %v8367_v15 = vld [vmem:[#allocation10 + $0x64] ss:$16 sps:$4 sm:$0xff]   ;;  %v8370_v12 = vld [vmem:[#allocation10 + $0x6c] ss:$16 sps:$4 sm:$0xff]   ;;  %v8365_v57 = vld [vmem:[#allocation10 + $0x60] ss:$16 sps:$4 sm:$0xff]   ;;  %v5726_v54 = vpack.c.bf16 %v9987_v18, %v9937_v14 }
 0xef3   :  { %v5335_v0 = vpop.f32.mrf.mxu0  ;;  %v5376_v16 = vpop.f32.mrf.mxu1  ;;  %v10317_v14 = vld [vmem:[#allocation12 + $0xe4] ss:$16 sps:$4 sm:$0xff]   ;;  %v10319_v18 = vld [vmem:[#allocation12 + $0xec] ss:$16 sps:$4 sm:$0xff]  }
 0xef4   :  { %v7920_v45 = vmul.f32 -1.442695, %v5381_v62  ;;  %v5382_v46 = vadd.f32 %v5335_v0, %v3144_v20  ;;  %v7922_v26 = vmul.f32 -1.442695, %v5383_v24  ;;  %v5384_v27 = vadd.f32 %v5376_v16, %v3217_v1  ;;  %v8373_v20 = vld [vmem:[#allocation10 + $0x44] ss:$16 sps:$4 sm:$0xff]  }
 0xef5   :  { %v5337_v21 = vpop.f32.mrf.mxu0  ;;  %v5378_v49 = vpop.f32.mrf.mxu1  ;;  %v8376_v62 = vld [vmem:[#allocation10 + $0x4c] ss:$16 sps:$4 sm:$0xff]   ;;  %v8371_v0 = vld [vmem:[#allocation10 + $0x40] ss:$16 sps:$4 sm:$0xff]   ;;  %v8374_v16 = vld [vmem:[#allocation10 + $0x48] ss:$16 sps:$4 sm:$0xff]   ;;  %v5727_v24 = vpack.c.bf16 %v10151_v5, %v10035_v2 }
 0xef6   :  { %8669 = vpow2.f32 %v7920_v45  ;;  %v7921_v42 = vmul.f32 -1.442695, %v5382_v46  ;;  %v8379_v45 = vld [vmem:[#allocation10 + $0x24] ss:$16 sps:$4 sm:$0xff]   ;;  %v8382_v46 = vld [vmem:[#allocation10 + $0x2c] ss:$16 sps:$4 sm:$0xff]  }
 0xef7   :  { %v5338_v19 = vpop.f32.mrf.mxu0  ;;  %v5379_v53 = vpop.f32.mrf.mxu1  ;;  %v8377_v21 = vld [vmem:[#allocation10 + $0x20] ss:$16 sps:$4 sm:$0xff]   ;;  %v8380_v49 = vld [vmem:[#allocation10 + $0x28] ss:$16 sps:$4 sm:$0xff]  }
 0xef8   :  { %8671 = vpow2.f32 %v7921_v42  ;;  %v8385_v42 = vld [vmem:[#allocation10 + $0x4] ss:$16 sps:$4 sm:$0xff]   ;;  %v8388_v19 = vld [vmem:[#allocation10 + $0xc] ss:$16 sps:$4 sm:$0xff]   ;;  %v8383_v53 = vld [vmem:[#allocation10] ss:$16 sps:$4 sm:$0xff]  }
 0xef9   :  { %8673 = vpow2.f32 %v7922_v26  ;;  %v10321_v2 = vld [vmem:[#allocation12 + $0xe0] ss:$16 sps:$4 sm:$0xff]   ;;  %v10323_v5 = vld [vmem:[#allocation12 + $0xe8] ss:$16 sps:$4 sm:$0xff]  }
 0xefa   :  { %8675 = vtanh.f32 %v5384_v27  ;;  %v10333_v1 = vld [vmem:[#allocation12 + $0xc0] ss:$16 sps:$4 sm:$0xff]   ;;  %v10335_v26 = vld [vmem:[#allocation12 + $0xc8] ss:$16 sps:$4 sm:$0xff]   ;;  %v10341_v27 = vld [vmem:[#allocation12 + $0xa4] ss:$16 sps:$4 sm:$0xff]  }
 0xf03   :  { %v8670_v28 = vpop.eup %8669 }
 0xf04   :  { %v5394_v29 = vadd.f32 1.0, %v8670_v28  ;;  %v10343_v28 = vld [vmem:[#allocation12 + $0xac] ss:$16 sps:$4 sm:$0xff]  }
 0xf05   :  { %v8672_v30 = vpop.eup %8671 }
 0xf06   :  { %8677 = vrcp.f32 %v5394_v29  ;;  %v5395_v32 = vadd.f32 1.0, %v8672_v30  ;;  %v8674_v35 = vpop.eup %8673  ;;  %v10345_v29 = vld [vmem:[#allocation12 + $0xa0] ss:$16 sps:$4 sm:$0xff]   ;;  %v10347_v30 = vld [vmem:[#allocation12 + $0xa8] ss:$16 sps:$4 sm:$0xff]  }
 0xf07   :  { %v8676_v31 = vpop.eup %8675  ;;  %v5396_v23 = vadd.f32 1.0, %v8674_v35  ;;  %v10355_v35 = vld [vmem:[#allocation12 + $0x8c] ss:$16 sps:$4 sm:$0xff]  }
 0xf08   :  { %8679 = vrcp.f32 %v5395_v32  ;;  %v10353_v32 = vld [vmem:[#allocation12 + $0x84] ss:$16 sps:$4 sm:$0xff]  }
 0xf09   :  { %8681 = vrcp.f32 %v5396_v23  ;;  %v10369_v23 = vld [vmem:[#allocation12 + $0x60] ss:$16 sps:$4 sm:$0xff]  }
 0xf13   :  { %v8678_v33 = vpop.eup %8677 }
 0xf14   :  { %v5405_v4 = vmul.f32 %v8678_v33, %v8676_v31  ;;  %v10357_v31 = vld [vmem:[#allocation12 + $0x80] ss:$16 sps:$4 sm:$0xff]   ;;  %v10359_v33 = vld [vmem:[#allocation12 + $0x88] ss:$16 sps:$4 sm:$0xff]  }
 0xf15   :  { %v8680_v56 = vpop.eup %8679 }
 0xf16   :  { %v5404_v40 = vmul.f32 %v8680_v56, %v10248_v63  ;;  %v8682_v34 = vpop.eup %8681  ;;  %v8358_v63 = vld [vmem:[#allocation10 + $0xac] ss:$16 sps:$4 sm:$0xff]  }
 0xf17   :  { %v10367_v56 = vld [vmem:[#allocation12 + $0x6c] ss:$16 sps:$4 sm:$0xff]  }
 0xf18   :  { %v10296_v51 = vadd.f32 %v5405_v4, %v5404_v40  ;;  %v10365_v4 = vld [vmem:[#allocation12 + $0x64] ss:$16 sps:$4 sm:$0xff]   ;;  %v10371_v40 = vld [vmem:[#allocation12 + $0x68] ss:$16 sps:$4 sm:$0xff]  }
 0xf1a   :  { %8683 = vtanh.f32 %v10296_v51 }
 0xf27   :  { %v8684_v43 = vpop.eup %8683 }
 0xf28   :  { %v10299_v17 = vmul.f32 %v8684_v43, %v8682_v34  ;;  %v10377_v34 = vld [vmem:[#allocation12 + $0x44] ss:$16 sps:$4 sm:$0xff]   ;;  %v10379_v43 = vld [vmem:[#allocation12 + $0x4c] ss:$16 sps:$4 sm:$0xff]  }
 0xf2a   :  { %v5414_v47 = vpack.c.bf16 %v10299_v17, %v10299_v17 }
 0xf2c   :  { %5640 = vmatmul.mubr.bf16.vlgmr.msra.gmra.mxu0 %v5414_v47  ;;  %5681 = vmatmul.mubr.bf16.vlgmr.msra.gmra.mxu1 %v5414_v47  ;;  %v10389_v47 = vld [vmem:[#allocation12 + $0x24] ss:$16 sps:$4 sm:$0xff]  }
 0xf2d   :  { %5945 = vmatpush1.bf16.msra.mxu0 %v8341_v36  ;;  %6018 = vmatpush1.bf16.msra.mxu1 %v8344_v58  ;;  %v10381_v36 = vld [vmem:[#allocation12 + $0x40] ss:$16 sps:$4 sm:$0xff]   ;;  %v10383_v58 = vld [vmem:[#allocation12 + $0x48] ss:$16 sps:$4 sm:$0xff]  }
 0xf2e   :  { %5946 = vmatprep.subr.bf16.mxu0 %v8349_v38  ;;  %6019 = vmatprep.subr.bf16.mxu1 %v8352_v55  ;;  %v10391_v38 = vld [vmem:[#allocation12 + $0x2c] ss:$16 sps:$4 sm:$0xff]   ;;  %v10393_v55 = vld [vmem:[#allocation12 + $0x20] ss:$16 sps:$4 sm:$0xff]  }
 0xf2f   :  { %5976 = vmatprep.mubr.bf16.mxu0 %v10955_v60  ;;  %6049 = vmatprep.mubr.bf16.mxu1 %v10955_v60 }
 0xf31   :  { %5947 = vmatpush1.bf16.msra.mxu0 %v8347_v11  ;;  %6020 = vmatpush1.bf16.msra.mxu1 %v8350_v3  ;;  %v10395_v11 = vld [vmem:[#allocation12 + $0x28] ss:$16 sps:$4 sm:$0xff]   ;;  %v10397_v3 = vld [vmem:[#allocation12 + $0x4] ss:$16 sps:$4 sm:$0xff]  }
 0xf32   :  { %5948 = vmatprep.subr.bf16.mxu0 %v8355_v7  ;;  %6021 = vmatprep.subr.bf16.mxu1 %v8358_v63  ;;  %v10399_v7 = vld [vmem:[#allocation12 + $0xc] ss:$16 sps:$4 sm:$0xff]   ;;  %v10405_v63 = vld [vmem:[#allocation12] ss:$16 sps:$4 sm:$0xff]  }
 0xf35   :  { %5949 = vmatpush1.bf16.msra.mxu0 %v8353_v37  ;;  %6022 = vmatpush1.bf16.msra.mxu1 %v8356_v41  ;;  %v10407_v37 = vld [vmem:[#allocation12 + $0x8] ss:$16 sps:$4 sm:$0xff]   ;;  %v11019_v41 = vld [vmem:[#allocation38_spill] sm:$0xff] }
 0xf36   :  { %5950 = vmatprep.subr.bf16.mxu0 %v8361_v6  ;;  %6023 = vmatprep.subr.bf16.mxu1 %v8364_v52  ;;  %v3146_v6 = vadd.f32 %v11019_v41, %v9911_v48 }
 0xf39   :  { %5951 = vmatpush1.bf16.msra.mxu0 %v8359_v10  ;;  %6024 = vmatpush1.bf16.msra.mxu1 %v8362_v50  ;;  %v11020_v50 = vld [vmem:[#allocation40_spill] sm:$0xff] }
 0xf3a   :  { %5952 = vmatprep.subr.bf16.mxu0 %v8367_v15  ;;  %6025 = vmatprep.subr.bf16.mxu1 %v8370_v12  ;;  %v3148_v15 = vadd.f32 %v11020_v50, %v9918_v9 }
 0xf3d   :  { %5953 = vmatpush1.bf16.msra.mxu0 %v8365_v57  ;;  %6026 = vmatpush1.bf16.msra.mxu1 %v8368_v44 }
 0xf3e   :  { %5954 = vmatprep.subr.bf16.mxu0 %v8373_v20  ;;  %6027 = vmatprep.subr.bf16.mxu1 %v8376_v62 }
 0xf41   :  { %5955 = vmatpush1.bf16.msra.mxu0 %v8371_v0  ;;  %6028 = vmatpush1.bf16.msra.mxu1 %v8374_v16 }
 0xf42   :  { %5956 = vmatprep.subr.bf16.mxu0 %v8379_v45  ;;  %6029 = vmatprep.subr.bf16.mxu1 %v8382_v46 }
 0xf45   :  { %5957 = vmatpush1.bf16.msra.mxu0 %v8377_v21  ;;  %6030 = vmatpush1.bf16.msra.mxu1 %v8380_v49  ;;  %v11021_v49 = vld [vmem:[#allocation39_spill] sm:$0xff] }
 0xf46   :  { %5958 = vmatprep.subr.bf16.mxu0 %v8385_v42  ;;  %6031 = vmatprep.subr.bf16.mxu1 %v8388_v19  ;;  %v3219_v48 = vadd.f32 %v11021_v49, %v9927_v59  ;;  %v11022_v19 = vld [vmem:[#allocation41_spill] sm:$0xff] }
 0xf49   :  { %5959 = vmatpush1.bf16.msra.mxu0 %v8383_v53  ;;  %6032 = vmatpush1.bf16.msra.mxu1 %v8386_v61  ;;  %v3221_v53 = vadd.f32 %v11022_v19, %v9931_v22 }
 0xf4a   :  { %6318 = vmatprep.subr.bf16.mxu0 %v10317_v14  ;;  %6359 = vmatprep.subr.bf16.mxu1 %v10319_v18 }
 0xf4c   :  { %5977 = vmatmul.mubr.bf16.vlgmr.msra.gmra.mxu0 %v5726_v54  ;;  %6050 = vmatmul.mubr.bf16.vlgmr.msra.gmra.mxu1 %v5726_v54 }
 0xf4d   :  { %5986 = vmatprep.mubr.bf16.mxu0 %v10955_v60  ;;  %6059 = vmatprep.mubr.bf16.mxu1 %v10955_v60 }
 0xf4e   :  { %6319 = vmatpush1.bf16.msra.mxu0 %v10321_v2  ;;  %6360 = vmatpush1.bf16.msra.mxu1 %v10323_v5 }
 0xf4f   :  { %6320 = vmatprep.subr.bf16.mxu0 %v10329_v39  ;;  %6361 = vmatprep.subr.bf16.mxu1 %v10331_v8 }
 0xf52   :  { %6321 = vmatpush1.bf16.msra.mxu0 %v10333_v1  ;;  %6362 = vmatpush1.bf16.msra.mxu1 %v10335_v26 }
 0xf53   :  { %6322 = vmatprep.subr.bf16.mxu0 %v10341_v27  ;;  %6363 = vmatprep.subr.bf16.mxu1 %v10343_v28 }
 0xf54   :  { %5987 = vmatmul.mubr.bf16.gmra.mxu0 %v5727_v24  ;;  %6060 = vmatmul.mubr.bf16.gmra.mxu1 %v5727_v24 }
 0xf55   :  { %5996 = vmatprep.mubr.bf16.mxu0 %v10955_v60  ;;  %6069 = vmatprep.mubr.bf16.mxu1 %v10955_v60 }
 0xf56   :  { %6323 = vmatpush1.bf16.msra.mxu0 %v10345_v29  ;;  %6364 = vmatpush1.bf16.msra.mxu1 %v10347_v30 }
 0xf57   :  { %6324 = vmatprep.subr.bf16.mxu0 %v10353_v32  ;;  %6365 = vmatprep.subr.bf16.mxu1 %v10355_v35 }
 0xf5a   :  { %6325 = vmatpush1.bf16.msra.mxu0 %v10357_v31  ;;  %6366 = vmatpush1.bf16.msra.mxu1 %v10359_v33 }
 0xf5b   :  { %6326 = vmatprep.subr.bf16.mxu0 %v10365_v4  ;;  %6367 = vmatprep.subr.bf16.mxu1 %v10367_v56 }
 0xf5c   :  { %5997 = vmatmul.mubr.bf16.gmra.mxu0 %v5728_v25  ;;  %6070 = vmatmul.mubr.bf16.gmra.mxu1 %v5728_v25 }
 0xf5d   :  { %6006 = vmatprep.mubr.bf16.mxu0 %v10955_v60  ;;  %6079 = vmatprep.mubr.bf16.mxu1 %v10955_v60 }
 0xf5e   :  { %6327 = vmatpush1.bf16.msra.mxu0 %v10369_v23  ;;  %6368 = vmatpush1.bf16.msra.mxu1 %v10371_v40 }
 0xf5f   :  { %6328 = vmatprep.subr.bf16.mxu0 %v10377_v34  ;;  %6369 = vmatprep.subr.bf16.mxu1 %v10379_v43 }
 0xf62   :  { %6329 = vmatpush1.bf16.msra.mxu0 %v10381_v36  ;;  %6370 = vmatpush1.bf16.msra.mxu1 %v10383_v58 }
 0xf63   :  { %6330 = vmatprep.subr.bf16.mxu0 %v10389_v47  ;;  %6371 = vmatprep.subr.bf16.mxu1 %v10391_v38 }
 0xf66   :  { %6331 = vmatpush1.bf16.msra.mxu0 %v10393_v55  ;;  %6372 = vmatpush1.bf16.msra.mxu1 %v10395_v11 }
 0xf67   :  { %6332 = vmatprep.subr.bf16.mxu0 %v10397_v3  ;;  %6373 = vmatprep.subr.bf16.mxu1 %v10399_v7 }
 0xf6a   :  { %6333 = vmatpush1.bf16.msra.mxu0 %v10405_v63  ;;  %6374 = vmatpush1.bf16.msra.mxu1 %v10407_v37 }
 0xf6b   :  { %6433 = vmatprep.subr.bf16.mxu0 %v10317_v14  ;;  %6474 = vmatprep.subr.bf16.mxu1 %v10319_v18 }
 0xfec   :  { %v5641_v52 = vpop.f32.mrf.mxu0  ;;  %v5682_v10 = vpop.f32.mrf.mxu1 }
 0xfed   :  { %v5689_v12 = vadd.f32 %v5641_v52, %v3146_v6  ;;  %v5691_v42 = vadd.f32 %v5682_v10, %v3219_v48 }
 0xfee   :  { %v5643_v57 = vpop.f32.mrf.mxu0  ;;  %v5684_v44 = vpop.f32.mrf.mxu1 }
 0xfef   :  { %v7955_v20 = vmul.f32 -1.442695, %v5689_v12  ;;  %v5690_v62 = vadd.f32 %v5643_v57, %v3148_v15  ;;  %v7957_v9 = vmul.f32 -1.442695, %v5691_v42  ;;  %v5692_v61 = vadd.f32 %v5684_v44, %v3221_v53 }
 0xff0   :  { %v5645_v0 = vpop.f32.mrf.mxu0  ;;  %v5686_v16 = vpop.f32.mrf.mxu1 }
 0xff1   :  { %8685 = vpow2.f32 %v7955_v20  ;;  %v7956_v45 = vmul.f32 -1.442695, %v5690_v62 }
 0xff2   :  { %v5646_v46 = vpop.f32.mrf.mxu0  ;;  %v5687_v21 = vpop.f32.mrf.mxu1 }
 0xff3   :  { %8687 = vpow2.f32 %v7956_v45 }
 0xff4   :  { %8689 = vpow2.f32 %v7957_v9 }
 0xff5   :  { %8691 = vtanh.f32 %v5692_v61 }
 0xffe   :  { %v8686_v54 = vpop.eup %8685 }
 0xfff   :  { %v5702_v24 = vadd.f32 1.0, %v8686_v54 }
0x1000   :  { %v8688_v25 = vpop.eup %8687 }
0x1001   :  { %8693 = vrcp.f32 %v5702_v24  ;;  %v5703_v41 = vadd.f32 1.0, %v8688_v25  ;;  %v8690_v6 = vpop.eup %8689 }
0x1002   :  { %v8692_v52 = vpop.eup %8691  ;;  %v5704_v59 = vadd.f32 1.0, %v8690_v6 }
0x1003   :  { %8695 = vrcp.f32 %v5703_v41 }
0x1004   :  { %8697 = vrcp.f32 %v5704_v59 }
0x100e   :  { %v8694_v50 = vpop.eup %8693 }
0x100f   :  { %v5713_v15 = vmul.f32 %v8694_v50, %v8692_v52 }
0x1010   :  { %v8696_v12 = vpop.eup %8695 }
0x1011   :  { %v5712_v10 = vmul.f32 %v8696_v12, %v10296_v51  ;;  %v8698_v22 = vpop.eup %8697  ;;  %v5978_v51 = vpop.f32.mrf.mxu0 }
0x1013   :  { %v5714_v57 = vadd.f32 %v5713_v15, %v5712_v10  ;;  %v5980_v0 = vpop.f32.mrf.mxu0  ;;  %v5762_v10 = vld [vmem:[%s10918_s9] sm:$0xf] }
0x1015   :  { %8699 = vtanh.f32 %v5714_v57  ;;  %v10463_v45 = vpop.f32.mrf.mxu0 }
0x1017   :  { %v10467_v21 = vpop.f32.mrf.mxu0 }
0x1019   :  { %v10471_v48 = vpop.f32.mrf.mxu0 }
0x101b   :  { %v10475_v19 = vpop.f32.mrf.mxu0 }
0x101d   :  { %v10479_v9 = vpop.f32.mrf.mxu0 }
0x101e   :  { %11025 = vst [vmem:[#allocation20_spill] sm:$0xff] %v10479_v9  ;;  %v10531_v9 = vrot.slane %v5762_v10, %v10999_v13 }
0x101f   :  { %v10483_v54 = vpop.f32.mrf.mxu0 }
0x1020   :  { %11027 = vst [vmem:[#allocation24_spill] sm:$0xff] %v10483_v54 }
0x1021   :  { %v10487_v25 = vpop.f32.mrf.mxu0 }
0x1022   :  { %v8700_v44 = vpop.eup %8699  ;;  %11029 = vst [vmem:[#allocation25_spill] sm:$0xff] %v10487_v25 }
0x1023   :  { %v5716_v20 = vmul.f32 %v8700_v44, %v8698_v22  ;;  %v10491_v6 = vpop.f32.mrf.mxu0 }
0x1024   :  { %11031 = vst [vmem:[#allocation29_spill] sm:$0xff] %v10491_v6 }
0x1025   :  { %v5729_v62 = vpack.c.bf16 %v5716_v20, %v10299_v17  ;;  %v6051_v17 = vpop.f32.mrf.mxu1  ;;  %v10495_v50 = vpop.f32.mrf.mxu0 }
0x1026   :  { %11033 = vst [vmem:[#allocation27_spill] sm:$0xff] %v10495_v50 }
0x1027   :  { %6007 = vmatmul.mubr.bf16.gmra.mxu0 %v5729_v62  ;;  %6080 = vmatmul.mubr.bf16.gmra.mxu1 %v5729_v62  ;;  %v6053_v16 = vpop.f32.mrf.mxu1  ;;  %v10499_v12 = vpop.f32.mrf.mxu0  ;;  %v11041_v62 = vld [vmem:[#allocation16_spill] sm:$0xff] }
0x1028   :  { %6350 = vmatprep.mubr.bf16.mxu0 %v10955_v60  ;;  %6391 = vmatprep.mubr.bf16.mxu1 %v10955_v60  ;;  %11035 = vst [vmem:[#allocation32_spill] sm:$0xff] %v10499_v12  ;;  %v10515_v50 = vrot.slane %v5762_v10, %v11041_v62 }
0x1029   :  { %v10465_v46 = vpop.f32.mrf.mxu1 }
0x102b   :  { %v10469_v49 = vpop.f32.mrf.mxu1 }
0x102d   :  { %v10473_v42 = vpop.f32.mrf.mxu1 }
0x102e   :  { %11023 = vst [vmem:[#allocation17_spill] sm:$0xff] %v10473_v42 }
0x102f   :  { %6351 = vmatmul.mubr.bf16.vlgmr.msra.gmra.mxu0 %v10955_v60  ;;  %6392 = vmatmul.mubr.bf16.vlgmr.msra.gmra.mxu1 %v10955_v60  ;;  %v10477_v53 = vpop.f32.mrf.mxu1 }
0x1030   :  { %6434 = vmatpush1.bf16.msra.mxu0 %v10321_v2  ;;  %6475 = vmatpush1.bf16.msra.mxu1 %v10323_v5  ;;  %11024 = vst [vmem:[#allocation21_spill] sm:$0xff] %v10477_v53  ;;  %v11047_v53 = vld [vmem:[#allocation19_spill] sm:$0xff] }
0x1031   :  { %6435 = vmatprep.subr.bf16.mxu0 %v10329_v39  ;;  %6476 = vmatprep.subr.bf16.mxu1 %v10331_v8  ;;  %v10481_v61 = vpop.f32.mrf.mxu1  ;;  %v10535_v42 = vrot.slane %v5762_v10, %v11047_v53 }
0x1032   :  { %6465 = vmatprep.mubr.bf16.mxu0 %v10955_v60  ;;  %6506 = vmatprep.mubr.bf16.mxu1 %v10955_v60  ;;  %11026 = vst [vmem:[#allocation22_spill] sm:$0xff] %v10481_v61 }
0x1033   :  { %v10485_v24 = vpop.f32.mrf.mxu1 }
0x1034   :  { %6436 = vmatpush1.bf16.msra.mxu0 %v10333_v1  ;;  %6477 = vmatpush1.bf16.msra.mxu1 %v10335_v26  ;;  %11028 = vst [vmem:[#allocation23_spill] sm:$0xff] %v10485_v24 }
0x1035   :  { %6437 = vmatprep.subr.bf16.mxu0 %v10341_v27  ;;  %6478 = vmatprep.subr.bf16.mxu1 %v10343_v28  ;;  %v10489_v41 = vpop.f32.mrf.mxu1 }
0x1036   :  { %11030 = vst [vmem:[#allocation26_spill] sm:$0xff] %v10489_v41 }
0x1037   :  { %v10493_v52 = vpop.f32.mrf.mxu1 }
0x1038   :  { %6438 = vmatpush1.bf16.msra.mxu0 %v10345_v29  ;;  %6479 = vmatpush1.bf16.msra.mxu1 %v10347_v30  ;;  %11032 = vst [vmem:[#allocation28_spill] sm:$0xff] %v10493_v52 }
0x1039   :  { %6439 = vmatprep.subr.bf16.mxu0 %v10353_v32  ;;  %6480 = vmatprep.subr.bf16.mxu1 %v10355_v35  ;;  %v10497_v15 = vpop.f32.mrf.mxu1 }
0x103a   :  { %11034 = vst [vmem:[#allocation30_spill] sm:$0xff] %v10497_v15 }
0x103b   :  { %v10501_v59 = vpop.f32.mrf.mxu1 }
0x103c   :  { %6440 = vmatpush1.bf16.msra.mxu0 %v10357_v31  ;;  %6481 = vmatpush1.bf16.msra.mxu1 %v10359_v33  ;;  %11036 = vst [vmem:[#allocation31_spill] sm:$0xff] %v10501_v59  ;;  %v11044_v59 = vld [vmem:[#allocation18_spill] sm:$0xff] }
0x103d   :  { %6441 = vmatprep.subr.bf16.mxu0 %v10365_v4  ;;  %6482 = vmatprep.subr.bf16.mxu1 %v10367_v56  ;;  %v10522_v52 = vrot.slane %v5762_v10, %v11044_v59 }
0x1040   :  { %6442 = vmatpush1.bf16.msra.mxu0 %v10369_v23  ;;  %6483 = vmatpush1.bf16.msra.mxu1 %v10371_v40 }
0x1041   :  { %6443 = vmatprep.subr.bf16.mxu0 %v10377_v34  ;;  %6484 = vmatprep.subr.bf16.mxu1 %v10379_v43 }
0x1044   :  { %6444 = vmatpush1.bf16.msra.mxu0 %v10381_v36  ;;  %6485 = vmatpush1.bf16.msra.mxu1 %v10383_v58 }
0x1045   :  { %6445 = vmatprep.subr.bf16.mxu0 %v10389_v47  ;;  %6486 = vmatprep.subr.bf16.mxu1 %v10391_v38 }
0x1048   :  { %6446 = vmatpush1.bf16.msra.mxu0 %v10393_v55  ;;  %6487 = vmatpush1.bf16.msra.mxu1 %v10395_v11 }
0x1049   :  { %6447 = vmatprep.subr.bf16.mxu0 %v10397_v3  ;;  %6488 = vmatprep.subr.bf16.mxu1 %v10399_v7 }
0x104c   :  { %6448 = vmatpush1.bf16.msra.mxu0 %v10405_v63  ;;  %6489 = vmatpush1.bf16.msra.mxu1 %v10407_v37 }
0x104d   :  { %6548 = vmatprep.subr.bf16.mxu0 %v10317_v14  ;;  %6589 = vmatprep.subr.bf16.mxu1 %v10319_v18 }
0x10e7   :  { %v10506_v57 = vpop.f32.mrf.mxu0  ;;  %v10508_v22 = vpop.f32.mrf.mxu1 }
0x10e8   :  { %11037 = vst [vmem:[#allocation33_spill] sm:$0xff] %v10506_v57  ;;  %11038 = vst [vmem:[#allocation34_spill] sm:$0xff] %v10508_v22  ;;  %v5979_v22 = vadd.f32 %v5978_v51, %v10515_v50  ;;  %v6052_v51 = vadd.f32 %v6051_v17, %v10531_v9 }
0x10e9   :  { %v10510_v44 = vpop.f32.mrf.mxu0  ;;  %v10512_v20 = vpop.f32.mrf.mxu1 }
0x10ea   :  { %11039 = vst [vmem:[#allocation37_spill] sm:$0xff] %v10510_v44  ;;  %11040 = vst [vmem:[#allocation36_spill] sm:$0xff] %v10512_v20  ;;  %v5981_v20 = vadd.f32 %v5980_v0, %v10522_v52 }
0x10eb   :  { %v10517_v15 = vpop.f32.mrf.mxu0  ;;  %v10519_v12 = vpop.f32.mrf.mxu1 }
0x10ec   :  { %11042 = vst [vmem:[#allocation35_spill] sm:$0xff] %v10517_v15  ;;  %11043 = vst [vmem:[#allocation38_spill] sm:$0xff] %v10519_v12 }
0x10ed   :  { %v10524_v41 = vpop.f32.mrf.mxu0  ;;  %v10526_v6 = vpop.f32.mrf.mxu1 }
0x10ee   :  { %11045 = vst [vmem:[#allocation40_spill] sm:$0xff] %v10524_v41  ;;  %11046 = vst [vmem:[#allocation39_spill] sm:$0xff] %v10526_v6 }
0x10ef   :  { %v6352_v57 = vpop.f32.mrf.mxu0  ;;  %v6393_v44 = vpop.f32.mrf.mxu1 }
0x10f0   :  { %v6400_v25 = vadd.f32 %v6352_v57, %v5979_v22  ;;  %v6402_v0 = vadd.f32 %v6393_v44, %v6052_v51  ;;  %v6054_v57 = vadd.f32 %v6053_v16, %v10535_v42  ;;  %v5983_v51 = vadd.f32 %v10463_v45, %v10515_v50 }
0x10f1   :  { %v6354_v62 = vpop.f32.mrf.mxu0  ;;  %v6395_v24 = vpop.f32.mrf.mxu1  ;;  %v6056_v45 = vadd.f32 %v10465_v46, %v10531_v9 }
0x10f2   :  { %v8022_v61 = vmul.f32 -1.442695, %v6400_v25  ;;  %v6401_v15 = vadd.f32 %v6354_v62, %v5981_v20  ;;  %v8024_v25 = vmul.f32 -1.442695, %v6402_v0 }
0x10f3   :  { %v6356_v54 = vpop.f32.mrf.mxu0  ;;  %v6397_v12 = vpop.f32.mrf.mxu1 }
0x10f4   :  { %8701 = vpow2.f32 %v8022_v61  ;;  %v8023_v59 = vmul.f32 -1.442695, %v6401_v15  ;;  %v6403_v54 = vadd.f32 %v6395_v24, %v6054_v57 }
0x10f5   :  { %v6357_v41 = vpop.f32.mrf.mxu0  ;;  %v6398_v6 = vpop.f32.mrf.mxu1 }
0x10f6   :  { %8703 = vpow2.f32 %v8023_v59 }
0x10f7   :  { %8705 = vpow2.f32 %v8024_v25  ;;  %v5985_v25 = vadd.f32 %v10467_v21, %v10522_v52 }
0x1101   :  { %v8702_v22 = vpop.eup %8701 }
0x1102   :  { %v6413_v12 = vadd.f32 1.0, %v8702_v22 }
0x1103   :  { %v8704_v61 = vpop.eup %8703 }
0x1104   :  { %8707 = vrcp.f32 %v6413_v12  ;;  %v6414_v13 = vadd.f32 1.0, %v8704_v61  ;;  %v8706_v41 = vpop.eup %8705 }
0x1105   :  { %8709 = vtanh.f32 %v6403_v54  ;;  %v6415_v20 = vadd.f32 1.0, %v8706_v41 }
0x1106   :  { %8711 = vrcp.f32 %v6414_v13 }
0x1107   :  { %8713 = vrcp.f32 %v6415_v20 }
0x1111   :  { %v8708_v6 = vpop.eup %8707 }
0x1112   :  { %v8710_v15 = vpop.eup %8709 }
0x1113   :  { %v8712_v17 = vpop.eup %8711  ;;  %v6424_v10 = vmul.f32 %v8710_v15, %v8708_v6 }
0x1114   :  { %v6423_v53 = vmul.f32 0.0, %v8712_v17  ;;  %v8714_v16 = vpop.eup %8713 }
0x1116   :  { %v10538_v44 = vadd.f32 %v6424_v10, %v6423_v53  ;;  %v6058_v10 = vadd.f32 %v10469_v49, %v10535_v42 }
0x1118   :  { %8715 = vtanh.f32 %v10538_v44 }
0x1125   :  { %v8716_v24 = vpop.eup %8715 }
0x1126   :  { %v6427_v62 = vmul.f32 %v8716_v24, %v8714_v16 }
0x1128   :  { %v6432_v59 = vpack.c.bf16 %v6427_v62, %v6427_v62 }
0x112a   :  { %6466 = vmatmul.mubr.bf16.vlgmr.msra.gmra.mxu0 %v6432_v59  ;;  %6507 = vmatmul.mubr.bf16.vlgmr.msra.gmra.mxu1 %v6432_v59 }
0x112b   :  { %6549 = vmatpush1.bf16.msra.mxu0 %v10321_v2  ;;  %6590 = vmatpush1.bf16.msra.mxu1 %v10323_v5 }
0x112c   :  { %6550 = vmatprep.subr.bf16.mxu0 %v10329_v39  ;;  %6591 = vmatprep.subr.bf16.mxu1 %v10331_v8 }
0x112d   :  { %6580 = vmatprep.mubr.bf16.mxu0 %v10955_v60  ;;  %6621 = vmatprep.mubr.bf16.mxu1 %v10955_v60 }
0x112f   :  { %6551 = vmatpush1.bf16.msra.mxu0 %v10333_v1  ;;  %6592 = vmatpush1.bf16.msra.mxu1 %v10335_v26 }
0x1130   :  { %6552 = vmatprep.subr.bf16.mxu0 %v10341_v27  ;;  %6593 = vmatprep.subr.bf16.mxu1 %v10343_v28 }
0x1133   :  { %6553 = vmatpush1.bf16.msra.mxu0 %v10345_v29  ;;  %6594 = vmatpush1.bf16.msra.mxu1 %v10347_v30 }
0x1134   :  { %6554 = vmatprep.subr.bf16.mxu0 %v10353_v32  ;;  %6595 = vmatprep.subr.bf16.mxu1 %v10355_v35 }
0x1137   :  { %6555 = vmatpush1.bf16.msra.mxu0 %v10357_v31  ;;  %6596 = vmatpush1.bf16.msra.mxu1 %v10359_v33 }
0x1138   :  { %6556 = vmatprep.subr.bf16.mxu0 %v10365_v4  ;;  %6597 = vmatprep.subr.bf16.mxu1 %v10367_v56 }
0x113b   :  { %6557 = vmatpush1.bf16.msra.mxu0 %v10369_v23  ;;  %6598 = vmatpush1.bf16.msra.mxu1 %v10371_v40 }
0x113c   :  { %6558 = vmatprep.subr.bf16.mxu0 %v10377_v34  ;;  %6599 = vmatprep.subr.bf16.mxu1 %v10379_v43 }
0x113f   :  { %6559 = vmatpush1.bf16.msra.mxu0 %v10381_v36  ;;  %6600 = vmatpush1.bf16.msra.mxu1 %v10383_v58 }
0x1140   :  { %6560 = vmatprep.subr.bf16.mxu0 %v10389_v47  ;;  %6601 = vmatprep.subr.bf16.mxu1 %v10391_v38 }
0x1143   :  { %6561 = vmatpush1.bf16.msra.mxu0 %v10393_v55  ;;  %6602 = vmatpush1.bf16.msra.mxu1 %v10395_v11 }
0x1144   :  { %6562 = vmatprep.subr.bf16.mxu0 %v10397_v3  ;;  %6603 = vmatprep.subr.bf16.mxu1 %v10399_v7 }
0x1147   :  { %6563 = vmatpush1.bf16.msra.mxu0 %v10405_v63  ;;  %6604 = vmatpush1.bf16.msra.mxu1 %v10407_v37 }
0x1148   :  { %6663 = vmatprep.subr.bf16.mxu0 %v10317_v14  ;;  %6704 = vmatprep.subr.bf16.mxu1 %v10319_v18 }
0x11ea   :  { %v6467_v0 = vpop.f32.mrf.mxu0  ;;  %v6508_v57 = vpop.f32.mrf.mxu1 }
0x11eb   :  { %v6515_v22 = vadd.f32 %v6467_v0, %v5983_v51  ;;  %v6517_v53 = vadd.f32 %v6508_v57, %v6056_v45 }
0x11ec   :  { %v6469_v54 = vpop.f32.mrf.mxu0  ;;  %v6510_v12 = vpop.f32.mrf.mxu1 }
0x11ed   :  { %v8025_v61 = vmul.f32 -1.442695, %v6515_v22  ;;  %v6516_v13 = vadd.f32 %v6469_v54, %v5985_v25  ;;  %v8027_v21 = vmul.f32 -1.442695, %v6517_v53  ;;  %v6518_v16 = vadd.f32 %v6510_v12, %v6058_v10 }
0x11ee   :  { %v6471_v41 = vpop.f32.mrf.mxu0  ;;  %v6512_v6 = vpop.f32.mrf.mxu1 }
0x11ef   :  { %8717 = vpow2.f32 %v8025_v61  ;;  %v8026_v15 = vmul.f32 -1.442695, %v6516_v13 }
0x11f0   :  { %v6472_v17 = vpop.f32.mrf.mxu0  ;;  %v6513_v20 = vpop.f32.mrf.mxu1 }
0x11f1   :  { %8719 = vpow2.f32 %v8026_v15  ;;  %v5991_v20 = vadd.f32 %v10475_v19, %v10522_v52 }
0x11f2   :  { %8721 = vpow2.f32 %v8027_v21 }
0x11f3   :  { %8723 = vtanh.f32 %v6518_v16 }
0x11fc   :  { %v8718_v24 = vpop.eup %8717 }
0x11fd   :  { %v6528_v62 = vadd.f32 1.0, %v8718_v24 }
0x11fe   :  { %v8720_v59 = vpop.eup %8719 }
0x11ff   :  { %8725 = vrcp.f32 %v6528_v62  ;;  %v6529_v51 = vadd.f32 1.0, %v8720_v59  ;;  %v8722_v0 = vpop.eup %8721 }
0x1200   :  { %v8724_v25 = vpop.eup %8723  ;;  %v6530_v46 = vadd.f32 1.0, %v8722_v0 }
0x1201   :  { %8727 = vrcp.f32 %v6529_v51 }
0x1202   :  { %8729 = vrcp.f32 %v6530_v46 }
0x120c   :  { %v8726_v22 = vpop.eup %8725 }
0x120d   :  { %v6539_v54 = vmul.f32 %v8726_v22, %v8724_v25  ;;  %v11048_v25 = vld [vmem:[#allocation17_spill] sm:$0xff] }
0x120e   :  { %v8728_v61 = vpop.eup %8727 }
0x120f   :  { %v6538_v57 = vmul.f32 %v8728_v61, %v10538_v44  ;;  %v8730_v49 = vpop.eup %8729  ;;  %v5989_v44 = vadd.f32 %v10471_v48, %v10515_v50  ;;  %v6062_v48 = vadd.f32 %v11048_v25, %v10531_v9  ;;  %v11051_v25 = vld [vmem:[#allocation24_spill] sm:$0xff] }
0x1211   :  { %v10584_v13 = vadd.f32 %v6539_v54, %v6538_v57  ;;  %v11049_v54 = vld [vmem:[#allocation21_spill] sm:$0xff] }
0x1212   :  { %v6064_v61 = vadd.f32 %v11049_v54, %v10535_v42 }
0x1213   :  { %8731 = vtanh.f32 %v10584_v13 }
0x1220   :  { %v8732_v12 = vpop.eup %8731 }
0x1221   :  { %v6542_v41 = vmul.f32 %v8732_v12, %v8730_v49 }
0x1223   :  { %v6547_v6 = vpack.c.bf16 %v6542_v41, %v6542_v41 }
0x1225   :  { %6581 = vmatmul.mubr.bf16.vlgmr.msra.gmra.mxu0 %v6547_v6  ;;  %6622 = vmatmul.mubr.bf16.vlgmr.msra.gmra.mxu1 %v6547_v6 }
0x1226   :  { %6664 = vmatpush1.bf16.msra.mxu0 %v10321_v2  ;;  %6705 = vmatpush1.bf16.msra.mxu1 %v10323_v5 }
0x1227   :  { %6665 = vmatprep.subr.bf16.mxu0 %v10329_v39  ;;  %6706 = vmatprep.subr.bf16.mxu1 %v10331_v8 }
0x1228   :  { %6695 = vmatprep.mubr.bf16.mxu0 %v10955_v60  ;;  %6736 = vmatprep.mubr.bf16.mxu1 %v10955_v60 }
0x122a   :  { %6666 = vmatpush1.bf16.msra.mxu0 %v10333_v1  ;;  %6707 = vmatpush1.bf16.msra.mxu1 %v10335_v26 }
0x122b   :  { %6667 = vmatprep.subr.bf16.mxu0 %v10341_v27  ;;  %6708 = vmatprep.subr.bf16.mxu1 %v10343_v28 }
0x122e   :  { %6668 = vmatpush1.bf16.msra.mxu0 %v10345_v29  ;;  %6709 = vmatpush1.bf16.msra.mxu1 %v10347_v30 }
0x122f   :  { %6669 = vmatprep.subr.bf16.mxu0 %v10353_v32  ;;  %6710 = vmatprep.subr.bf16.mxu1 %v10355_v35 }
0x1232   :  { %6670 = vmatpush1.bf16.msra.mxu0 %v10357_v31  ;;  %6711 = vmatpush1.bf16.msra.mxu1 %v10359_v33 }
0x1233   :  { %6671 = vmatprep.subr.bf16.mxu0 %v10365_v4  ;;  %6712 = vmatprep.subr.bf16.mxu1 %v10367_v56 }
0x1236   :  { %6672 = vmatpush1.bf16.msra.mxu0 %v10369_v23  ;;  %6713 = vmatpush1.bf16.msra.mxu1 %v10371_v40 }
0x1237   :  { %6673 = vmatprep.subr.bf16.mxu0 %v10377_v34  ;;  %6714 = vmatprep.subr.bf16.mxu1 %v10379_v43 }
0x123a   :  { %6674 = vmatpush1.bf16.msra.mxu0 %v10381_v36  ;;  %6715 = vmatpush1.bf16.msra.mxu1 %v10383_v58 }
0x123b   :  { %6675 = vmatprep.subr.bf16.mxu0 %v10389_v47  ;;  %6716 = vmatprep.subr.bf16.mxu1 %v10391_v38 }
0x123e   :  { %6676 = vmatpush1.bf16.msra.mxu0 %v10393_v55  ;;  %6717 = vmatpush1.bf16.msra.mxu1 %v10395_v11 }
0x123f   :  { %6677 = vmatprep.subr.bf16.mxu0 %v10397_v3  ;;  %6718 = vmatprep.subr.bf16.mxu1 %v10399_v7 }
0x1242   :  { %6678 = vmatpush1.bf16.msra.mxu0 %v10405_v63  ;;  %6719 = vmatpush1.bf16.msra.mxu1 %v10407_v37 }
0x1243   :  { %6778 = vmatprep.subr.bf16.mxu0 %v10317_v14  ;;  %6819 = vmatprep.subr.bf16.mxu1 %v10319_v18 }
0x12e5   :  { %v6582_v15 = vpop.f32.mrf.mxu0  ;;  %v6623_v17 = vpop.f32.mrf.mxu1 }
0x12e6   :  { %v6630_v45 = vadd.f32 %v6582_v15, %v5989_v44  ;;  %v6632_v22 = vadd.f32 %v6623_v17, %v6062_v48  ;;  %v5995_v48 = vadd.f32 %v11051_v25, %v10522_v52 }
0x12e7   :  { %v6584_v53 = vpop.f32.mrf.mxu0  ;;  %v6625_v10 = vpop.f32.mrf.mxu1 }
0x12e8   :  { %v8028_v21 = vmul.f32 -1.442695, %v6630_v45  ;;  %v6631_v16 = vadd.f32 %v6584_v53, %v5991_v20  ;;  %v8030_v19 = vmul.f32 -1.442695, %v6632_v22  ;;  %v6633_v46 = vadd.f32 %v6625_v10, %v6064_v61 }
0x12e9   :  { %v6586_v24 = vpop.f32.mrf.mxu0  ;;  %v6627_v62 = vpop.f32.mrf.mxu1 }
0x12ea   :  { %8733 = vpow2.f32 %v8028_v21  ;;  %v8029_v59 = vmul.f32 -1.442695, %v6631_v16 }
0x12eb   :  { %v6587_v51 = vpop.f32.mrf.mxu0  ;;  %v6628_v0 = vpop.f32.mrf.mxu1 }
0x12ec   :  { %8735 = vpow2.f32 %v8029_v59 }
0x12ed   :  { %8737 = vpow2.f32 %v8030_v19 }
0x12ee   :  { %8739 = vtanh.f32 %v6633_v46 }
0x12f7   :  { %v8734_v57 = vpop.eup %8733 }
0x12f8   :  { %v6643_v49 = vadd.f32 1.0, %v8734_v57 }
0x12f9   :  { %v8736_v12 = vpop.eup %8735 }
0x12fa   :  { %8741 = vrcp.f32 %v6643_v49  ;;  %v6644_v41 = vadd.f32 1.0, %v8736_v12  ;;  %v8738_v6 = vpop.eup %8737 }
0x12fb   :  { %v8740_v44 = vpop.eup %8739  ;;  %v6645_v53 = vadd.f32 1.0, %v8738_v6 }
0x12fc   :  { %8743 = vrcp.f32 %v6644_v41 }
0x12fd   :  { %8745 = vrcp.f32 %v6645_v53 }
0x1307   :  { %v8742_v15 = vpop.eup %8741 }
0x1308   :  { %v6654_v20 = vmul.f32 %v8742_v15, %v8740_v44  ;;  %v11052_v44 = vld [vmem:[#allocation22_spill] sm:$0xff] }
0x1309   :  { %v8744_v45 = vpop.eup %8743  ;;  %v6066_v15 = vadd.f32 %v11052_v44, %v10531_v9 }
0x130a   :  { %v6653_v17 = vmul.f32 %v8744_v45, %v10584_v13  ;;  %v8746_v10 = vpop.eup %8745  ;;  %v11050_v13 = vld [vmem:[#allocation20_spill] sm:$0xff]  ;;  %v11053_v45 = vld [vmem:[#allocation23_spill] sm:$0xff] }
0x130b   :  { %v5993_v59 = vadd.f32 %v11050_v13, %v10515_v50  ;;  %v6068_v53 = vadd.f32 %v11053_v45, %v10535_v42  ;;  %v10725_v45 = vld [vmem:[#allocation12 + $0xe0] ss:$16 sps:$4 sm:$0xff]  }
0x130c   :  { %v10630_v21 = vadd.f32 %v6654_v20, %v6653_v17 }
0x130e   :  { %8747 = vtanh.f32 %v10630_v21 }
0x131b   :  { %v8748_v16 = vpop.eup %8747 }
0x131c   :  { %v6657_v24 = vmul.f32 %v8748_v16, %v8746_v10 }
0x131e   :  { %v6662_v62 = vpack.c.bf16 %v6657_v24, %v6657_v24 }
0x1320   :  { %6696 = vmatmul.mubr.bf16.vlgmr.msra.gmra.mxu0 %v6662_v62  ;;  %6737 = vmatmul.mubr.bf16.vlgmr.msra.gmra.mxu1 %v6662_v62 }
0x1321   :  { %6779 = vmatpush1.bf16.msra.mxu0 %v10321_v2  ;;  %6820 = vmatpush1.bf16.msra.mxu1 %v10323_v5 }
0x1322   :  { %6780 = vmatprep.subr.bf16.mxu0 %v10329_v39  ;;  %6821 = vmatprep.subr.bf16.mxu1 %v10331_v8 }
0x1323   :  { %6810 = vmatprep.mubr.bf16.mxu0 %v10955_v60  ;;  %6851 = vmatprep.mubr.bf16.mxu1 %v10955_v60 }
0x1325   :  { %6781 = vmatpush1.bf16.msra.mxu0 %v10333_v1  ;;  %6822 = vmatpush1.bf16.msra.mxu1 %v10335_v26 }
0x1326   :  { %6782 = vmatprep.subr.bf16.mxu0 %v10341_v27  ;;  %6823 = vmatprep.subr.bf16.mxu1 %v10343_v28 }
0x1329   :  { %6783 = vmatpush1.bf16.msra.mxu0 %v10345_v29  ;;  %6824 = vmatpush1.bf16.msra.mxu1 %v10347_v30 }
0x132a   :  { %6784 = vmatprep.subr.bf16.mxu0 %v10353_v32  ;;  %6825 = vmatprep.subr.bf16.mxu1 %v10355_v35 }
0x132d   :  { %6785 = vmatpush1.bf16.msra.mxu0 %v10357_v31  ;;  %6826 = vmatpush1.bf16.msra.mxu1 %v10359_v33 }
0x132e   :  { %6786 = vmatprep.subr.bf16.mxu0 %v10365_v4  ;;  %6827 = vmatprep.subr.bf16.mxu1 %v10367_v56 }
0x1331   :  { %6787 = vmatpush1.bf16.msra.mxu0 %v10369_v23  ;;  %6828 = vmatpush1.bf16.msra.mxu1 %v10371_v40 }
0x1332   :  { %6788 = vmatprep.subr.bf16.mxu0 %v10377_v34  ;;  %6829 = vmatprep.subr.bf16.mxu1 %v10379_v43 }
0x1335   :  { %6789 = vmatpush1.bf16.msra.mxu0 %v10381_v36  ;;  %6830 = vmatpush1.bf16.msra.mxu1 %v10383_v58 }
0x1336   :  { %6790 = vmatprep.subr.bf16.mxu0 %v10389_v47  ;;  %6831 = vmatprep.subr.bf16.mxu1 %v10391_v38 }
0x1339   :  { %6791 = vmatpush1.bf16.msra.mxu0 %v10393_v55  ;;  %6832 = vmatpush1.bf16.msra.mxu1 %v10395_v11 }
0x133a   :  { %6792 = vmatprep.subr.bf16.mxu0 %v10397_v3  ;;  %6833 = vmatprep.subr.bf16.mxu1 %v10399_v7 }
0x133d   :  { %6793 = vmatpush1.bf16.msra.mxu0 %v10405_v63  ;;  %6834 = vmatpush1.bf16.msra.mxu1 %v10407_v37 }
0x133e   :  { %6893 = vmatprep.subr.bf16.mxu0 %v10317_v14  ;;  %6934 = vmatprep.subr.bf16.mxu1 %v10319_v18 }
0x13e0   :  { %v6697_v51 = vpop.f32.mrf.mxu0  ;;  %v6738_v0 = vpop.f32.mrf.mxu1 }
0x13e1   :  { %v6745_v22 = vadd.f32 %v6697_v51, %v5993_v59  ;;  %v6747_v20 = vadd.f32 %v6738_v0, %v6066_v15 }
0x13e2   :  { %v6699_v54 = vpop.f32.mrf.mxu0  ;;  %v6740_v61 = vpop.f32.mrf.mxu1 }
0x13e3   :  { %v8031_v19 = vmul.f32 -1.442695, %v6745_v22  ;;  %v6746_v46 = vadd.f32 %v6699_v54, %v5995_v48  ;;  %v8033_v17 = vmul.f32 -1.442695, %v6747_v20  ;;  %v6748_v10 = vadd.f32 %v6740_v61, %v6068_v53  ;;  %v10728_v53 = vld [vmem:[#allocation12 + $0xe8] ss:$16 sps:$4 sm:$0xff]  }
0x13e4   :  { %v6701_v57 = vpop.f32.mrf.mxu0  ;;  %v6742_v49 = vpop.f32.mrf.mxu1 }
0x13e5   :  { %8749 = vpow2.f32 %v8031_v19  ;;  %v8032_v12 = vmul.f32 -1.442695, %v6746_v46 }
0x13e6   :  { %v6702_v41 = vpop.f32.mrf.mxu0  ;;  %v6743_v6 = vpop.f32.mrf.mxu1 }
0x13e7   :  { %8751 = vpow2.f32 %v8032_v12 }
0x13e8   :  { %8753 = vpow2.f32 %v8033_v17  ;;  %v10731_v17 = vld [vmem:[#allocation12 + $0xc4] ss:$16 sps:$4 sm:$0xff]  }
0x13e9   :  { %8755 = vtanh.f32 %v6748_v10  ;;  %v10734_v10 = vld [vmem:[#allocation12 + $0xcc] ss:$16 sps:$4 sm:$0xff]  }
0x13f2   :  { %v8750_v16 = vpop.eup %8749 }
0x13f3   :  { %v6758_v24 = vadd.f32 1.0, %v8750_v16  ;;  %v10739_v16 = vld [vmem:[#allocation12 + $0xc0] ss:$16 sps:$4 sm:$0xff]  }
0x13f4   :  { %v8752_v62 = vpop.eup %8751 }
0x13f5   :  { %8757 = vrcp.f32 %v6758_v24  ;;  %v6759_v13 = vadd.f32 1.0, %v8752_v62  ;;  %v8754_v59 = vpop.eup %8753  ;;  %v10742_v24 = vld [vmem:[#allocation12 + $0xc8] ss:$16 sps:$4 sm:$0xff]   ;;  %v10745_v62 = vld [vmem:[#allocation12 + $0xa4] ss:$16 sps:$4 sm:$0xff]  }
0x13f6   :  { %v8756_v51 = vpop.eup %8755  ;;  %v6760_v54 = vadd.f32 1.0, %v8754_v59  ;;  %v10751_v59 = vld [vmem:[#allocation12 + $0xa0] ss:$16 sps:$4 sm:$0xff]  }
0x13f7   :  { %8759 = vrcp.f32 %v6759_v13  ;;  %v10748_v13 = vld [vmem:[#allocation12 + $0xac] ss:$16 sps:$4 sm:$0xff]  }
0x13f8   :  { %8761 = vrcp.f32 %v6760_v54  ;;  %v10766_v54 = vld [vmem:[#allocation12 + $0x88] ss:$16 sps:$4 sm:$0xff]  }
0x1402   :  { %v8758_v25 = vpop.eup %8757 }
0x1403   :  { %v6769_v48 = vmul.f32 %v8758_v25, %v8756_v51  ;;  %v10754_v51 = vld [vmem:[#allocation12 + $0xa8] ss:$16 sps:$4 sm:$0xff]   ;;  %v10757_v25 = vld [vmem:[#allocation12 + $0x84] ss:$16 sps:$4 sm:$0xff]  }
0x1404   :  { %v8760_v22 = vpop.eup %8759 }
0x1405   :  { %v6768_v0 = vmul.f32 %v8760_v22, %v10630_v21  ;;  %v8762_v61 = vpop.eup %8761  ;;  %v10763_v22 = vld [vmem:[#allocation12 + $0x80] ss:$16 sps:$4 sm:$0xff]  }
0x1407   :  { %v10676_v19 = vadd.f32 %v6769_v48, %v6768_v0  ;;  %v10760_v48 = vld [vmem:[#allocation12 + $0x8c] ss:$16 sps:$4 sm:$0xff]   ;;  %v10769_v0 = vld [vmem:[#allocation12 + $0x64] ss:$16 sps:$4 sm:$0xff]  }
0x1409   :  { %8763 = vtanh.f32 %v10676_v19 }
0x1416   :  { %v8764_v46 = vpop.eup %8763 }
0x1417   :  { %v6772_v57 = vmul.f32 %v8764_v46, %v8762_v61  ;;  %v10775_v61 = vld [vmem:[#allocation12 + $0x60] ss:$16 sps:$4 sm:$0xff]   ;;  %v10778_v46 = vld [vmem:[#allocation12 + $0x68] ss:$16 sps:$4 sm:$0xff]  }
0x1419   :  { %v6777_v49 = vpack.c.bf16 %v6772_v57, %v6772_v57  ;;  %v10781_v57 = vld [vmem:[#allocation12 + $0x44] ss:$16 sps:$4 sm:$0xff]  }
0x141b   :  { %6811 = vmatmul.mubr.bf16.vlgmr.msra.gmra.mxu0 %v6777_v49  ;;  %6852 = vmatmul.mubr.bf16.vlgmr.msra.gmra.mxu1 %v6777_v49  ;;  %v10784_v49 = vld [vmem:[#allocation12 + $0x4c] ss:$16 sps:$4 sm:$0xff]  }
0x141c   :  { %6894 = vmatpush1.bf16.msra.mxu0 %v10321_v2  ;;  %6935 = vmatpush1.bf16.msra.mxu1 %v10323_v5  ;;  %v11054_v2 = vld [vmem:[#allocation25_spill] sm:$0xff] }
0x141d   :  { %6895 = vmatprep.subr.bf16.mxu0 %v10329_v39  ;;  %6936 = vmatprep.subr.bf16.mxu1 %v10331_v8  ;;  %v5999_v5 = vadd.f32 %v11054_v2, %v10515_v50  ;;  %v10787_v2 = vld [vmem:[#allocation12 + $0x40] ss:$16 sps:$4 sm:$0xff]  }
0x141e   :  { %6925 = vmatprep.mubr.bf16.mxu0 %v10955_v60  ;;  %6966 = vmatprep.mubr.bf16.mxu1 %v10955_v60 }
0x1420   :  { %6896 = vmatpush1.bf16.msra.mxu0 %v10333_v1  ;;  %6937 = vmatpush1.bf16.msra.mxu1 %v10335_v26  ;;  %v11055_v1 = vld [vmem:[#allocation29_spill] sm:$0xff] }
0x1421   :  { %6897 = vmatprep.subr.bf16.mxu0 %v10341_v27  ;;  %6938 = vmatprep.subr.bf16.mxu1 %v10343_v28  ;;  %v6001_v26 = vadd.f32 %v11055_v1, %v10522_v52  ;;  %v10799_v1 = vld [vmem:[#allocation12 + $0x20] ss:$16 sps:$4 sm:$0xff]  }
0x1424   :  { %6898 = vmatpush1.bf16.msra.mxu0 %v10345_v29  ;;  %6939 = vmatpush1.bf16.msra.mxu1 %v10347_v30 }
0x1425   :  { %6899 = vmatprep.subr.bf16.mxu0 %v10353_v32  ;;  %6940 = vmatprep.subr.bf16.mxu1 %v10355_v35 }
0x1428   :  { %6900 = vmatpush1.bf16.msra.mxu0 %v10357_v31  ;;  %6941 = vmatpush1.bf16.msra.mxu1 %v10359_v33 }
0x1429   :  { %6901 = vmatprep.subr.bf16.mxu0 %v10365_v4  ;;  %6942 = vmatprep.subr.bf16.mxu1 %v10367_v56 }
0x142c   :  { %6902 = vmatpush1.bf16.msra.mxu0 %v10369_v23  ;;  %6943 = vmatpush1.bf16.msra.mxu1 %v10371_v40  ;;  %v11057_v40 = vld [vmem:[#allocation28_spill] sm:$0xff] }
0x142d   :  { %6903 = vmatprep.subr.bf16.mxu0 %v10377_v34  ;;  %6944 = vmatprep.subr.bf16.mxu1 %v10379_v43  ;;  %v6074_v34 = vadd.f32 %v11057_v40, %v10535_v42 }
0x1430   :  { %6904 = vmatpush1.bf16.msra.mxu0 %v10381_v36  ;;  %6945 = vmatpush1.bf16.msra.mxu1 %v10383_v58 }
0x1431   :  { %6905 = vmatprep.subr.bf16.mxu0 %v10389_v47  ;;  %6946 = vmatprep.subr.bf16.mxu1 %v10391_v38 }
0x1434   :  { %6906 = vmatpush1.bf16.msra.mxu0 %v10393_v55  ;;  %6947 = vmatpush1.bf16.msra.mxu1 %v10395_v11 }
0x1435   :  { %6907 = vmatprep.subr.bf16.mxu0 %v10397_v3  ;;  %6948 = vmatprep.subr.bf16.mxu1 %v10399_v7 }
0x1438   :  { %6908 = vmatpush1.bf16.msra.mxu0 %v10405_v63  ;;  %6949 = vmatpush1.bf16.msra.mxu1 %v10407_v37 }
0x1439   :  { %7008 = vmatprep.subr.bf16.mxu0 %v10317_v14  ;;  %7049 = vmatprep.subr.bf16.mxu1 %v10319_v18  ;;  %v11056_v18 = vld [vmem:[#allocation26_spill] sm:$0xff] }
0x143a   :  { %v6072_v56 = vadd.f32 %v11056_v18, %v10531_v9  ;;  %v11059_v18 = vld [vmem:[#allocation32_spill] sm:$0xff] }
0x14db   :  { %v6812_v39 = vpop.f32.mrf.mxu0  ;;  %v6853_v8 = vpop.f32.mrf.mxu1 }
0x14dc   :  { %v6860_v27 = vadd.f32 %v6812_v39, %v5999_v5  ;;  %v6862_v23 = vadd.f32 %v6853_v8, %v6072_v56  ;;  %v10790_v5 = vld [vmem:[#allocation12 + $0x48] ss:$16 sps:$4 sm:$0xff]   ;;  %v10793_v39 = vld [vmem:[#allocation12 + $0x24] ss:$16 sps:$4 sm:$0xff]   ;;  %v10796_v8 = vld [vmem:[#allocation12 + $0x2c] ss:$16 sps:$4 sm:$0xff]   ;;  %v6005_v56 = vadd.f32 %v11059_v18, %v10522_v52 }
0x14dd   :  { %v6814_v28 = vpop.f32.mrf.mxu0  ;;  %v6855_v29 = vpop.f32.mrf.mxu1 }
0x14de   :  { %v8034_v30 = vmul.f32 -1.442695, %v6860_v27  ;;  %v6861_v32 = vadd.f32 %v6814_v28, %v6001_v26  ;;  %v8036_v43 = vmul.f32 -1.442695, %v6862_v23  ;;  %v6863_v36 = vadd.f32 %v6855_v29, %v6074_v34  ;;  %v10802_v26 = vld [vmem:[#allocation12 + $0x28] ss:$16 sps:$4 sm:$0xff]  }
0x14df   :  { %v6816_v35 = vpop.f32.mrf.mxu0  ;;  %v6857_v31 = vpop.f32.mrf.mxu1  ;;  %v10805_v27 = vld [vmem:[#allocation12 + $0x4] ss:$16 sps:$4 sm:$0xff]   ;;  %v10808_v28 = vld [vmem:[#allocation12 + $0xc] ss:$16 sps:$4 sm:$0xff]   ;;  %v10811_v29 = vld [vmem:[#allocation12] ss:$16 sps:$4 sm:$0xff]  }
0x14e0   :  { %8765 = vpow2.f32 %v8034_v30  ;;  %v8035_v33 = vmul.f32 -1.442695, %v6861_v32  ;;  %v10814_v30 = vld [vmem:[#allocation12 + $0x8] ss:$16 sps:$4 sm:$0xff]   ;;  %v8869_v32 = vld [vmem:[#allocation12 + $0xe4] ss:$16 sps:$4 sm:$0xff]  }
0x14e1   :  { %v6817_v14 = vpop.f32.mrf.mxu0  ;;  %v6858_v4 = vpop.f32.mrf.mxu1  ;;  %v8870_v35 = vld [vmem:[#allocation12 + $0xec] ss:$16 sps:$4 sm:$0xff]  }
0x14e2   :  { %8767 = vpow2.f32 %v8035_v33  ;;  %v11058_v31 = vld [vmem:[#allocation27_spill] sm:$0xff] }
0x14e3   :  { %8769 = vpow2.f32 %v8036_v43  ;;  %v6003_v33 = vadd.f32 %v11058_v31, %v10515_v50 }
0x14e4   :  { %8771 = vtanh.f32 %v6863_v36 }
0x14ed   :  { %v8766_v58 = vpop.eup %8765 }
0x14ee   :  { %v6873_v47 = vadd.f32 1.0, %v8766_v58 }
0x14ef   :  { %v8768_v38 = vpop.eup %8767 }
0x14f0   :  { %8773 = vrcp.f32 %v6873_v47  ;;  %v6874_v55 = vadd.f32 1.0, %v8768_v38  ;;  %v8770_v11 = vpop.eup %8769 }
0x14f1   :  { %v8772_v3 = vpop.eup %8771  ;;  %v6875_v21 = vadd.f32 1.0, %v8770_v11 }
0x14f2   :  { %8775 = vrcp.f32 %v6874_v55 }
0x14f3   :  { %8777 = vrcp.f32 %v6875_v21 }
0x14fd   :  { %v8774_v7 = vpop.eup %8773 }
0x14fe   :  { %v6884_v63 = vmul.f32 %v8774_v7, %v8772_v3  ;;  %v11060_v3 = vld [vmem:[#allocation30_spill] sm:$0xff] }
0x14ff   :  { %v8776_v37 = vpop.eup %8775  ;;  %v6076_v7 = vadd.f32 %v11060_v3, %v10531_v9 }
0x1500   :  { %v6883_v12 = vmul.f32 %v8776_v37, %v10676_v19  ;;  %v8778_v6 = vpop.eup %8777  ;;  %v10772_v19 = vld [vmem:[#allocation12 + $0x6c] ss:$16 sps:$4 sm:$0xff]  }
0x1501   :  { %v11061_v37 = vld [vmem:[#allocation31_spill] sm:$0xff] }
0x1502   :  { %v10722_v41 = vadd.f32 %v6884_v63, %v6883_v12  ;;  %v6078_v21 = vadd.f32 %v11061_v37, %v10535_v42  ;;  %v8987_v37 = vmov 0.0  }
0x1504   :  { %8779 = vtanh.f32 %v10722_v41 }
0x1511   :  { %v8780_v44 = vpop.eup %8779 }
0x1512   :  { %v6887_v15 = vmul.f32 %v8780_v44, %v8778_v6 }
0x1514   :  { %v6892_v20 = vpack.c.bf16 %v6887_v15, %v6887_v15 }
0x1516   :  { %6926 = vmatmul.mubr.bf16.vlgmr.msra.gmra.mxu0 %v6892_v20  ;;  %6967 = vmatmul.mubr.bf16.vlgmr.msra.gmra.mxu1 %v6892_v20 }
0x1517   :  { %7009 = vmatpush1.bf16.msra.mxu0 %v10725_v45  ;;  %7050 = vmatpush1.bf16.msra.mxu1 %v10728_v53 }
0x1518   :  { %7010 = vmatprep.subr.bf16.mxu0 %v10731_v17  ;;  %7051 = vmatprep.subr.bf16.mxu1 %v10734_v10 }
0x1519   :  { %7040 = vmatprep.mubr.bf16.mxu0 %v10955_v60  ;;  %7081 = vmatprep.mubr.bf16.mxu1 %v10955_v60 }
0x151b   :  { %7011 = vmatpush1.bf16.msra.mxu0 %v10739_v16  ;;  %7052 = vmatpush1.bf16.msra.mxu1 %v10742_v24 }
0x151c   :  { %7012 = vmatprep.subr.bf16.mxu0 %v10745_v62  ;;  %7053 = vmatprep.subr.bf16.mxu1 %v10748_v13 }
0x151f   :  { %7013 = vmatpush1.bf16.msra.mxu0 %v10751_v59  ;;  %7054 = vmatpush1.bf16.msra.mxu1 %v10754_v51 }
0x1520   :  { %7014 = vmatprep.subr.bf16.mxu0 %v10757_v25  ;;  %7055 = vmatprep.subr.bf16.mxu1 %v10760_v48 }
0x1523   :  { %7015 = vmatpush1.bf16.msra.mxu0 %v10763_v22  ;;  %7056 = vmatpush1.bf16.msra.mxu1 %v10766_v54 }
0x1524   :  { %7016 = vmatprep.subr.bf16.mxu0 %v10769_v0  ;;  %7057 = vmatprep.subr.bf16.mxu1 %v10772_v19 }
0x1527   :  { %7017 = vmatpush1.bf16.msra.mxu0 %v10775_v61  ;;  %7058 = vmatpush1.bf16.msra.mxu1 %v10778_v46 }
0x1528   :  { %7018 = vmatprep.subr.bf16.mxu0 %v10781_v57  ;;  %7059 = vmatprep.subr.bf16.mxu1 %v10784_v49 }
0x152b   :  { %7019 = vmatpush1.bf16.msra.mxu0 %v10787_v2  ;;  %7060 = vmatpush1.bf16.msra.mxu1 %v10790_v5 }
0x152c   :  { %7020 = vmatprep.subr.bf16.mxu0 %v10793_v39  ;;  %7061 = vmatprep.subr.bf16.mxu1 %v10796_v8 }
0x152f   :  { %7021 = vmatpush1.bf16.msra.mxu0 %v10799_v1  ;;  %7062 = vmatpush1.bf16.msra.mxu1 %v10802_v26 }
0x1530   :  { %7022 = vmatprep.subr.bf16.mxu0 %v10805_v27  ;;  %7063 = vmatprep.subr.bf16.mxu1 %v10808_v28 }
0x1533   :  { %7023 = vmatpush1.bf16.msra.mxu0 %v10811_v29  ;;  %7064 = vmatpush1.bf16.msra.mxu1 %v10814_v30 }
0x1534   :  { %7123 = vmatprep.subr.bf16.mxu0 %v8869_v32  ;;  %7164 = vmatprep.subr.bf16.mxu1 %v8870_v35 }
0x15d6   :  { %v6927_v14 = vpop.f32.mrf.mxu0  ;;  %v6968_v4 = vpop.f32.mrf.mxu1 }
0x15d7   :  { %v6975_v23 = vadd.f32 %v6927_v14, %v6003_v33  ;;  %v6977_v63 = vadd.f32 %v6968_v4, %v6076_v7 }
0x15d8   :  { %v6929_v40 = vpop.f32.mrf.mxu0  ;;  %v6970_v34 = vpop.f32.mrf.mxu1 }
0x15d9   :  { %v8037_v43 = vmul.f32 -1.442695, %v6975_v23  ;;  %v6976_v36 = vadd.f32 %v6929_v40, %v6005_v56  ;;  %v8039_v12 = vmul.f32 -1.442695, %v6977_v63  ;;  %v6978_v44 = vadd.f32 %v6970_v34, %v6078_v21  ;;  %v8437_v63 = vld [vmem:[%s10919_s10 + $0x38] sm:$0xff]   ;;  %v8438_v21 = vld [vmem:[%s10919_s10 + $0x30] sm:$0xff]  }
0x15da   :  { %v6931_v58 = vpop.f32.mrf.mxu0  ;;  %v6972_v47 = vpop.f32.mrf.mxu1 }
0x15db   :  { %8781 = vpow2.f32 %v8037_v43  ;;  %v8038_v38 = vmul.f32 -1.442695, %v6976_v36 }
0x15dc   :  { %v6932_v55 = vpop.f32.mrf.mxu0  ;;  %v6973_v11 = vpop.f32.mrf.mxu1 }
0x15dd   :  { %8783 = vpow2.f32 %v8038_v38 }
0x15de   :  { %8785 = vpow2.f32 %v8039_v12  ;;  %v8439_v12 = vld [vmem:[%s10919_s10 + $0x28] sm:$0xff]  }
0x15e8   :  { %v8782_v6 = vpop.eup %8781 }
0x15e9   :  { %v6988_v15 = vadd.f32 1.0, %v8782_v6  ;;  %v8440_v6 = vld [vmem:[%s10919_s10 + $0x20] sm:$0xff]  }
0x15ea   :  { %v8784_v20 = vpop.eup %8783 }
0x15eb   :  { %8787 = vrcp.f32 %v6988_v15  ;;  %v6989_v32 = vadd.f32 1.0, %v8784_v20  ;;  %v8786_v35 = vpop.eup %8785  ;;  %v8442_v15 = vld [vmem:[%s10919_s10 + $0x10] sm:$0xff]   ;;  %v8443_v20 = vld [vmem:[%s10919_s10 + $0x8] sm:$0xff]  }
0x15ec   :  { %8789 = vtanh.f32 %v6978_v44  ;;  %v6990_v18 = vadd.f32 1.0, %v8786_v35  ;;  %v8441_v44 = vld [vmem:[%s10919_s10 + $0x18] sm:$0xff]  }
0x15ed   :  { %8791 = vrcp.f32 %v6989_v32  ;;  %v8444_v32 = vld [vmem:[%s10919_s10] sm:$0xff]  }
0x15ee   :  { %8793 = vrcp.f32 %v6990_v18  ;;  %v11066_v35 = vld [vmem:[#allocation35_spill] sm:$0xff]  ;;  %v11067_v18 = vld [vmem:[#allocation40_spill] sm:$0xff] }
0x15f8   :  { %v8788_v31 = vpop.eup %8787 }
0x15f9   :  { %v8790_v33 = vpop.eup %8789 }
0x15fa   :  { %v8792_v14 = vpop.eup %8791  ;;  %v6999_v56 = vmul.f32 %v8790_v33, %v8788_v31  ;;  %v6013_v31 = vadd.f32 %v11066_v35, %v10515_v50 }
0x15fb   :  { %v6998_v4 = vmul.f32 %v8792_v14, %v10722_v41  ;;  %v8794_v40 = vpop.eup %8793 }
0x15fd   :  { %v10826_v23 = vadd.f32 %v6999_v56, %v6998_v4  ;;  %v6015_v4 = vadd.f32 %v11067_v18, %v10522_v52 }
0x15ff   :  { %8795 = vtanh.f32 %v10826_v23 }
0x160c   :  { %v8796_v34 = vpop.eup %8795 }
0x160d   :  { %v7002_v43 = vmul.f32 %v8796_v34, %v8794_v40 }
0x160f   :  { %v7007_v36 = vpack.c.bf16 %v7002_v43, %v7002_v43 }
0x1611   :  { %7041 = vmatmul.mubr.bf16.vlgmr.msra.gmra.mxu0 %v7007_v36  ;;  %7082 = vmatmul.mubr.bf16.vlgmr.msra.gmra.mxu1 %v7007_v36 }
0x1612   :  { %7124 = vmatpush1.bf16.msra.mxu0 %v10725_v45  ;;  %7165 = vmatpush1.bf16.msra.mxu1 %v10728_v53 }
0x1613   :  { %7125 = vmatprep.subr.bf16.mxu0 %v10731_v17  ;;  %7166 = vmatprep.subr.bf16.mxu1 %v10734_v10  ;;  %v11063_v17 = vld [vmem:[#allocation37_spill] sm:$0xff] }
0x1614   :  { %7155 = vmatprep.mubr.bf16.mxu0 %v10955_v60  ;;  %7196 = vmatprep.mubr.bf16.mxu1 %v10955_v60  ;;  %v11062_v60 = vld [vmem:[#allocation33_spill] sm:$0xff]  ;;  %v6011_v10 = vadd.f32 %v11063_v17, %v10522_v52  ;;  %v11068_v17 = vld [vmem:[#allocation38_spill] sm:$0xff] }
0x1615   :  { %v6009_v41 = vadd.f32 %v11062_v60, %v10515_v50  ;;  %v6086_v50 = vadd.f32 %v11068_v17, %v10531_v9 }
0x1616   :  { %7126 = vmatpush1.bf16.msra.mxu0 %v10739_v16  ;;  %7167 = vmatpush1.bf16.msra.mxu1 %v10742_v24 }
0x1617   :  { %7127 = vmatprep.subr.bf16.mxu0 %v10745_v62  ;;  %7168 = vmatprep.subr.bf16.mxu1 %v10748_v13 }
0x161a   :  { %7128 = vmatpush1.bf16.msra.mxu0 %v10751_v59  ;;  %7169 = vmatpush1.bf16.msra.mxu1 %v10754_v51 }
0x161b   :  { %7129 = vmatprep.subr.bf16.mxu0 %v10757_v25  ;;  %7170 = vmatprep.subr.bf16.mxu1 %v10760_v48 }
0x161e   :  { %7130 = vmatpush1.bf16.msra.mxu0 %v10763_v22  ;;  %7171 = vmatpush1.bf16.msra.mxu1 %v10766_v54 }
0x161f   :  { %7131 = vmatprep.subr.bf16.mxu0 %v10769_v0  ;;  %7172 = vmatprep.subr.bf16.mxu1 %v10772_v19  ;;  %v11064_v0 = vld [vmem:[#allocation34_spill] sm:$0xff] }
0x1620   :  { %v6082_v19 = vadd.f32 %v11064_v0, %v10531_v9 }
0x1622   :  { %7132 = vmatpush1.bf16.msra.mxu0 %v10775_v61  ;;  %7173 = vmatpush1.bf16.msra.mxu1 %v10778_v46  ;;  %v11065_v46 = vld [vmem:[#allocation36_spill] sm:$0xff] }
0x1623   :  { %7133 = vmatprep.subr.bf16.mxu0 %v10781_v57  ;;  %7174 = vmatprep.subr.bf16.mxu1 %v10784_v49  ;;  %v6084_v57 = vadd.f32 %v11065_v46, %v10535_v42 }
0x1626   :  { %7134 = vmatpush1.bf16.msra.mxu0 %v10787_v2  ;;  %7175 = vmatpush1.bf16.msra.mxu1 %v10790_v5 }
0x1627   :  { %7135 = vmatprep.subr.bf16.mxu0 %v10793_v39  ;;  %7176 = vmatprep.subr.bf16.mxu1 %v10796_v8 }
0x162a   :  { %7136 = vmatpush1.bf16.msra.mxu0 %v10799_v1  ;;  %7177 = vmatpush1.bf16.msra.mxu1 %v10802_v26 }
0x162b   :  { %7137 = vmatprep.subr.bf16.mxu0 %v10805_v27  ;;  %7178 = vmatprep.subr.bf16.mxu1 %v10808_v28 }
0x162e   :  { %7138 = vmatpush1.bf16.msra.mxu0 %v10811_v29  ;;  %7179 = vmatpush1.bf16.msra.mxu1 %v10814_v30 }
0x162f   :  { %8064 = vmatprep.subr.bf16.mxu0 %v8987_v37 }
0x16d1   :  { %v7042_v45 = vpop.f32.mrf.mxu0  ;;  %v7083_v53 = vpop.f32.mrf.mxu1 }
0x16d2   :  { %v7090_v16 = vadd.f32 %v7042_v45, %v6009_v41  ;;  %v7092_v61 = vadd.f32 %v7083_v53, %v6082_v19 }
0x16d3   :  { %v7044_v24 = vpop.f32.mrf.mxu0  ;;  %v7085_v62 = vpop.f32.mrf.mxu1 }
0x16d4   :  { %v8040_v13 = vmul.f32 -1.442695, %v7090_v16  ;;  %v7091_v59 = vadd.f32 %v7044_v24, %v6011_v10  ;;  %v8042_v49 = vmul.f32 -1.442695, %v7092_v61  ;;  %v7093_v2 = vadd.f32 %v7085_v62, %v6084_v57  ;;  %v11069_v16 = vld [vmem:[#allocation39_spill] sm:$0xff] }
0x16d5   :  { %v7046_v51 = vpop.f32.mrf.mxu0  ;;  %v7087_v25 = vpop.f32.mrf.mxu1  ;;  %v6088_v24 = vadd.f32 %v11069_v16, %v10535_v42 }
0x16d6   :  { %8797 = vpow2.f32 %v8040_v13  ;;  %v8041_v48 = vmul.f32 -1.442695, %v7091_v59 }
0x16d7   :  { %v7047_v22 = vpop.f32.mrf.mxu0  ;;  %v7088_v54 = vpop.f32.mrf.mxu1 }
0x16d8   :  { %8799 = vpow2.f32 %v8041_v48 }
0x16d9   :  { %8801 = vpow2.f32 %v8042_v49 }
0x16da   :  { %8803 = vtanh.f32 %v7093_v2 }
0x16e3   :  { %v8798_v5 = vpop.eup %8797 }
0x16e4   :  { %v7103_v39 = vadd.f32 1.0, %v8798_v5  ;;  %v8046_v5 = vld [vmem:[#allocation4] ss:$0 sm:$0xff] }
0x16e5   :  { %v8800_v8 = vpop.eup %8799 }
0x16e6   :  { %8805 = vrcp.f32 %v7103_v39  ;;  %v7104_v1 = vadd.f32 1.0, %v8800_v8  ;;  %v8802_v26 = vpop.eup %8801 }
0x16e7   :  { %v8804_v27 = vpop.eup %8803  ;;  %v7105_v58 = vadd.f32 1.0, %v8802_v26 }
0x16e8   :  { %8807 = vrcp.f32 %v7104_v1 }
0x16e9   :  { %8809 = vrcp.f32 %v7105_v58 }
0x16f3   :  { %v8806_v28 = vpop.eup %8805 }
0x16f4   :  { %v7114_v29 = vmul.f32 %v8806_v28, %v8804_v27 }
0x16f5   :  { %v8808_v30 = vpop.eup %8807 }
0x16f6   :  { %v7113_v47 = vmul.f32 %v8808_v30, %v10826_v23  ;;  %v8810_v55 = vpop.eup %8809 }
0x16f8   :  { %v10870_v38 = vadd.f32 %v7114_v29, %v7113_v47 }
0x16fa   :  { %8811 = vtanh.f32 %v10870_v38 }
0x1707   :  { %v8812_v11 = vpop.eup %8811 }
0x1708   :  { %v7117_v3 = vmul.f32 %v8812_v11, %v8810_v55 }
0x170a   :  { %v7122_v7 = vpack.c.bf16 %v7117_v3, %v7117_v3 }
0x170c   :  { %7156 = vmatmul.mubr.bf16.vlgmr.msra.gmra.mxu0 %v7122_v7  ;;  %7197 = vmatmul.mubr.bf16.vlgmr.msra.gmra.mxu1 %v7122_v7 }
0x170d   :  { %8065 = vmatpush3.bf16.msra.mxu0 %v8437_v63  ;;  %8080 = vmatprep.mubr.msk.bf16.mxu0 %vm8988_vm3, %v8987_v37 }
0x170e   :  { %8066 = vmatprep.subr.bf16.mxu0 %v8987_v37 }
0x1711   :  { %8067 = vmatpush3.bf16.msra.mxu0 %v8438_v21 }
0x1712   :  { %8068 = vmatprep.subr.bf16.mxu0 %v8987_v37 }
0x1715   :  { %8069 = vmatpush3.bf16.msra.mxu0 %v8439_v12 }
0x1716   :  { %8070 = vmatprep.subr.bf16.mxu0 %v8987_v37 }
0x1719   :  { %8071 = vmatpush3.bf16.msra.mxu0 %v8440_v6 }
0x171a   :  { %8072 = vmatprep.subr.bf16.mxu0 %v8987_v37 }
0x171d   :  { %8073 = vmatpush3.bf16.msra.mxu0 %v8441_v44 }
0x171e   :  { %8074 = vmatprep.subr.bf16.mxu0 %v8987_v37 }
0x1721   :  { %8075 = vmatpush3.bf16.msra.mxu0 %v8442_v15 }
0x1722   :  { %8076 = vmatprep.subr.bf16.mxu0 %v8987_v37 }
0x1725   :  { %8077 = vmatpush3.bf16.msra.mxu0 %v8443_v20 }
0x1726   :  { %8078 = vmatprep.subr.bf16.mxu0 %v8987_v37 }
0x1729   :  { %8079 = vmatpush3.bf16.msra.mxu0 %v8444_v32 }
0x17cc   :  { %v7157_v33 = vpop.f32.mrf.mxu0  ;;  %v7198_v14 = vpop.f32.mrf.mxu1 }
0x17cd   :  { %v7205_v56 = vadd.f32 %v7157_v33, %v6013_v31  ;;  %v7207_v10 = vadd.f32 %v7198_v14, %v6086_v50 }
0x17ce   :  { %v7159_v23 = vpop.f32.mrf.mxu0  ;;  %v7200_v40 = vpop.f32.mrf.mxu1 }
0x17cf   :  { %v8043_v34 = vmul.f32 -1.442695, %v7205_v56  ;;  %v7206_v43 = vadd.f32 %v7159_v23, %v6015_v4  ;;  %v8045_v52 = vmul.f32 -1.442695, %v7207_v10  ;;  %v7208_v62 = vadd.f32 %v7200_v40, %v6088_v24 }
0x17d0   :  { %v7161_v36 = vpop.f32.mrf.mxu0  ;;  %v7202_v60 = vpop.f32.mrf.mxu1 }
0x17d1   :  { %8813 = vpow2.f32 %v8043_v34  ;;  %v8044_v41 = vmul.f32 -1.442695, %v7206_v43 }
0x17d2   :  { %v7162_v45 = vpop.f32.mrf.mxu0  ;;  %v7203_v53 = vpop.f32.mrf.mxu1 }
0x17d3   :  { %8815 = vpow2.f32 %v8044_v41 }
0x17d4   :  { %8817 = vpow2.f32 %v8045_v52 }
0x17d5   :  { %8819 = vtanh.f32 %v7208_v62 }
0x17de   :  { %v8814_v13 = vpop.eup %8813 }
0x17df   :  { %v7218_v59 = vadd.f32 1.0, %v8814_v13 }
0x17e0   :  { %v8816_v51 = vpop.eup %8815 }
0x17e1   :  { %8821 = vrcp.f32 %v7218_v59  ;;  %v7219_v25 = vadd.f32 1.0, %v8816_v51  ;;  %v8818_v48 = vpop.eup %8817 }
0x17e2   :  { %v8820_v22 = vpop.eup %8819  ;;  %v7220_v9 = vadd.f32 1.0, %v8818_v48 }
0x17e3   :  { %8823 = vrcp.f32 %v7219_v25 }
0x17e4   :  { %8825 = vrcp.f32 %v7220_v9 }
0x17ee   :  { %v8822_v54 = vpop.eup %8821 }
0x17ef   :  { %v7229_v0 = vmul.f32 %v8822_v54, %v8820_v22 }
0x17f0   :  { %v8824_v19 = vpop.eup %8823 }
0x17f1   :  { %v7228_v61 = vmul.f32 %v8824_v19, %v10870_v38  ;;  %v8826_v42 = vpop.eup %8825 }
0x17f3   :  { %v7230_v46 = vadd.f32 %v7229_v0, %v7228_v61 }
0x17f5   :  { %8827 = vtanh.f32 %v7230_v46 }
0x1802   :  { %v8828_v57 = vpop.eup %8827 }
0x1803   :  { %v7232_v49 = vmul.f32 %v8828_v57, %v8826_v42 }
0x1805   :  { %v7233_v2 = vpack.c.bf16 %v7232_v49, %v7232_v49 }
0x1807   :  { %8081 = vmatmul.mubr.bf16.vlgmr.msra.gmra.mxu0 %v7233_v2 }
0x18c7   :  { %v7339_v39 = vpop.f32.mrf.mxu0 }
0x18c8   :  { %v7340_v8 = vadd.f32 %v8046_v5, %v7339_v39 }
0x18c9   :  { %v8082_v1 = vpop.f32.mrf.mxu0 }
0x18ca   :  { %7346 = vst.msk [vmem:[%s10921_s12] sm:$0xff] %vm7345_vm4, %v7340_v8 }
0x18cb   :  { %v7342_v26 = vpop.f32.mrf.mxu0 }
0x18cd   :  { %v8083_v27 = vpop.f32.mrf.mxu0 }
0x18ce   :  { %7351 = vsyncpa [#allocation6], 1 }
0x18cf   :  { %7352 = vsyncpa [#allocation8], 1 }
0x18d0   :  { %7353 = vsyncpa [#allocation11], 1 }

</bundles_post_ra>
